<compile_context>
chip_gen: v5e
topology: v5e:2x2
jax: 0.10.0
libtpu: 0.0.40
codegen_flags: <defaults>
</compile_context>

<pallas_src>
import functools

import jax
import jax.numpy as jnp
from jax.experimental import pallas as pl
from jax.experimental.pallas import tpu as pltpu


def _round_up(v, m):
    return (v + m - 1) // m * m


# ----------------------------------------------------------------------------
# Fused forward kernel: one grid step == one batch element (parallel axis)
# ----------------------------------------------------------------------------
def _wavenet_kernel(x_ref, c_ref, wc0_ref, wc1_ref,
                    wlo_ref, whi_ref, wcd_ref, bgf_ref,
                    wres_ref, bres_ref, wskip_ref, bskip_ref,
                    w1_ref, b1_ref, w2_ref, b2_ref,
                    out_ref, h_scr, skip_scr,
                    *, dilations, compute_dtype):
    f32 = jnp.float32
    Tp = c_ref.shape[1]                     # padded time window (multiple of 8)
    hpad = h_scr.shape[0] - Tp              # zero halo in front of the h window
    xoff = x_ref.shape[1] - Tp              # front pad of the x buffer (>= 1)
    res_ch = wres_ref.shape[1]
    sp8 = skip_scr.shape[0]                 # padded skip rows (multiple of 8)
    n_heads, hid, _ = w2_ref.shape

    def mm(a, b):
        return jnp.dot(a, b, preferred_element_type=f32)

    # ---- CausalConv1d: h[t] = W0 @ x[t-1] + W1 @ x[t] (static slices) -------
    x_cur = x_ref[0, xoff:, :]                                  # (Tp, Cin)
    x_prev = x_ref[0, xoff - 1:xoff - 1 + Tp, :]                # (Tp, Cin)
    h_scr[hpad:, :] = mm(x_prev, wc0_ref[...]) + mm(x_cur, wc1_ref[...])
    h_scr[:hpad, :] = jnp.zeros((hpad, res_ch), f32)            # halo stays zero
    skip_scr[...] = jnp.zeros_like(skip_scr)                    # scratch persists: re-init

    # Condition window: cast once, reused by every block.
    cw = c_ref[0].astype(compute_dtype)                         # (Tp, Ccond)

    # ---- Residual stack (unrolled; state lives in VMEM scratch, in place) ---
    for n, d in enumerate(dilations):
        h_hi = h_scr[hpad:, :]                                  # x[t + d] (aligned)
        h_lo = h_scr[hpad - d:hpad - d + Tp, :]                 # x[t]     (shift by d)
        # gate in cols [0:C], filter (pre-scaled by 2) in cols [C:2C]
        gf = (mm(h_lo.astype(compute_dtype), wlo_ref[n])
              + mm(h_hi.astype(compute_dtype), whi_ref[n])
              + mm(cw, wcd_ref[n])
              + bgf_ref[n])                                     # (Tp, 2*Cres) f32
        s = jax.nn.sigmoid(gf)                                  # single EUP pass
        out = (2.0 * s[:, res_ch:] - 1.0) * s[:, :res_ch]       # tanh(f) * sigmoid(g)
        # residual / skip paths stay f32 and are written in place
        h_scr[hpad:, :] = mm(out, wres_ref[n]) + bres_ref[n] + h_hi
        skip_scr[...] += mm(out[Tp - sp8:, :], wskip_ref[n]) + bskip_ref[n]

    # ---- LastNet heads: relu -> (Cskip -> H*512) -> relu -> (512 -> 256) ----
    s_in = jnp.maximum(skip_scr[...], 0.0).astype(compute_dtype)        # relu once
    h1 = jnp.maximum(mm(s_in, w1_ref[...]) + b1_ref[...], 0.0)          # (sp8, H*512)
    h1c = h1.astype(compute_dtype)
    for h in range(n_heads):
        out_ref[0, h] = mm(h1c[:, h * hid:(h + 1) * hid], w2_ref[h]) + b2_ref[h]


# ----------------------------------------------------------------------------
# Wrapper: weight packing, zero-padded inputs, pallas_call, output trim
# ----------------------------------------------------------------------------
def conditional_wavenet_forward(params, x, c, layer_size, stack_size,
                                compute_dtype=jnp.bfloat16):
    """x: (B, T, input_chan)   c: (B, cond_ch, T)
    returns (B, 256, output_size, out_chan)  (matches the torch transposes)."""
    receptive = int(sum(2 ** i for i in range(layer_size)))     # sum of unique dilations
    B, T, in_ch = x.shape
    skip_size = T - receptive
    assert skip_size >= 1, "The data x is too short!"
    dilations = tuple(2 ** l for _ in range(stack_size) for l in range(layer_size))
    assert T - sum(dilations) >= skip_size, "sequence too short for this stack"

    res_ch = params["causal_w"].shape[0]
    skip_ch = params["blocks"][0]["wskip"].shape[0]
    n_heads, hid, _ = params["ln_w1"].shape
    last_out = params["ln_w2"].shape[1]
    cond_ch = c.shape[1]

    f32 = jnp.float32
    Tp = _round_up(T, 8)                       # time window (multiple of 8)
    hpad = _round_up(max(dilations), 8)        # zero halo for the dilated taps
    xoff = 8                                   # causal halo, kept 8-aligned
    sp8 = _round_up(skip_size, 8)              # padded skip rows (trimmed below)

    # ---- one-time weight packing ---------------------------------------------
    # filter weights/bias pre-scaled by 2 so tanh(f) = 2*sigmoid(2f) - 1.
    wc0 = params["causal_w"][:, :, 0].T.astype(f32)             # (Cin, Cres)
    wc1 = params["causal_w"][:, :, 1].T.astype(f32)
    wlo, whi, wcd, bgf, wres, bres, wskip, bskip = ([] for _ in range(8))
    for blk in params["blocks"]:
        wlo.append(jnp.concatenate([blk["wg"][:, :, 0].T, 2.0 * blk["wf"][:, :, 0].T], axis=1))
        whi.append(jnp.concatenate([blk["wg"][:, :, 1].T, 2.0 * blk["wf"][:, :, 1].T], axis=1))
        wcd.append(jnp.concatenate([blk["wcg"].T, 2.0 * blk["wcf"].T], axis=1))
        bgf.append(jnp.concatenate([blk["bcg"][:, 0], 2.0 * blk["bcf"][:, 0]])[None, :])
        wres.append(blk["wres"].T)
        bres.append(blk["bres"][:, 0][None, :])
        wskip.append(blk["wskip"].T)
        bskip.append(blk["bskip"][:, 0][None, :])
    wlo = jnp.stack(wlo).astype(compute_dtype)                  # (n, Cres, 2C)
    whi = jnp.stack(whi).astype(compute_dtype)
    wcd = jnp.stack(wcd).astype(compute_dtype)                  # (n, Ccond, 2C)
    bgf = jnp.stack(bgf).astype(f32)                            # (n, 1, 2C)
    wres = jnp.stack(wres).astype(f32)                          # residual path stays f32
    bres = jnp.stack(bres).astype(f32)
    wskip = jnp.stack(wskip).astype(f32)
    bskip = jnp.stack(bskip).astype(f32)
    w1 = jnp.transpose(params["ln_w1"], (2, 0, 1)).reshape(skip_ch, n_heads * hid).astype(compute_dtype)
    b1 = params["ln_b1"].reshape(1, n_heads * hid).astype(f32)
    w2 = jnp.transpose(params["ln_w2"], (0, 2, 1)).astype(compute_dtype)  # (H, 512, 256)
    b2 = jnp.transpose(params["ln_b2"], (0, 2, 1)).astype(f32)            # (H, 1, 256)

    # ---- zero-padded, right-aligned inputs (static slices inside the kernel) --
    x_pad = jnp.zeros((B, xoff + Tp, in_ch), f32)
    x_pad = x_pad.at[:, xoff + Tp - T:, :].set(x.astype(f32))
    c_pad = jnp.zeros((B, Tp, cond_ch), f32)
    c_pad = c_pad.at[:, Tp - T:, :].set(jnp.transpose(c, (0, 2, 1)).astype(f32))

    weights = [wc0, wc1, wlo, whi, wcd, bgf, wres, bres, wskip, bskip, w1, b1, w2, b2]

    def const_spec(arr):
        shp = tuple(arr.shape)
        return pl.BlockSpec(shp, lambda b: (0,) * len(shp))

    in_specs = [pl.BlockSpec((1, xoff + Tp, in_ch), lambda b: (b, 0, 0)),
                pl.BlockSpec((1, Tp, cond_ch), lambda b: (b, 0, 0))]
    in_specs += [const_spec(w) for w in weights]
    out_specs = pl.BlockSpec((1, n_heads, sp8, last_out), lambda b: (b, 0, 0, 0))

    # ---- explicit VMEM budget -------------------------------------------------
    w_bytes = sum(int(a.size) * a.dtype.itemsize for a in weights)
    est = (2 * ((xoff + Tp) * in_ch + Tp * cond_ch) * 4          # double-buffered inputs
           + 2 * w_bytes                                          # resident weights
           + 2 * n_heads * sp8 * last_out * 4                     # output block
           + ((hpad + Tp) * res_ch + sp8 * skip_ch) * 4           # scratch state
           + 2 * sp8 * n_heads * hid * 4)                         # LastNet intermediate
    vmem_limit = int(min(64 * 2 ** 20, max(16 * 2 ** 20, 2 * est)))

    kern = functools.partial(_wavenet_kernel, dilations=dilations,
                             compute_dtype=compute_dtype)
    out = pl.pallas_call(
        kern,
        out_shape=jax.ShapeDtypeStruct((B, n_heads, sp8, last_out), f32),
        grid_spec=pltpu.PrefetchScalarGridSpec(
            num_scalar_prefetch=0,
            grid=(B,),                                  # batch-parallel (megacore on v7x)
            in_specs=in_specs,
            out_specs=out_specs,
            scratch_shapes=[pltpu.VMEM((hpad + Tp, res_ch), f32),
                            pltpu.VMEM((sp8, skip_ch), f32)]),
        compiler_params=pltpu.CompilerParams(
            dimension_semantics=("parallel",),
            vmem_limit_bytes=vmem_limit),
    )(x_pad, c_pad, *weights)

    # (B, H, sp8, 256) -> trim the padded rows -> (B, 256, skip, H)
    out = out[:, :, sp8 - skip_size:, :]
    return jnp.transpose(out, (0, 3, 2, 1))


# ----------------------------------------------------------------------------
# Parameter init (deterministic, fan-in scaled)
# ----------------------------------------------------------------------------
def init_params(key, layer_size, stack_size, res_ch, skip_ch, input_chan,
                out_chan, cond_ch, hid=512, last_out=256):
    n_blocks = layer_size * stack_size
    keys = iter(jax.random.split(key, 8 + n_blocks * 10 + out_chan * 4))

    def rnd(shape, fan_in):
        return (jax.random.normal(next(keys), shape, jnp.float32)
                / jnp.sqrt(jnp.float32(fan_in)))

    params = {"causal_w": rnd((res_ch, input_chan, 2), 2 * input_chan)}
    blocks = []
    for _ in range(n_blocks):
        blocks.append({
            "wg": rnd((res_ch, res_ch, 2), 2 * res_ch),        # causal_gate (no bias)
            "wf": rnd((res_ch, res_ch, 2), 2 * res_ch),        # causal_filter (no bias)
            "wcg": rnd((res_ch, cond_ch), cond_ch),            # condition_gate
            "bcg": rnd((res_ch, 1), cond_ch),
            "wcf": rnd((res_ch, cond_ch), cond_ch),            # condition_filter
            "bcf": rnd((res_ch, 1), cond_ch),
            "wres": rnd((res_ch, res_ch), res_ch),              # conv_res
            "bres": rnd((res_ch, 1), res_ch),
            "wskip": rnd((skip_ch, res_ch), res_ch),            # conv_skip
            "bskip": rnd((skip_ch, 1), res_ch),
        })
    params["blocks"] = blocks
    params["ln_w1"] = jnp.stack([rnd((hid, skip_ch), skip_ch) for _ in range(out_chan)])
    params["ln_b1"] = jnp.stack([rnd((hid, 1), skip_ch) for _ in range(out_chan)])
    params["ln_w2"] = jnp.stack([rnd((last_out, hid), hid) for _ in range(out_chan)])
    params["ln_b2"] = jnp.stack([rnd((last_out, 1), hid) for _ in range(out_chan)])
    return params


# ----------------------------------------------------------------------------
# Pure-JAX reference (lax.conv) for verification
# ----------------------------------------------------------------------------
def _conv1d(x, w, b=None, dilation=1, padding=0):
    y = jax.lax.conv_general_dilated(
        x, w, window_strides=(1,), padding=[(padding, padding)],
        rhs_dilation=(dilation,), dimension_numbers=("NCH", "OIH", "NCH"),
        precision=jax.lax.Precision.HIGHEST)
    if b is not None:
        y = y + b[None, :, :]
    return y


def ref_forward(params, x, c, layer_size, stack_size):
    receptive = int(sum(2 ** i for i in range(layer_size)))
    h = jnp.transpose(x, (0, 2, 1)).astype(jnp.float32)
    T = h.shape[2]
    skip_size = T - receptive
    h = _conv1d(h, params["causal_w"], padding=1)[:, :, :-1]
    dilations = [2 ** l for _ in range(stack_size) for l in range(layer_size)]
    skips = []
    for blk, d in zip(params["blocks"], dilations):
        out_len = h.shape[2] - d
        c_sl = c[:, :, c.shape[2] - out_len:]
        gate = _conv1d(h, blk["wg"], dilation=d) + _conv1d(c_sl, blk["wcg"][:, :, None], blk["bcg"])
        filt = _conv1d(h, blk["wf"], dilation=d) + _conv1d(c_sl, blk["wcf"][:, :, None], blk["bcf"])
        out = jnp.tanh(filt) * jax.nn.sigmoid(gate)
        skips.append(_conv1d(out, blk["wskip"][:, :, None], blk["bskip"])[:, :, -skip_size:])
        h = _conv1d(out, blk["wres"][:, :, None], blk["bres"]) + h[:, :, -out_len:]
    output = jnp.sum(jnp.stack(skips), axis=0)
    decs = []
    for i in range(params["ln_w1"].shape[0]):
        o = jnp.maximum(output, 0.0)
        o = _conv1d(o, params["ln_w1"][i][:, :, None], params["ln_b1"][i])
        o = jnp.maximum(o, 0.0)
        o = _conv1d(o, params["ln_w2"][i][:, :, None], params["ln_b2"][i])
        decs.append(o)
    decisions = jnp.stack(decs, axis=1)
    return jnp.transpose(decisions, (0, 2, 3, 1))


if __name__ == "__main__":
    # Small, consistent configuration: layer_size=4 -> receptive field = 15
    layer_size, stack_size = 4, 1
    res_ch, skip_ch = 32, 32
    input_chan, out_chan, cond_ch = 12, 4, 12
    B, T = 2, 24

    key = jax.random.PRNGKey(0)
    kp, kx, kc = jax.random.split(key, 3)
    params = init_params(kp, layer_size, stack_size, res_ch, skip_ch,
                         input_chan, out_chan, cond_ch)
    x = jax.random.normal(kx, (B, T, input_chan), jnp.float32)   # [batch, timestep, channels]
    c = jax.random.normal(kc, (B, cond_ch, T), jnp.float32)      # conditioning (acceleration)

    expected_shape = (B, 256, T - (2 ** layer_size - 1), out_chan)
    ref = jax.block_until_ready(ref_forward(params, x, c, layer_size, stack_size))

    # f32 matmul operands (tight check).
    out = jax.block_until_ready(
        conditional_wavenet_forward(params, x, c, layer_size, stack_size,
                                    compute_dtype=jnp.float32))
    assert out.shape == expected_shape, (out.shape, expected_shape)
    err = float(jnp.max(jnp.abs(out - ref)))
    assert err < 1e-2, err

    # Default path: bf16 gate/filter + LastNet matmul operands (residual path stays f32).
    out_bf16 = jax.block_until_ready(
        conditional_wavenet_forward(params, x, c, layer_size, stack_size))
    assert out_bf16.shape == expected_shape, (out_bf16.shape, expected_shape)
    err_bf16 = float(jnp.max(jnp.abs(out_bf16 - ref)))
    assert err_bf16 < 0.25, err_bf16

    print("KERNEL_OK")
</pallas_src>

<mosaic_0001>
module attributes {stable_mosaic.version = 11 : i64} {
  func.func @_wavenet_kernel(%arg0: i32, %arg1: memref<1x32x12xf32, #tpu.memory_space<vmem>>, %arg2: memref<1x24x12xf32, #tpu.memory_space<vmem>>, %arg3: memref<12x32xf32, #tpu.memory_space<vmem>>, %arg4: memref<12x32xf32, #tpu.memory_space<vmem>>, %arg5: memref<4x32x64xf32, #tpu.memory_space<vmem>>, %arg6: memref<4x32x64xf32, #tpu.memory_space<vmem>>, %arg7: memref<4x12x64xf32, #tpu.memory_space<vmem>>, %arg8: memref<4x1x64xf32, #tpu.memory_space<vmem>>, %arg9: memref<4x32x32xf32, #tpu.memory_space<vmem>>, %arg10: memref<4x1x32xf32, #tpu.memory_space<vmem>>, %arg11: memref<4x32x32xf32, #tpu.memory_space<vmem>>, %arg12: memref<4x1x32xf32, #tpu.memory_space<vmem>>, %arg13: memref<32x2048xf32, #tpu.memory_space<vmem>>, %arg14: memref<1x2048xf32, #tpu.memory_space<vmem>>, %arg15: memref<4x512x256xf32, #tpu.memory_space<vmem>>, %arg16: memref<4x1x256xf32, #tpu.memory_space<vmem>>, %arg17: memref<1x4x16x256xf32, #tpu.memory_space<vmem>>, %arg18: memref<32x32xf32, #tpu.memory_space<vmem>>, %arg19: memref<16x32xf32, #tpu.memory_space<vmem>>) attributes {dimension_semantics = [#tpu.dimension_semantics<parallel>], iteration_bounds = array<i64: 2>, scalar_prefetch = 0 : i64, scratch_operands = 2 : i64, tpu.core_type = #tpu.core_type<tc>, window_params = [{transform_indices = @transform_0, window_bounds = array<i64: 1, 32, 12>}, {transform_indices = @transform_1, window_bounds = array<i64: 1, 24, 12>}, {pipeline_mode = #tpu.pipeline_mode<synchronous>, transform_indices = @transform_2, window_bounds = array<i64: 12, 32>}, {pipeline_mode = #tpu.pipeline_mode<synchronous>, transform_indices = @transform_3, window_bounds = array<i64: 12, 32>}, {pipeline_mode = #tpu.pipeline_mode<synchronous>, transform_indices = @transform_4, window_bounds = array<i64: 4, 32, 64>}, {pipeline_mode = #tpu.pipeline_mode<synchronous>, transform_indices = @transform_5, window_bounds = array<i64: 4, 32, 64>}, {pipeline_mode = #tpu.pipeline_mode<synchronous>, transform_indices = @transform_6, window_bounds = array<i64: 4, 12, 64>}, {pipeline_mode = #tpu.pipeline_mode<synchronous>, transform_indices = @transform_7, window_bounds = array<i64: 4, 1, 64>}, {pipeline_mode = #tpu.pipeline_mode<synchronous>, transform_indices = @transform_8, window_bounds = array<i64: 4, 32, 32>}, {pipeline_mode = #tpu.pipeline_mode<synchronous>, transform_indices = @transform_9, window_bounds = array<i64: 4, 1, 32>}, {pipeline_mode = #tpu.pipeline_mode<synchronous>, transform_indices = @transform_10, window_bounds = array<i64: 4, 32, 32>}, {pipeline_mode = #tpu.pipeline_mode<synchronous>, transform_indices = @transform_11, window_bounds = array<i64: 4, 1, 32>}, {pipeline_mode = #tpu.pipeline_mode<synchronous>, transform_indices = @transform_12, window_bounds = array<i64: 32, 2048>}, {pipeline_mode = #tpu.pipeline_mode<synchronous>, transform_indices = @transform_13, window_bounds = array<i64: 1, 2048>}, {pipeline_mode = #tpu.pipeline_mode<synchronous>, transform_indices = @transform_14, window_bounds = array<i64: 4, 512, 256>}, {pipeline_mode = #tpu.pipeline_mode<synchronous>, transform_indices = @transform_15, window_bounds = array<i64: 4, 1, 256>}, {transform_indices = @transform_16, window_bounds = array<i64: 1, 4, 16, 256>}]} {
    %c0 = arith.constant 0 : index
    %c8 = arith.constant 8 : index
    %c0_0 = arith.constant 0 : index
    %0 = vector.load %arg1[%c0, %c8, %c0_0] : memref<1x32x12xf32, #tpu.memory_space<vmem>>, vector<1x24x12xf32>
    %1 = vector.shape_cast %0 : vector<1x24x12xf32> to vector<24x12xf32>
    %c0_1 = arith.constant 0 : index
    %c7 = arith.constant 7 : index
    %c0_2 = arith.constant 0 : index
    %2 = vector.load %arg1[%c0_1, %c7, %c0_2] : memref<1x32x12xf32, #tpu.memory_space<vmem>>, vector<1x24x12xf32>
    %3 = vector.shape_cast %2 : vector<1x24x12xf32> to vector<24x12xf32>
    %c0_3 = arith.constant 0 : index
    %c0_4 = arith.constant 0 : index
    %4 = vector.load %arg3[%c0_3, %c0_4] : memref<12x32xf32, #tpu.memory_space<vmem>>, vector<12x32xf32>
    %cst = arith.constant dense<0.000000e+00> : vector<24x32xf32>
    %5 = tpu.matmul %3, %4, %cst {dimension_numbers = #tpu.dot_dimension_numbers<[1], [0], [0], [1], [0, 0, 1, 1], [], []>} : vector<24x12xf32>, vector<12x32xf32>, vector<24x32xf32> -> vector<24x32xf32>
    %c0_5 = arith.constant 0 : index
    %c0_6 = arith.constant 0 : index
    %6 = vector.load %arg4[%c0_5, %c0_6] : memref<12x32xf32, #tpu.memory_space<vmem>>, vector<12x32xf32>
    %cst_7 = arith.constant dense<0.000000e+00> : vector<24x32xf32>
    %7 = tpu.matmul %1, %6, %cst_7 {dimension_numbers = #tpu.dot_dimension_numbers<[1], [0], [0], [1], [0, 0, 1, 1], [], []>} : vector<24x12xf32>, vector<12x32xf32>, vector<24x32xf32> -> vector<24x32xf32>
    %8 = arith.addf %5, %7 : vector<24x32xf32>
    %c8_8 = arith.constant 8 : index
    %c0_9 = arith.constant 0 : index
    %9 = vector.load %arg18[%c8_8, %c0_9] : memref<32x32xf32, #tpu.memory_space<vmem>>, vector<24x32xf32>
    tpu.vector_store %arg18[%c8_8, %c0_9], %8 {strides = array<i32>} : memref<32x32xf32, #tpu.memory_space<vmem>>, vector<24x32xf32>,
    %cst_10 = arith.constant 0.000000e+00 : f32
    %10 = vector.broadcast %cst_10 : f32 to vector<8x32xf32>
    %c0_11 = arith.constant 0 : index
    %c0_12 = arith.constant 0 : index
    %11 = vector.load %arg18[%c0_11, %c0_12] : memref<32x32xf32, #tpu.memory_space<vmem>>, vector<8x32xf32>
    tpu.vector_store %arg18[%c0_11, %c0_12], %10 {strides = array<i32>} : memref<32x32xf32, #tpu.memory_space<vmem>>, vector<8x32xf32>,
    %cst_13 = arith.constant 0.000000e+00 : f32
    %12 = vector.broadcast %cst_13 : f32 to vector<16x32xf32>
    %c0_14 = arith.constant 0 : index
    %c0_15 = arith.constant 0 : index
    %13 = vector.load %arg19[%c0_14, %c0_15] : memref<16x32xf32, #tpu.memory_space<vmem>>, vector<16x32xf32>
    tpu.vector_store %arg19[%c0_14, %c0_15], %12 {strides = array<i32>} : memref<16x32xf32, #tpu.memory_space<vmem>>, vector<16x32xf32>,
    %c0_16 = arith.constant 0 : index
    %c0_17 = arith.constant 0 : index
    %c0_18 = arith.constant 0 : index
    %14 = vector.load %arg2[%c0_16, %c0_17, %c0_18] : memref<1x24x12xf32, #tpu.memory_space<vmem>>, vector<1x24x12xf32>
    %15 = vector.shape_cast %14 : vector<1x24x12xf32> to vector<24x12xf32>
    %c8_19 = arith.constant 8 : index
    %c0_20 = arith.constant 0 : index
    %16 = vector.load %arg18[%c8_19, %c0_20] : memref<32x32xf32, #tpu.memory_space<vmem>>, vector<24x32xf32>
    %c7_21 = arith.constant 7 : index
    %c0_22 = arith.constant 0 : index
    %17 = vector.load %arg18[%c7_21, %c0_22] : memref<32x32xf32, #tpu.memory_space<vmem>>, vector<24x32xf32>
    %c0_23 = arith.constant 0 : index
    %c0_24 = arith.constant 0 : index
    %c0_25 = arith.constant 0 : index
    %18 = vector.load %arg5[%c0_23, %c0_24, %c0_25] : memref<4x32x64xf32, #tpu.memory_space<vmem>>, vector<1x32x64xf32>
    %19 = vector.shape_cast %18 : vector<1x32x64xf32> to vector<32x64xf32>
    %cst_26 = arith.constant dense<0.000000e+00> : vector<24x64xf32>
    %20 = tpu.matmul %17, %19, %cst_26 {dimension_numbers = #tpu.dot_dimension_numbers<[1], [0], [0], [1], [0, 0, 1, 1], [], []>} : vector<24x32xf32>, vector<32x64xf32>, vector<24x64xf32> -> vector<24x64xf32>
    %c0_27 = arith.constant 0 : index
    %c0_28 = arith.constant 0 : index
    %c0_29 = arith.constant 0 : index
    %21 = vector.load %arg6[%c0_27, %c0_28, %c0_29] : memref<4x32x64xf32, #tpu.memory_space<vmem>>, vector<1x32x64xf32>
    %22 = vector.shape_cast %21 : vector<1x32x64xf32> to vector<32x64xf32>
    %cst_30 = arith.constant dense<0.000000e+00> : vector<24x64xf32>
    %23 = tpu.matmul %16, %22, %cst_30 {dimension_numbers = #tpu.dot_dimension_numbers<[1], [0], [0], [1], [0, 0, 1, 1], [], []>} : vector<24x32xf32>, vector<32x64xf32>, vector<24x64xf32> -> vector<24x64xf32>
    %24 = arith.addf %20, %23 : vector<24x64xf32>
    %c0_31 = arith.constant 0 : index
    %c0_32 = arith.constant 0 : index
    %c0_33 = arith.constant 0 : index
    %25 = vector.load %arg7[%c0_31, %c0_32, %c0_33] : memref<4x12x64xf32, #tpu.memory_space<vmem>>, vector<1x12x64xf32>
    %26 = vector.shape_cast %25 : vector<1x12x64xf32> to vector<12x64xf32>
    %cst_34 = arith.constant dense<0.000000e+00> : vector<24x64xf32>
    %27 = tpu.matmul %15, %26, %cst_34 {dimension_numbers = #tpu.dot_dimension_numbers<[1], [0], [0], [1], [0, 0, 1, 1], [], []>} : vector<24x12xf32>, vector<12x64xf32>, vector<24x64xf32> -> vector<24x64xf32>
    %28 = arith.addf %24, %27 : vector<24x64xf32>
    %c0_35 = arith.constant 0 : index
    %c0_36 = arith.constant 0 : index
    %c0_37 = arith.constant 0 : index
    %29 = vector.load %arg8[%c0_35, %c0_36, %c0_37] : memref<4x1x64xf32, #tpu.memory_space<vmem>>, vector<1x1x64xf32>
    %30 = vector.shape_cast %29 : vector<1x1x64xf32> to vector<1x64xf32>
    %31 = vector.broadcast %30 : vector<1x64xf32> to vector<24x64xf32>
    %32 = arith.addf %28, %31 : vector<24x64xf32>
    %33 = arith.negf %32 : vector<24x64xf32>
    %34 = math.exp %33 : vector<24x64xf32>
    %cst_38 = arith.constant 1.000000e+00 : f32
    %35 = vector.broadcast %cst_38 : f32 to vector<24x64xf32>
    %36 = arith.addf %35, %34 : vector<24x64xf32>
    %37 = arith.divf %35, %36 : vector<24x64xf32>
    %38 = vector.extract_strided_slice %37 {offsets = [0, 32], sizes = [24, 32], strides = [1, 1]} : vector<24x64xf32> to vector<24x32xf32>
    %cst_39 = arith.constant 2.000000e+00 : f32
    %39 = vector.broadcast %cst_39 : f32 to vector<24x32xf32>
    %40 = arith.mulf %39, %38 : vector<24x32xf32>
    %cst_40 = arith.constant 1.000000e+00 : f32
    %41 = vector.broadcast %cst_40 : f32 to vector<24x32xf32>
    %42 = arith.subf %40, %41 : vector<24x32xf32>
    %43 = vector.extract_strided_slice %37 {offsets = [0, 0], sizes = [24, 32], strides = [1, 1]} : vector<24x64xf32> to vector<24x32xf32>
    %44 = arith.mulf %42, %43 : vector<24x32xf32>
    %c0_41 = arith.constant 0 : index
    %c0_42 = arith.constant 0 : index
    %c0_43 = arith.constant 0 : index
    %45 = vector.load %arg9[%c0_41, %c0_42, %c0_43] : memref<4x32x32xf32, #tpu.memory_space<vmem>>, vector<1x32x32xf32>
    %46 = vector.shape_cast %45 : vector<1x32x32xf32> to vector<32x32xf32>
    %cst_44 = arith.constant dense<0.000000e+00> : vector<24x32xf32>
    %47 = tpu.matmul %44, %46, %cst_44 {dimension_numbers = #tpu.dot_dimension_numbers<[1], [0], [0], [1], [0, 0, 1, 1], [], []>} : vector<24x32xf32>, vector<32x32xf32>, vector<24x32xf32> -> vector<24x32xf32>
    %c0_45 = arith.constant 0 : index
    %c0_46 = arith.constant 0 : index
    %c0_47 = arith.constant 0 : index
    %48 = vector.load %arg10[%c0_45, %c0_46, %c0_47] : memref<4x1x32xf32, #tpu.memory_space<vmem>>, vector<1x1x32xf32>
    %49 = vector.shape_cast %48 : vector<1x1x32xf32> to vector<1x32xf32>
    %50 = vector.broadcast %49 : vector<1x32xf32> to vector<24x32xf32>
    %51 = arith.addf %47, %50 : vector<24x32xf32>
    %52 = arith.addf %51, %16 : vector<24x32xf32>
    %c8_48 = arith.constant 8 : index
    %c0_49 = arith.constant 0 : index
    %53 = vector.load %arg18[%c8_48, %c0_49] : memref<32x32xf32, #tpu.memory_space<vmem>>, vector<24x32xf32>
    tpu.vector_store %arg18[%c8_48, %c0_49], %52 {strides = array<i32>} : memref<32x32xf32, #tpu.memory_space<vmem>>, vector<24x32xf32>,
    %c0_50 = arith.constant 0 : index
    %c0_51 = arith.constant 0 : index
    %54 = vector.load %arg19[%c0_50, %c0_51] : memref<16x32xf32, #tpu.memory_space<vmem>>, vector<16x32xf32>
    %55 = vector.extract_strided_slice %44 {offsets = [8, 0], sizes = [16, 32], strides = [1, 1]} : vector<24x32xf32> to vector<16x32xf32>
    %c0_52 = arith.constant 0 : index
    %c0_53 = arith.constant 0 : index
    %c0_54 = arith.constant 0 : index
    %56 = vector.load %arg11[%c0_52, %c0_53, %c0_54] : memref<4x32x32xf32, #tpu.memory_space<vmem>>, vector<1x32x32xf32>
    %57 = vector.shape_cast %56 : vector<1x32x32xf32> to vector<32x32xf32>
    %cst_55 = arith.constant dense<0.000000e+00> : vector<16x32xf32>
    %58 = tpu.matmul %55, %57, %cst_55 {dimension_numbers = #tpu.dot_dimension_numbers<[1], [0], [0], [1], [0, 0, 1, 1], [], []>} : vector<16x32xf32>, vector<32x32xf32>, vector<16x32xf32> -> vector<16x32xf32>
    %c0_56 = arith.constant 0 : index
    %c0_57 = arith.constant 0 : index
    %c0_58 = arith.constant 0 : index
    %59 = vector.load %arg12[%c0_56, %c0_57, %c0_58] : memref<4x1x32xf32, #tpu.memory_space<vmem>>, vector<1x1x32xf32>
    %60 = vector.shape_cast %59 : vector<1x1x32xf32> to vector<1x32xf32>
    %61 = vector.broadcast %60 : vector<1x32xf32> to vector<16x32xf32>
    %62 = arith.addf %58, %61 : vector<16x32xf32>
    %63 = arith.addf %54, %62 : vector<16x32xf32>
    %c0_59 = arith.constant 0 : index
    %c0_60 = arith.constant 0 : index
    %64 = vector.load %arg19[%c0_59, %c0_60] : memref<16x32xf32, #tpu.memory_space<vmem>>, vector<16x32xf32>
    tpu.vector_store %arg19[%c0_59, %c0_60], %63 {strides = array<i32>} : memref<16x32xf32, #tpu.memory_space<vmem>>, vector<16x32xf32>,
    %c8_61 = arith.constant 8 : index
    %c0_62 = arith.constant 0 : index
    %65 = vector.load %arg18[%c8_61, %c0_62] : memref<32x32xf32, #tpu.memory_space<vmem>>, vector<24x32xf32>
    %c6 = arith.constant 6 : index
    %c0_63 = arith.constant 0 : index
    %66 = vector.load %arg18[%c6, %c0_63] : memref<32x32xf32, #tpu.memory_space<vmem>>, vector<24x32xf32>
    %c1 = arith.constant 1 : index
    %c0_64 = arith.constant 0 : index
    %c0_65 = arith.constant 0 : index
    %67 = vector.load %arg5[%c1, %c0_64, %c0_65] : memref<4x32x64xf32, #tpu.memory_space<vmem>>, vector<1x32x64xf32>
    %68 = vector.shape_cast %67 : vector<1x32x64xf32> to vector<32x64xf32>
    %cst_66 = arith.constant dense<0.000000e+00> : vector<24x64xf32>
    %69 = tpu.matmul %66, %68, %cst_66 {dimension_numbers = #tpu.dot_dimension_numbers<[1], [0], [0], [1], [0, 0, 1, 1], [], []>} : vector<24x32xf32>, vector<32x64xf32>, vector<24x64xf32> -> vector<24x64xf32>
    %c1_67 = arith.constant 1 : index
    %c0_68 = arith.constant 0 : index
    %c0_69 = arith.constant 0 : index
    %70 = vector.load %arg6[%c1_67, %c0_68, %c0_69] : memref<4x32x64xf32, #tpu.memory_space<vmem>>, vector<1x32x64xf32>
    %71 = vector.shape_cast %70 : vector<1x32x64xf32> to vector<32x64xf32>
    %cst_70 = arith.constant dense<0.000000e+00> : vector<24x64xf32>
    %72 = tpu.matmul %65, %71, %cst_70 {dimension_numbers = #tpu.dot_dimension_numbers<[1], [0], [0], [1], [0, 0, 1, 1], [], []>} : vector<24x32xf32>, vector<32x64xf32>, vector<24x64xf32> -> vector<24x64xf32>
    %73 = arith.addf %69, %72 : vector<24x64xf32>
    %c1_71 = arith.constant 1 : index
    %c0_72 = arith.constant 0 : index
    %c0_73 = arith.constant 0 : index
    %74 = vector.load %arg7[%c1_71, %c0_72, %c0_73] : memref<4x12x64xf32, #tpu.memory_space<vmem>>, vector<1x12x64xf32>
    %75 = vector.shape_cast %74 : vector<1x12x64xf32> to vector<12x64xf32>
    %cst_74 = arith.constant dense<0.000000e+00> : vector<24x64xf32>
    %76 = tpu.matmul %15, %75, %cst_74 {dimension_numbers = #tpu.dot_dimension_numbers<[1], [0], [0], [1], [0, 0, 1, 1], [], []>} : vector<24x12xf32>, vector<12x64xf32>, vector<24x64xf32> -> vector<24x64xf32>
    %77 = arith.addf %73, %76 : vector<24x64xf32>
    %c1_75 = arith.constant 1 : index
    %c0_76 = arith.constant 0 : index
    %c0_77 = arith.constant 0 : index
    %78 = vector.load %arg8[%c1_75, %c0_76, %c0_77] : memref<4x1x64xf32, #tpu.memory_space<vmem>>, vector<1x1x64xf32>
    %79 = vector.shape_cast %78 : vector<1x1x64xf32> to vector<1x64xf32>
    %80 = vector.broadcast %79 : vector<1x64xf32> to vector<24x64xf32>
    %81 = arith.addf %77, %80 : vector<24x64xf32>
    %82 = arith.negf %81 : vector<24x64xf32>
    %83 = math.exp %82 : vector<24x64xf32>
    %cst_78 = arith.constant 1.000000e+00 : f32
    %84 = vector.broadcast %cst_78 : f32 to vector<24x64xf32>
    %85 = arith.addf %84, %83 : vector<24x64xf32>
    %86 = arith.divf %84, %85 : vector<24x64xf32>
    %87 = vector.extract_strided_slice %86 {offsets = [0, 32], sizes = [24, 32], strides = [1, 1]} : vector<24x64xf32> to vector<24x32xf32>
    %cst_79 = arith.constant 2.000000e+00 : f32
    %88 = vector.broadcast %cst_79 : f32 to vector<24x32xf32>
    %89 = arith.mulf %88, %87 : vector<24x32xf32>
    %cst_80 = arith.constant 1.000000e+00 : f32
    %90 = vector.broadcast %cst_80 : f32 to vector<24x32xf32>
    %91 = arith.subf %89, %90 : vector<24x32xf32>
    %92 = vector.extract_strided_slice %86 {offsets = [0, 0], sizes = [24, 32], strides = [1, 1]} : vector<24x64xf32> to vector<24x32xf32>
    %93 = arith.mulf %91, %92 : vector<24x32xf32>
    %c1_81 = arith.constant 1 : index
    %c0_82 = arith.constant 0 : index
    %c0_83 = arith.constant 0 : index
    %94 = vector.load %arg9[%c1_81, %c0_82, %c0_83] : memref<4x32x32xf32, #tpu.memory_space<vmem>>, vector<1x32x32xf32>
    %95 = vector.shape_cast %94 : vector<1x32x32xf32> to vector<32x32xf32>
    %cst_84 = arith.constant dense<0.000000e+00> : vector<24x32xf32>
    %96 = tpu.matmul %93, %95, %cst_84 {dimension_numbers = #tpu.dot_dimension_numbers<[1], [0], [0], [1], [0, 0, 1, 1], [], []>} : vector<24x32xf32>, vector<32x32xf32>, vector<24x32xf32> -> vector<24x32xf32>
    %c1_85 = arith.constant 1 : index
    %c0_86 = arith.constant 0 : index
    %c0_87 = arith.constant 0 : index
    %97 = vector.load %arg10[%c1_85, %c0_86, %c0_87] : memref<4x1x32xf32, #tpu.memory_space<vmem>>, vector<1x1x32xf32>
    %98 = vector.shape_cast %97 : vector<1x1x32xf32> to vector<1x32xf32>
    %99 = vector.broadcast %98 : vector<1x32xf32> to vector<24x32xf32>
    %100 = arith.addf %96, %99 : vector<24x32xf32>
    %101 = arith.addf %100, %65 : vector<24x32xf32>
    %c8_88 = arith.constant 8 : index
    %c0_89 = arith.constant 0 : index
    %102 = vector.load %arg18[%c8_88, %c0_89] : memref<32x32xf32, #tpu.memory_space<vmem>>, vector<24x32xf32>
    tpu.vector_store %arg18[%c8_88, %c0_89], %101 {strides = array<i32>} : memref<32x32xf32, #tpu.memory_space<vmem>>, vector<24x32xf32>,
    %c0_90 = arith.constant 0 : index
    %c0_91 = arith.constant 0 : index
    %103 = vector.load %arg19[%c0_90, %c0_91] : memref<16x32xf32, #tpu.memory_space<vmem>>, vector<16x32xf32>
    %104 = vector.extract_strided_slice %93 {offsets = [8, 0], sizes = [16, 32], strides = [1, 1]} : vector<24x32xf32> to vector<16x32xf32>
    %c1_92 = arith.constant 1 : index
    %c0_93 = arith.constant 0 : index
    %c0_94 = arith.constant 0 : index
    %105 = vector.load %arg11[%c1_92, %c0_93, %c0_94] : memref<4x32x32xf32, #tpu.memory_space<vmem>>, vector<1x32x32xf32>
    %106 = vector.shape_cast %105 : vector<1x32x32xf32> to vector<32x32xf32>
    %cst_95 = arith.constant dense<0.000000e+00> : vector<16x32xf32>
    %107 = tpu.matmul %104, %106, %cst_95 {dimension_numbers = #tpu.dot_dimension_numbers<[1], [0], [0], [1], [0, 0, 1, 1], [], []>} : vector<16x32xf32>, vector<32x32xf32>, vector<16x32xf32> -> vector<16x32xf32>
    %c1_96 = arith.constant 1 : index
    %c0_97 = arith.constant 0 : index
    %c0_98 = arith.constant 0 : index
    %108 = vector.load %arg12[%c1_96, %c0_97, %c0_98] : memref<4x1x32xf32, #tpu.memory_space<vmem>>, vector<1x1x32xf32>
    %109 = vector.shape_cast %108 : vector<1x1x32xf32> to vector<1x32xf32>
    %110 = vector.broadcast %109 : vector<1x32xf32> to vector<16x32xf32>
    %111 = arith.addf %107, %110 : vector<16x32xf32>
    %112 = arith.addf %103, %111 : vector<16x32xf32>
    %c0_99 = arith.constant 0 : index
    %c0_100 = arith.constant 0 : index
    %113 = vector.load %arg19[%c0_99, %c0_100] : memref<16x32xf32, #tpu.memory_space<vmem>>, vector<16x32xf32>
    tpu.vector_store %arg19[%c0_99, %c0_100], %112 {strides = array<i32>} : memref<16x32xf32, #tpu.memory_space<vmem>>, vector<16x32xf32>,
    %c8_101 = arith.constant 8 : index
    %c0_102 = arith.constant 0 : index
    %114 = vector.load %arg18[%c8_101, %c0_102] : memref<32x32xf32, #tpu.memory_space<vmem>>, vector<24x32xf32>
    %c4 = arith.constant 4 : index
    %c0_103 = arith.constant 0 : index
    %115 = vector.load %arg18[%c4, %c0_103] : memref<32x32xf32, #tpu.memory_space<vmem>>, vector<24x32xf32>
    %c2 = arith.constant 2 : index
    %c0_104 = arith.constant 0 : index
    %c0_105 = arith.constant 0 : index
    %116 = vector.load %arg5[%c2, %c0_104, %c0_105] : memref<4x32x64xf32, #tpu.memory_space<vmem>>, vector<1x32x64xf32>
    %117 = vector.shape_cast %116 : vector<1x32x64xf32> to vector<32x64xf32>
    %cst_106 = arith.constant dense<0.000000e+00> : vector<24x64xf32>
    %118 = tpu.matmul %115, %117, %cst_106 {dimension_numbers = #tpu.dot_dimension_numbers<[1], [0], [0], [1], [0, 0, 1, 1], [], []>} : vector<24x32xf32>, vector<32x64xf32>, vector<24x64xf32> -> vector<24x64xf32>
    %c2_107 = arith.constant 2 : index
    %c0_108 = arith.constant 0 : index
    %c0_109 = arith.constant 0 : index
    %119 = vector.load %arg6[%c2_107, %c0_108, %c0_109] : memref<4x32x64xf32, #tpu.memory_space<vmem>>, vector<1x32x64xf32>
    %120 = vector.shape_cast %119 : vector<1x32x64xf32> to vector<32x64xf32>
    %cst_110 = arith.constant dense<0.000000e+00> : vector<24x64xf32>
    %121 = tpu.matmul %114, %120, %cst_110 {dimension_numbers = #tpu.dot_dimension_numbers<[1], [0], [0], [1], [0, 0, 1, 1], [], []>} : vector<24x32xf32>, vector<32x64xf32>, vector<24x64xf32> -> vector<24x64xf32>
    %122 = arith.addf %118, %121 : vector<24x64xf32>
    %c2_111 = arith.constant 2 : index
    %c0_112 = arith.constant 0 : index
    %c0_113 = arith.constant 0 : index
    %123 = vector.load %arg7[%c2_111, %c0_112, %c0_113] : memref<4x12x64xf32, #tpu.memory_space<vmem>>, vector<1x12x64xf32>
    %124 = vector.shape_cast %123 : vector<1x12x64xf32> to vector<12x64xf32>
    %cst_114 = arith.constant dense<0.000000e+00> : vector<24x64xf32>
    %125 = tpu.matmul %15, %124, %cst_114 {dimension_numbers = #tpu.dot_dimension_numbers<[1], [0], [0], [1], [0, 0, 1, 1], [], []>} : vector<24x12xf32>, vector<12x64xf32>, vector<24x64xf32> -> vector<24x64xf32>
    %126 = arith.addf %122, %125 : vector<24x64xf32>
    %c2_115 = arith.constant 2 : index
    %c0_116 = arith.constant 0 : index
    %c0_117 = arith.constant 0 : index
    %127 = vector.load %arg8[%c2_115, %c0_116, %c0_117] : memref<4x1x64xf32, #tpu.memory_space<vmem>>, vector<1x1x64xf32>
    %128 = vector.shape_cast %127 : vector<1x1x64xf32> to vector<1x64xf32>
    %129 = vector.broadcast %128 : vector<1x64xf32> to vector<24x64xf32>
    %130 = arith.addf %126, %129 : vector<24x64xf32>
    %131 = arith.negf %130 : vector<24x64xf32>
    %132 = math.exp %131 : vector<24x64xf32>
    %cst_118 = arith.constant 1.000000e+00 : f32
    %133 = vector.broadcast %cst_118 : f32 to vector<24x64xf32>
    %134 = arith.addf %133, %132 : vector<24x64xf32>
    %135 = arith.divf %133, %134 : vector<24x64xf32>
    %136 = vector.extract_strided_slice %135 {offsets = [0, 32], sizes = [24, 32], strides = [1, 1]} : vector<24x64xf32> to vector<24x32xf32>
    %cst_119 = arith.constant 2.000000e+00 : f32
    %137 = vector.broadcast %cst_119 : f32 to vector<24x32xf32>
    %138 = arith.mulf %137, %136 : vector<24x32xf32>
    %cst_120 = arith.constant 1.000000e+00 : f32
    %139 = vector.broadcast %cst_120 : f32 to vector<24x32xf32>
    %140 = arith.subf %138, %139 : vector<24x32xf32>
    %141 = vector.extract_strided_slice %135 {offsets = [0, 0], sizes = [24, 32], strides = [1, 1]} : vector<24x64xf32> to vector<24x32xf32>
    %142 = arith.mulf %140, %141 : vector<24x32xf32>
    %c2_121 = arith.constant 2 : index
    %c0_122 = arith.constant 0 : index
    %c0_123 = arith.constant 0 : index
    %143 = vector.load %arg9[%c2_121, %c0_122, %c0_123] : memref<4x32x32xf32, #tpu.memory_space<vmem>>, vector<1x32x32xf32>
    %144 = vector.shape_cast %143 : vector<1x32x32xf32> to vector<32x32xf32>
    %cst_124 = arith.constant dense<0.000000e+00> : vector<24x32xf32>
    %145 = tpu.matmul %142, %144, %cst_124 {dimension_numbers = #tpu.dot_dimension_numbers<[1], [0], [0], [1], [0, 0, 1, 1], [], []>} : vector<24x32xf32>, vector<32x32xf32>, vector<24x32xf32> -> vector<24x32xf32>
    %c2_125 = arith.constant 2 : index
    %c0_126 = arith.constant 0 : index
    %c0_127 = arith.constant 0 : index
    %146 = vector.load %arg10[%c2_125, %c0_126, %c0_127] : memref<4x1x32xf32, #tpu.memory_space<vmem>>, vector<1x1x32xf32>
    %147 = vector.shape_cast %146 : vector<1x1x32xf32> to vector<1x32xf32>
    %148 = vector.broadcast %147 : vector<1x32xf32> to vector<24x32xf32>
    %149 = arith.addf %145, %148 : vector<24x32xf32>
    %150 = arith.addf %149, %114 : vector<24x32xf32>
    %c8_128 = arith.constant 8 : index
    %c0_129 = arith.constant 0 : index
    %151 = vector.load %arg18[%c8_128, %c0_129] : memref<32x32xf32, #tpu.memory_space<vmem>>, vector<24x32xf32>
    tpu.vector_store %arg18[%c8_128, %c0_129], %150 {strides = array<i32>} : memref<32x32xf32, #tpu.memory_space<vmem>>, vector<24x32xf32>,
    %c0_130 = arith.constant 0 : index
    %c0_131 = arith.constant 0 : index
    %152 = vector.load %arg19[%c0_130, %c0_131] : memref<16x32xf32, #tpu.memory_space<vmem>>, vector<16x32xf32>
    %153 = vector.extract_strided_slice %142 {offsets = [8, 0], sizes = [16, 32], strides = [1, 1]} : vector<24x32xf32> to vector<16x32xf32>
    %c2_132 = arith.constant 2 : index
    %c0_133 = arith.constant 0 : index
    %c0_134 = arith.constant 0 : index
    %154 = vector.load %arg11[%c2_132, %c0_133, %c0_134] : memref<4x32x32xf32, #tpu.memory_space<vmem>>, vector<1x32x32xf32>
    %155 = vector.shape_cast %154 : vector<1x32x32xf32> to vector<32x32xf32>
    %cst_135 = arith.constant dense<0.000000e+00> : vector<16x32xf32>
    %156 = tpu.matmul %153, %155, %cst_135 {dimension_numbers = #tpu.dot_dimension_numbers<[1], [0], [0], [1], [0, 0, 1, 1], [], []>} : vector<16x32xf32>, vector<32x32xf32>, vector<16x32xf32> -> vector<16x32xf32>
    %c2_136 = arith.constant 2 : index
    %c0_137 = arith.constant 0 : index
    %c0_138 = arith.constant 0 : index
    %157 = vector.load %arg12[%c2_136, %c0_137, %c0_138] : memref<4x1x32xf32, #tpu.memory_space<vmem>>, vector<1x1x32xf32>
    %158 = vector.shape_cast %157 : vector<1x1x32xf32> to vector<1x32xf32>
    %159 = vector.broadcast %158 : vector<1x32xf32> to vector<16x32xf32>
    %160 = arith.addf %156, %159 : vector<16x32xf32>
    %161 = arith.addf %152, %160 : vector<16x32xf32>
    %c0_139 = arith.constant 0 : index
    %c0_140 = arith.constant 0 : index
    %162 = vector.load %arg19[%c0_139, %c0_140] : memref<16x32xf32, #tpu.memory_space<vmem>>, vector<16x32xf32>
    tpu.vector_store %arg19[%c0_139, %c0_140], %161 {strides = array<i32>} : memref<16x32xf32, #tpu.memory_space<vmem>>, vector<16x32xf32>,
    %c8_141 = arith.constant 8 : index
    %c0_142 = arith.constant 0 : index
    %163 = vector.load %arg18[%c8_141, %c0_142] : memref<32x32xf32, #tpu.memory_space<vmem>>, vector<24x32xf32>
    %c0_143 = arith.constant 0 : index
    %c0_144 = arith.constant 0 : index
    %164 = vector.load %arg18[%c0_143, %c0_144] : memref<32x32xf32, #tpu.memory_space<vmem>>, vector<24x32xf32>
    %c3 = arith.constant 3 : index
    %c0_145 = arith.constant 0 : index
    %c0_146 = arith.constant 0 : index
    %165 = vector.load %arg5[%c3, %c0_145, %c0_146] : memref<4x32x64xf32, #tpu.memory_space<vmem>>, vector<1x32x64xf32>
    %166 = vector.shape_cast %165 : vector<1x32x64xf32> to vector<32x64xf32>
    %cst_147 = arith.constant dense<0.000000e+00> : vector<24x64xf32>
    %167 = tpu.matmul %164, %166, %cst_147 {dimension_numbers = #tpu.dot_dimension_numbers<[1], [0], [0], [1], [0, 0, 1, 1], [], []>} : vector<24x32xf32>, vector<32x64xf32>, vector<24x64xf32> -> vector<24x64xf32>
    %c3_148 = arith.constant 3 : index
    %c0_149 = arith.constant 0 : index
    %c0_150 = arith.constant 0 : index
    %168 = vector.load %arg6[%c3_148, %c0_149, %c0_150] : memref<4x32x64xf32, #tpu.memory_space<vmem>>, vector<1x32x64xf32>
    %169 = vector.shape_cast %168 : vector<1x32x64xf32> to vector<32x64xf32>
    %cst_151 = arith.constant dense<0.000000e+00> : vector<24x64xf32>
    %170 = tpu.matmul %163, %169, %cst_151 {dimension_numbers = #tpu.dot_dimension_numbers<[1], [0], [0], [1], [0, 0, 1, 1], [], []>} : vector<24x32xf32>, vector<32x64xf32>, vector<24x64xf32> -> vector<24x64xf32>
    %171 = arith.addf %167, %170 : vector<24x64xf32>
    %c3_152 = arith.constant 3 : index
    %c0_153 = arith.constant 0 : index
    %c0_154 = arith.constant 0 : index
    %172 = vector.load %arg7[%c3_152, %c0_153, %c0_154] : memref<4x12x64xf32, #tpu.memory_space<vmem>>, vector<1x12x64xf32>
    %173 = vector.shape_cast %172 : vector<1x12x64xf32> to vector<12x64xf32>
    %cst_155 = arith.constant dense<0.000000e+00> : vector<24x64xf32>
    %174 = tpu.matmul %15, %173, %cst_155 {dimension_numbers = #tpu.dot_dimension_numbers<[1], [0], [0], [1], [0, 0, 1, 1], [], []>} : vector<24x12xf32>, vector<12x64xf32>, vector<24x64xf32> -> vector<24x64xf32>
    %175 = arith.addf %171, %174 : vector<24x64xf32>
    %c3_156 = arith.constant 3 : index
    %c0_157 = arith.constant 0 : index
    %c0_158 = arith.constant 0 : index
    %176 = vector.load %arg8[%c3_156, %c0_157, %c0_158] : memref<4x1x64xf32, #tpu.memory_space<vmem>>, vector<1x1x64xf32>
    %177 = vector.shape_cast %176 : vector<1x1x64xf32> to vector<1x64xf32>
    %178 = vector.broadcast %177 : vector<1x64xf32> to vector<24x64xf32>
    %179 = arith.addf %175, %178 : vector<24x64xf32>
    %180 = arith.negf %179 : vector<24x64xf32>
    %181 = math.exp %180 : vector<24x64xf32>
    %cst_159 = arith.constant 1.000000e+00 : f32
    %182 = vector.broadcast %cst_159 : f32 to vector<24x64xf32>
    %183 = arith.addf %182, %181 : vector<24x64xf32>
    %184 = arith.divf %182, %183 : vector<24x64xf32>
    %185 = vector.extract_strided_slice %184 {offsets = [0, 32], sizes = [24, 32], strides = [1, 1]} : vector<24x64xf32> to vector<24x32xf32>
    %cst_160 = arith.constant 2.000000e+00 : f32
    %186 = vector.broadcast %cst_160 : f32 to vector<24x32xf32>
    %187 = arith.mulf %186, %185 : vector<24x32xf32>
    %cst_161 = arith.constant 1.000000e+00 : f32
    %188 = vector.broadcast %cst_161 : f32 to vector<24x32xf32>
    %189 = arith.subf %187, %188 : vector<24x32xf32>
    %190 = vector.extract_strided_slice %184 {offsets = [0, 0], sizes = [24, 32], strides = [1, 1]} : vector<24x64xf32> to vector<24x32xf32>
    %191 = arith.mulf %189, %190 : vector<24x32xf32>
    %c3_162 = arith.constant 3 : index
    %c0_163 = arith.constant 0 : index
    %c0_164 = arith.constant 0 : index
    %192 = vector.load %arg9[%c3_162, %c0_163, %c0_164] : memref<4x32x32xf32, #tpu.memory_space<vmem>>, vector<1x32x32xf32>
    %193 = vector.shape_cast %192 : vector<1x32x32xf32> to vector<32x32xf32>
    %cst_165 = arith.constant dense<0.000000e+00> : vector<24x32xf32>
    %194 = tpu.matmul %191, %193, %cst_165 {dimension_numbers = #tpu.dot_dimension_numbers<[1], [0], [0], [1], [0, 0, 1, 1], [], []>} : vector<24x32xf32>, vector<32x32xf32>, vector<24x32xf32> -> vector<24x32xf32>
    %c3_166 = arith.constant 3 : index
    %c0_167 = arith.constant 0 : index
    %c0_168 = arith.constant 0 : index
    %195 = vector.load %arg10[%c3_166, %c0_167, %c0_168] : memref<4x1x32xf32, #tpu.memory_space<vmem>>, vector<1x1x32xf32>
    %196 = vector.shape_cast %195 : vector<1x1x32xf32> to vector<1x32xf32>
    %197 = vector.broadcast %196 : vector<1x32xf32> to vector<24x32xf32>
    %198 = arith.addf %194, %197 : vector<24x32xf32>
    %199 = arith.addf %198, %163 : vector<24x32xf32>
    %c8_169 = arith.constant 8 : index
    %c0_170 = arith.constant 0 : index
    %200 = vector.load %arg18[%c8_169, %c0_170] : memref<32x32xf32, #tpu.memory_space<vmem>>, vector<24x32xf32>
    tpu.vector_store %arg18[%c8_169, %c0_170], %199 {strides = array<i32>} : memref<32x32xf32, #tpu.memory_space<vmem>>, vector<24x32xf32>,
    %c0_171 = arith.constant 0 : index
    %c0_172 = arith.constant 0 : index
    %201 = vector.load %arg19[%c0_171, %c0_172] : memref<16x32xf32, #tpu.memory_space<vmem>>, vector<16x32xf32>
    %202 = vector.extract_strided_slice %191 {offsets = [8, 0], sizes = [16, 32], strides = [1, 1]} : vector<24x32xf32> to vector<16x32xf32>
    %c3_173 = arith.constant 3 : index
    %c0_174 = arith.constant 0 : index
    %c0_175 = arith.constant 0 : index
    %203 = vector.load %arg11[%c3_173, %c0_174, %c0_175] : memref<4x32x32xf32, #tpu.memory_space<vmem>>, vector<1x32x32xf32>
    %204 = vector.shape_cast %203 : vector<1x32x32xf32> to vector<32x32xf32>
    %cst_176 = arith.constant dense<0.000000e+00> : vector<16x32xf32>
    %205 = tpu.matmul %202, %204, %cst_176 {dimension_numbers = #tpu.dot_dimension_numbers<[1], [0], [0], [1], [0, 0, 1, 1], [], []>} : vector<16x32xf32>, vector<32x32xf32>, vector<16x32xf32> -> vector<16x32xf32>
    %c3_177 = arith.constant 3 : index
    %c0_178 = arith.constant 0 : index
    %c0_179 = arith.constant 0 : index
    %206 = vector.load %arg12[%c3_177, %c0_178, %c0_179] : memref<4x1x32xf32, #tpu.memory_space<vmem>>, vector<1x1x32xf32>
    %207 = vector.shape_cast %206 : vector<1x1x32xf32> to vector<1x32xf32>
    %208 = vector.broadcast %207 : vector<1x32xf32> to vector<16x32xf32>
    %209 = arith.addf %205, %208 : vector<16x32xf32>
    %210 = arith.addf %201, %209 : vector<16x32xf32>
    %c0_180 = arith.constant 0 : index
    %c0_181 = arith.constant 0 : index
    %211 = vector.load %arg19[%c0_180, %c0_181] : memref<16x32xf32, #tpu.memory_space<vmem>>, vector<16x32xf32>
    tpu.vector_store %arg19[%c0_180, %c0_181], %210 {strides = array<i32>} : memref<16x32xf32, #tpu.memory_space<vmem>>, vector<16x32xf32>,
    %c0_182 = arith.constant 0 : index
    %c0_183 = arith.constant 0 : index
    %212 = vector.load %arg19[%c0_182, %c0_183] : memref<16x32xf32, #tpu.memory_space<vmem>>, vector<16x32xf32>
    %cst_184 = arith.constant 0.000000e+00 : f32
    %213 = vector.broadcast %cst_184 : f32 to vector<16x32xf32>
    %214 = arith.maximumf %212, %213 : vector<16x32xf32>
    %c0_185 = arith.constant 0 : index
    %c0_186 = arith.constant 0 : index
    %215 = vector.load %arg13[%c0_185, %c0_186] : memref<32x2048xf32, #tpu.memory_space<vmem>>, vector<32x2048xf32>
    %cst_187 = arith.constant dense<0.000000e+00> : vector<16x2048xf32>
    %216 = tpu.matmul %214, %215, %cst_187 {dimension_numbers = #tpu.dot_dimension_numbers<[1], [0], [0], [1], [0, 0, 1, 1], [], []>} : vector<16x32xf32>, vector<32x2048xf32>, vector<16x2048xf32> -> vector<16x2048xf32>
    %c0_188 = arith.constant 0 : index
    %c0_189 = arith.constant 0 : index
    %217 = vector.load %arg14[%c0_188, %c0_189] : memref<1x2048xf32, #tpu.memory_space<vmem>>, vector<1x2048xf32>
    %218 = vector.broadcast %217 : vector<1x2048xf32> to vector<16x2048xf32>
    %219 = arith.addf %216, %218 : vector<16x2048xf32>
    %cst_190 = arith.constant 0.000000e+00 : f32
    %220 = vector.broadcast %cst_190 : f32 to vector<16x2048xf32>
    %221 = arith.maximumf %219, %220 : vector<16x2048xf32>
    %222 = vector.extract_strided_slice %221 {offsets = [0, 0], sizes = [16, 512], strides = [1, 1]} : vector<16x2048xf32> to vector<16x512xf32>
    %c0_191 = arith.constant 0 : index
    %c0_192 = arith.constant 0 : index
    %c0_193 = arith.constant 0 : index
    %223 = vector.load %arg15[%c0_191, %c0_192, %c0_193] : memref<4x512x256xf32, #tpu.memory_space<vmem>>, vector<1x512x256xf32>
    %224 = vector.shape_cast %223 : vector<1x512x256xf32> to vector<512x256xf32>
    %cst_194 = arith.constant dense<0.000000e+00> : vector<16x256xf32>
    %225 = tpu.matmul %222, %224, %cst_194 {dimension_numbers = #tpu.dot_dimension_numbers<[1], [0], [0], [1], [0, 0, 1, 1], [], []>} : vector<16x512xf32>, vector<512x256xf32>, vector<16x256xf32> -> vector<16x256xf32>
    %c0_195 = arith.constant 0 : index
    %c0_196 = arith.constant 0 : index
    %c0_197 = arith.constant 0 : index
    %226 = vector.load %arg16[%c0_195, %c0_196, %c0_197] : memref<4x1x256xf32, #tpu.memory_space<vmem>>, vector<1x1x256xf32>
    %227 = vector.shape_cast %226 : vector<1x1x256xf32> to vector<1x256xf32>
    %228 = vector.broadcast %227 : vector<1x256xf32> to vector<16x256xf32>
    %229 = arith.addf %225, %228 : vector<16x256xf32>
    %c0_198 = arith.constant 0 : index
    %c0_199 = arith.constant 0 : index
    %c0_200 = arith.constant 0 : index
    %c0_201 = arith.constant 0 : index
    %230 = vector.load %arg17[%c0_198, %c0_199, %c0_200, %c0_201] : memref<1x4x16x256xf32, #tpu.memory_space<vmem>>, vector<1x1x16x256xf32>
    %231 = vector.shape_cast %230 : vector<1x1x16x256xf32> to vector<16x256xf32>
    %232 = vector.shape_cast %229 : vector<16x256xf32> to vector<1x1x16x256xf32>
    tpu.vector_store %arg17[%c0_198, %c0_199, %c0_200, %c0_201], %232 {strides = array<i32>} : memref<1x4x16x256xf32, #tpu.memory_space<vmem>>, vector<1x1x16x256xf32>,
    %233 = vector.extract_strided_slice %221 {offsets = [0, 512], sizes = [16, 512], strides = [1, 1]} : vector<16x2048xf32> to vector<16x512xf32>
    %c1_202 = arith.constant 1 : index
    %c0_203 = arith.constant 0 : index
    %c0_204 = arith.constant 0 : index
    %234 = vector.load %arg15[%c1_202, %c0_203, %c0_204] : memref<4x512x256xf32, #tpu.memory_space<vmem>>, vector<1x512x256xf32>
    %235 = vector.shape_cast %234 : vector<1x512x256xf32> to vector<512x256xf32>
    %cst_205 = arith.constant dense<0.000000e+00> : vector<16x256xf32>
    %236 = tpu.matmul %233, %235, %cst_205 {dimension_numbers = #tpu.dot_dimension_numbers<[1], [0], [0], [1], [0, 0, 1, 1], [], []>} : vector<16x512xf32>, vector<512x256xf32>, vector<16x256xf32> -> vector<16x256xf32>
    %c1_206 = arith.constant 1 : index
    %c0_207 = arith.constant 0 : index
    %c0_208 = arith.constant 0 : index
    %237 = vector.load %arg16[%c1_206, %c0_207, %c0_208] : memref<4x1x256xf32, #tpu.memory_space<vmem>>, vector<1x1x256xf32>
    %238 = vector.shape_cast %237 : vector<1x1x256xf32> to vector<1x256xf32>
    %239 = vector.broadcast %238 : vector<1x256xf32> to vector<16x256xf32>
    %240 = arith.addf %236, %239 : vector<16x256xf32>
    %c0_209 = arith.constant 0 : index
    %c1_210 = arith.constant 1 : index
    %c0_211 = arith.constant 0 : index
    %c0_212 = arith.constant 0 : index
    %241 = vector.load %arg17[%c0_209, %c1_210, %c0_211, %c0_212] : memref<1x4x16x256xf32, #tpu.memory_space<vmem>>, vector<1x1x16x256xf32>
    %242 = vector.shape_cast %241 : vector<1x1x16x256xf32> to vector<16x256xf32>
    %243 = vector.shape_cast %240 : vector<16x256xf32> to vector<1x1x16x256xf32>
    tpu.vector_store %arg17[%c0_209, %c1_210, %c0_211, %c0_212], %243 {strides = array<i32>} : memref<1x4x16x256xf32, #tpu.memory_space<vmem>>, vector<1x1x16x256xf32>,
    %244 = vector.extract_strided_slice %221 {offsets = [0, 1024], sizes = [16, 512], strides = [1, 1]} : vector<16x2048xf32> to vector<16x512xf32>
    %c2_213 = arith.constant 2 : index
    %c0_214 = arith.constant 0 : index
    %c0_215 = arith.constant 0 : index
    %245 = vector.load %arg15[%c2_213, %c0_214, %c0_215] : memref<4x512x256xf32, #tpu.memory_space<vmem>>, vector<1x512x256xf32>
    %246 = vector.shape_cast %245 : vector<1x512x256xf32> to vector<512x256xf32>
    %cst_216 = arith.constant dense<0.000000e+00> : vector<16x256xf32>
    %247 = tpu.matmul %244, %246, %cst_216 {dimension_numbers = #tpu.dot_dimension_numbers<[1], [0], [0], [1], [0, 0, 1, 1], [], []>} : vector<16x512xf32>, vector<512x256xf32>, vector<16x256xf32> -> vector<16x256xf32>
    %c2_217 = arith.constant 2 : index
    %c0_218 = arith.constant 0 : index
    %c0_219 = arith.constant 0 : index
    %248 = vector.load %arg16[%c2_217, %c0_218, %c0_219] : memref<4x1x256xf32, #tpu.memory_space<vmem>>, vector<1x1x256xf32>
    %249 = vector.shape_cast %248 : vector<1x1x256xf32> to vector<1x256xf32>
    %250 = vector.broadcast %249 : vector<1x256xf32> to vector<16x256xf32>
    %251 = arith.addf %247, %250 : vector<16x256xf32>
    %c0_220 = arith.constant 0 : index
    %c2_221 = arith.constant 2 : index
    %c0_222 = arith.constant 0 : index
    %c0_223 = arith.constant 0 : index
    %252 = vector.load %arg17[%c0_220, %c2_221, %c0_222, %c0_223] : memref<1x4x16x256xf32, #tpu.memory_space<vmem>>, vector<1x1x16x256xf32>
    %253 = vector.shape_cast %252 : vector<1x1x16x256xf32> to vector<16x256xf32>
    %254 = vector.shape_cast %251 : vector<16x256xf32> to vector<1x1x16x256xf32>
    tpu.vector_store %arg17[%c0_220, %c2_221, %c0_222, %c0_223], %254 {strides = array<i32>} : memref<1x4x16x256xf32, #tpu.memory_space<vmem>>, vector<1x1x16x256xf32>,
    %255 = vector.extract_strided_slice %221 {offsets = [0, 1536], sizes = [16, 512], strides = [1, 1]} : vector<16x2048xf32> to vector<16x512xf32>
    %c3_224 = arith.constant 3 : index
    %c0_225 = arith.constant 0 : index
    %c0_226 = arith.constant 0 : index
    %256 = vector.load %arg15[%c3_224, %c0_225, %c0_226] : memref<4x512x256xf32, #tpu.memory_space<vmem>>, vector<1x512x256xf32>
    %257 = vector.shape_cast %256 : vector<1x512x256xf32> to vector<512x256xf32>
    %cst_227 = arith.constant dense<0.000000e+00> : vector<16x256xf32>
    %258 = tpu.matmul %255, %257, %cst_227 {dimension_numbers = #tpu.dot_dimension_numbers<[1], [0], [0], [1], [0, 0, 1, 1], [], []>} : vector<16x512xf32>, vector<512x256xf32>, vector<16x256xf32> -> vector<16x256xf32>
    %c3_228 = arith.constant 3 : index
    %c0_229 = arith.constant 0 : index
    %c0_230 = arith.constant 0 : index
    %259 = vector.load %arg16[%c3_228, %c0_229, %c0_230] : memref<4x1x256xf32, #tpu.memory_space<vmem>>, vector<1x1x256xf32>
    %260 = vector.shape_cast %259 : vector<1x1x256xf32> to vector<1x256xf32>
    %261 = vector.broadcast %260 : vector<1x256xf32> to vector<16x256xf32>
    %262 = arith.addf %258, %261 : vector<16x256xf32>
    %c0_231 = arith.constant 0 : index
    %c3_232 = arith.constant 3 : index
    %c0_233 = arith.constant 0 : index
    %c0_234 = arith.constant 0 : index
    %263 = vector.load %arg17[%c0_231, %c3_232, %c0_233, %c0_234] : memref<1x4x16x256xf32, #tpu.memory_space<vmem>>, vector<1x1x16x256xf32>
    %264 = vector.shape_cast %263 : vector<1x1x16x256xf32> to vector<16x256xf32>
    %265 = vector.shape_cast %262 : vector<16x256xf32> to vector<1x1x16x256xf32>
    tpu.vector_store %arg17[%c0_231, %c3_232, %c0_233, %c0_234], %265 {strides = array<i32>} : memref<1x4x16x256xf32, #tpu.memory_space<vmem>>, vector<1x1x16x256xf32>,
    return
  }
  func.func @transform_0(%arg0: i32) -> (i32, i32, i32) {
    %c0_i32 = arith.constant 0 : i32
    %c0_i32_0 = arith.constant 0 : i32
    %c0_i32_1 = arith.constant 0 : i32
    return %arg0, %c0_i32, %c0_i32_0 : i32, i32, i32
  }
  func.func @transform_1(%arg0: i32) -> (i32, i32, i32) {
    %c0_i32 = arith.constant 0 : i32
    %c0_i32_0 = arith.constant 0 : i32
    %c0_i32_1 = arith.constant 0 : i32
    return %arg0, %c0_i32, %c0_i32_0 : i32, i32, i32
  }
  func.func @transform_2(%arg0: i32) -> (i32, i32) {
    %c0_i32 = arith.constant 0 : i32
    %c0_i32_0 = arith.constant 0 : i32
    %c0_i32_1 = arith.constant 0 : i32
    return %c0_i32, %c0_i32_0 : i32, i32
  }
  func.func @transform_3(%arg0: i32) -> (i32, i32) {
    %c0_i32 = arith.constant 0 : i32
    %c0_i32_0 = arith.constant 0 : i32
    %c0_i32_1 = arith.constant 0 : i32
    return %c0_i32, %c0_i32_0 : i32, i32
  }
  func.func @transform_4(%arg0: i32) -> (i32, i32, i32) {
    %c0_i32 = arith.constant 0 : i32
    %c0_i32_0 = arith.constant 0 : i32
    %c0_i32_1 = arith.constant 0 : i32
    %c0_i32_2 = arith.constant 0 : i32
    return %c0_i32, %c0_i32_0, %c0_i32_1 : i32, i32, i32
  }
  func.func @transform_5(%arg0: i32) -> (i32, i32, i32) {
    %c0_i32 = arith.constant 0 : i32
    %c0_i32_0 = arith.constant 0 : i32
    %c0_i32_1 = arith.constant 0 : i32
    %c0_i32_2 = arith.constant 0 : i32
    return %c0_i32, %c0_i32_0, %c0_i32_1 : i32, i32, i32
  }
  func.func @transform_6(%arg0: i32) -> (i32, i32, i32) {
    %c0_i32 = arith.constant 0 : i32
    %c0_i32_0 = arith.constant 0 : i32
    %c0_i32_1 = arith.constant 0 : i32
    %c0_i32_2 = arith.constant 0 : i32
    return %c0_i32, %c0_i32_0, %c0_i32_1 : i32, i32, i32
  }
  func.func @transform_7(%arg0: i32) -> (i32, i32, i32) {
    %c0_i32 = arith.constant 0 : i32
    %c0_i32_0 = arith.constant 0 : i32
    %c0_i32_1 = arith.constant 0 : i32
    %c0_i32_2 = arith.constant 0 : i32
    return %c0_i32, %c0_i32_0, %c0_i32_1 : i32, i32, i32
  }
  func.func @transform_8(%arg0: i32) -> (i32, i32, i32) {
    %c0_i32 = arith.constant 0 : i32
    %c0_i32_0 = arith.constant 0 : i32
    %c0_i32_1 = arith.constant 0 : i32
    %c0_i32_2 = arith.constant 0 : i32
    return %c0_i32, %c0_i32_0, %c0_i32_1 : i32, i32, i32
  }
  func.func @transform_9(%arg0: i32) -> (i32, i32, i32) {
    %c0_i32 = arith.constant 0 : i32
    %c0_i32_0 = arith.constant 0 : i32
    %c0_i32_1 = arith.constant 0 : i32
    %c0_i32_2 = arith.constant 0 : i32
    return %c0_i32, %c0_i32_0, %c0_i32_1 : i32, i32, i32
  }
  func.func @transform_10(%arg0: i32) -> (i32, i32, i32) {
    %c0_i32 = arith.constant 0 : i32
    %c0_i32_0 = arith.constant 0 : i32
    %c0_i32_1 = arith.constant 0 : i32
    %c0_i32_2 = arith.constant 0 : i32
    return %c0_i32, %c0_i32_0, %c0_i32_1 : i32, i32, i32
  }
  func.func @transform_11(%arg0: i32) -> (i32, i32, i32) {
    %c0_i32 = arith.constant 0 : i32
    %c0_i32_0 = arith.constant 0 : i32
    %c0_i32_1 = arith.constant 0 : i32
    %c0_i32_2 = arith.constant 0 : i32
    return %c0_i32, %c0_i32_0, %c0_i32_1 : i32, i32, i32
  }
  func.func @transform_12(%arg0: i32) -> (i32, i32) {
    %c0_i32 = arith.constant 0 : i32
    %c0_i32_0 = arith.constant 0 : i32
    %c0_i32_1 = arith.constant 0 : i32
    return %c0_i32, %c0_i32_0 : i32, i32
  }
  func.func @transform_13(%arg0: i32) -> (i32, i32) {
    %c0_i32 = arith.constant 0 : i32
    %c0_i32_0 = arith.constant 0 : i32
    %c0_i32_1 = arith.constant 0 : i32
    return %c0_i32, %c0_i32_0 : i32, i32
  }
  func.func @transform_14(%arg0: i32) -> (i32, i32, i32) {
    %c0_i32 = arith.constant 0 : i32
    %c0_i32_0 = arith.constant 0 : i32
    %c0_i32_1 = arith.constant 0 : i32
    %c0_i32_2 = arith.constant 0 : i32
    return %c0_i32, %c0_i32_0, %c0_i32_1 : i32, i32, i32
  }
  func.func @transform_15(%arg0: i32) -> (i32, i32, i32) {
    %c0_i32 = arith.constant 0 : i32
    %c0_i32_0 = arith.constant 0 : i32
    %c0_i32_1 = arith.constant 0 : i32
    %c0_i32_2 = arith.constant 0 : i32
    return %c0_i32, %c0_i32_0, %c0_i32_1 : i32, i32, i32
  }
  func.func @transform_16(%arg0: i32) -> (i32, i32, i32, i32) {
    %c0_i32 = arith.constant 0 : i32
    %c0_i32_0 = arith.constant 0 : i32
    %c0_i32_1 = arith.constant 0 : i32
    %c0_i32_2 = arith.constant 0 : i32
    return %arg0, %c0_i32, %c0_i32_0, %c0_i32_1 : i32, i32, i32, i32
  }
}

</mosaic_0001>

<bundles_post_ra>
// kernel: tpu_custom_call.1
= control target key start
LH: loop header
LB: loop body
LE: loop exit
PB: predicated region body
PF: predicated region fallthrough
CT: control target
= control target key end

     0   :  { %s6010_s0 = inlined_call_operand.vmem [shape: f32[2,32,12], index: 0, kind: input, shape index: {}]   ;;  %s6011_s1 = inlined_call_operand.vmem [shape: f32[2,24,12], index: 1, kind: input, shape index: {}]   ;;  %s6012_s2 = inlined_call_operand.hbm [shape: f32[12,32], index: 2, kind: input, shape index: {}]   ;;  %s6013_s3 = inlined_call_operand.hbm [shape: f32[12,32], index: 3, kind: input, shape index: {}]   ;;  %s6014_s4 = inlined_call_operand.hbm [shape: f32[4,32,64], index: 4, kind: input, shape index: {}]   ;;  %s6015_s5 = inlined_call_operand.hbm [shape: f32[4,32,64], index: 5, kind: input, shape index: {}]   ;;  %s6016_s6 = inlined_call_operand.vmem [shape: f32[4,12,64], index: 6, kind: input, shape index: {}]   ;;  %s6017_s7 = inlined_call_operand.hbm [shape: f32[4,1,64], index: 7, kind: input, shape index: {}]   ;;  %s6018_s8 = inlined_call_operand.hbm [shape: f32[4,32,32], index: 8, kind: input, shape index: {}]   ;;  %s6019_s9 = inlined_call_operand.hbm [shape: f32[4,1,32], index: 9, kind: input, shape index: {}]   ;;  %s6020_s10 = inlined_call_operand.hbm [shape: f32[4,32,32], index: 10, kind: input, shape index: {}]   ;;  %s6021_s11 = inlined_call_operand.hbm [shape: f32[4,1,32], index: 11, kind: input, shape index: {}]   ;;  %s6022_s12 = inlined_call_operand.hbm [shape: f32[32,2048], index: 12, kind: input, shape index: {}]   ;;  %s6023_s13 = inlined_call_operand.hbm [shape: f32[1,2048], index: 13, kind: input, shape index: {}]   ;;  %s6024_s14 = inlined_call_operand.hbm [shape: f32[4,512,256], index: 14, kind: input, shape index: {}]   ;;  %s6025_s15 = inlined_call_operand.hbm [shape: f32[4,1,256], index: 15, kind: input, shape index: {}]   ;;  %s6026_s16 = inlined_call_operand.hbm [shape: f32[2,4,16,256], index: 16, kind: output, shape index: {}]  }
   0x1   :  { %6038 = sst [smem:[#allocation41_spill]] %s6010_s0 }
   0x2   :  { %6039 = sst [smem:[#allocation42_spill]] %s6013_s3 }
   0x3   :  { %6040 = sst [smem:[#allocation43_spill]] %s6015_s5 }
   0x4   :  { %6041 = sst [smem:[#allocation44_spill]] %s6018_s8 }
   0x5   :  { %6042 = sst [smem:[#allocation45_spill]] %s6020_s10 }
   0x6   :  { %6043 = sst [smem:[#allocation46_spill]] %s6026_s16 }
   0x7   :  { %21 = vsyncpa [#allocation5], 0 }
   0x8   :  { %22 = vsyncpa [#allocation8], 0 }
   0x9   :  { %23 = vsyncpa [#allocation11], 0 }
   0xa   :  { %24 = vsyncpa [#allocation14], 0 }
   0xb   :  { %25 = vsyncpa [#allocation17], 0 }
   0xc   :  { %26 = vsyncpa [#allocation20], 0 }
   0xd   :  { %27 = vsyncpa [#allocation23], 0 }
   0xe   :  { %28 = vsyncpa [#allocation6], 0 }
   0xf   :  { %30 = vsyncpa [#allocation6 + $0x1], 0  ;;  %s5110_s21 = smov 0   ;;  %s5112_s22 = smov 0  }
  0x10   :  { %s5114_s23 = smov 0   ;;  %s5116_s24 = smov 0  }
  0x11 LB: > { %6044 = sst [smem:[#allocation34_spill]] %s4985_s21  ;;  %s5131_s25 = sadd.s32 4294967295, %s4997_s24   ;;  %s4997_s24 = sphi %s5116_s24, %s6067_s24   ;;  %s4993_s23 = sphi %s5114_s23, %s6069_s23   ;;  %s4989_s22 = sphi %s5112_s22, %s6071_s22   ;;  %s4985_s21 = sphi %s5110_s21, %s6070_s21  }
  0x12   : > { %6045 = sst [smem:[#allocation35_spill]] %s4993_s23  ;;  %s4079_s26 = sadd.s32 4294967294, %s4997_s24  }
  0x13   : > { %6046 = sst [smem:[#allocation36_spill]] %s4997_s24  ;;  %s5135_s27 = sadd.s32 1, %s4997_s24  }
  0x14   : > { %6047 = sst [smem:[#allocation37_spill]] %s5135_s27  ;;  %s389_s28 = sadd.s32 1, %s4993_s23 }
  0x15   : > { %s386_s29 = ssub.s32 %s4997_s24, %s5135_s27  ;;  %p399_p0 = scmp.ne.s32.totalorder %s4993_s23, %s4989_s22 }
  0x16   : > { %p387_p1 = scmp.eq.s32.totalorder %s386_s29, 0  ;;  %p400_p2 = scmp.eq.s32.totalorder %s5131_s25, 1 }
  0x17   : > { %p405_p3 = scmp.ne.s32.totalorder %s4989_s22, %s4985_s21  ;;  %p406_p4 = scmp.eq.s32.totalorder %s4079_s26, 1 }
  0x18   : > { %s5146_s30 = scalar_select %p387_p1, %s4993_s23, %s389_s28  }
  0x19   : > { %p5148_p5 = por %p400_p2, %p399_p0  ;;  %p5152_p6 = por %p406_p4, %p405_p3 }
  0x1a   : > { %6048 = sst [smem:[#allocation38_spill]] %s5146_s30  ;;  %p4080_p7 = scmp.ge.s32.totalorder %s4997_s24, 1 }
  0x1b   : > { %s6049_s0 = scalar_select %p5148_p5, 1, 0 }
  0x1c   : > { %s6051_s17 = scalar_select %p5152_p6, 1, 0 }
  0x1d   : > { %6050 = sst [smem:[#allocation39_spill]] %s6049_s0  ;;  %p413_p8 = scmp.lt.s32.totalorder %s4997_s24, 3 }
  0x1e   : > { %6052 = sst [smem:[#allocation40_spill]] %s6051_s17  ;;  %p4369_p9 = scmp.eq.s32.totalorder %s5131_s25, 0 }
  0x1f   : > { %p5159_p10 = pnand %p4080_p7, %p413_p8  ;;  %s6054_s3 = sld [smem:[#allocation42_spill]] }
  0x20   : > { %s6055_s5 = sld [smem:[#allocation43_spill]]  ;;  %s4999_s27 = smov [#allocation7]  }
  0x21   : > { %p4325_p11 = pneg %p5159_p10  ;;  %s440_s17 = sshll.u32 %s4999_s27, 4  ;;  %s441_s17 = int_to_ptr.vmem [resolvable:$true] %s440_s17 }
  0x22   : > { %s5000_s19 = smov 128   ;;  %s6036_s20 = smov 8  }
  0x23   : > { %p5173_p12 = pnand %p4369_p9, %p4325_p11  ;;  %s5002_s28 = smov [#allocation10]  }
  0x24   : > { %s468_s29 = sshll.u32 %s5002_s28, 4  ;;  %s6057_s8 = sld [smem:[#allocation44_spill]]  ;;  %s469_s29 = int_to_ptr.vmem [resolvable:$true] %s468_s29 }
  0x25   : > { %s438_s26 = sshll.u32 %s6054_s3, 4  ;;  %s6058_s10 = sld [smem:[#allocation45_spill]]  ;;  %s439_s26 = int_to_ptr.hbm [resolvable:$true] %s438_s26 }
  0x26   : > { %s466_s30 = sshll.u32 %s6055_s5, 4  ;;  %s5003_s16 = smov [#allocation13]   ;;  %s467_s30 = int_to_ptr.hbm [resolvable:$true] %s466_s30 }
  0x27   : > { %4331 = dma.hbm_to_vmem [thread:$0]  (!%p5173_p12), %s439_s26, 256, %s441_s17, [#allocation8], %s5000_s19, %s5000_s19, %s6036_s20  }
  0x28   : > { %4337 = dma.hbm_to_vmem [thread:$0]  (!%p5173_p12), %s467_s30, 2048, %s469_s29, [#allocation11], %s5000_s19, %s5000_s19, %s6036_s20  }
  0x29   : > { %s499_s17 = sshll.u32 %s5003_s16, 4  ;;  %s5004_s3 = smov [#allocation16]   ;;  %s500_s17 = int_to_ptr.vmem [resolvable:$true] %s499_s17 }
  0x2a   : > { %s497_s21 = sshll.u32 %s6057_s8, 4  ;;  %s527_s5 = sshll.u32 %s5004_s3, 4  ;;  %s498_s21 = int_to_ptr.hbm [resolvable:$true] %s497_s21  ;;  %s528_s5 = int_to_ptr.vmem [resolvable:$true] %s527_s5 }
  0x2b   : > { %s525_s0 = sshll.u32 %s6058_s10, 4  ;;  %s553_s30 = sshll.u32 %s6022_s12, 4  ;;  %s526_s0 = int_to_ptr.hbm [resolvable:$true] %s525_s0  ;;  %s554_s30 = int_to_ptr.hbm [resolvable:$true] %s553_s30 }
  0x2c   : > { %4343 = dma.hbm_to_vmem [thread:$0]  (!%p5173_p12), %s498_s21, 2048, %s500_s17, [#allocation14], %s5000_s19, %s5000_s19, %s6036_s20  }
  0x2d   : > { %4349 = dma.hbm_to_vmem [thread:$0]  (!%p5173_p12), %s526_s0, 2048, %s528_s5, [#allocation17], %s5000_s19, %s5000_s19, %s6036_s20  }
  0x2e   : > { %s5005_s16 = smov [#allocation19]   ;;  %s579_s21 = sshll.u32 %s6024_s14, 4  ;;  %s580_s21 = int_to_ptr.hbm [resolvable:$true] %s579_s21 }
  0x2f   : > { %s555_s24 = sshll.u32 %s5005_s16, 4  ;;  %s5006_s17 = smov 2048   ;;  %s556_s24 = int_to_ptr.vmem [resolvable:$true] %s555_s24 }
  0x30   : > { %4355 = dma.hbm_to_vmem [thread:$0]  (!%p5173_p12), %s554_s30, 8192, %s556_s24, [#allocation20], %s5006_s17, %s5006_s17, %s5000_s19  }
  0x31   : > { %s5007_s3 = smov [#allocation22]   ;;  %s424_s0 = sshll.u32 %s6012_s2, 4  ;;  %s425_s0 = int_to_ptr.hbm [resolvable:$true] %s424_s0 }
  0x32   : > { %s581_s26 = sshll.u32 %s5007_s3, 4  ;;  %s5008_s5 = smov 256   ;;  %s582_s26 = int_to_ptr.vmem [resolvable:$true] %s581_s26 }
  0x33   : > { %s5009_s16 = smov 16   ;;  %s5010_s29 = smov [#allocation4]  }
  0x34   : > { %4361 = dma.hbm_to_vmem [thread:$0]  (!%p5173_p12), %s580_s21, 65536, %s582_s26, [#allocation23], %s5008_s5, %s5008_s5, %s5009_s16  }
  0x35   : > { %s426_s27 = sshll.u32 %s5010_s29, 4  ;;  %s452_s30 = sshll.u32 %s6014_s4, 4  ;;  %s427_s27 = int_to_ptr.vmem [resolvable:$true] %s426_s27  ;;  %s453_s30 = int_to_ptr.hbm [resolvable:$true] %s452_s30 }
  0x36   : > { %s6059_s24 = smov 8   ;;  %s483_s3 = sshll.u32 %s6017_s7, 4  ;;  %s484_s3 = int_to_ptr.hbm [resolvable:$true] %s483_s3 }
  0x37   : > { %4328 = dma.hbm_to_vmem [thread:$0]  (!%p5173_p12), %s425_s0, 256, %s427_s27, [#allocation5], %s5000_s19, %s5000_s19, %s6059_s24  }
  0x38   : > { %s5011_s21 = smov [#allocation9]   ;;  %s5012_s10 = smov [#allocation12]  }
  0x39   : > { %s454_s26 = sshll.u32 %s5011_s21, 4  ;;  %s485_s20 = sshll.u32 %s5012_s10, 4  ;;  %s455_s26 = int_to_ptr.vmem [resolvable:$true] %s454_s26  ;;  %s486_s20 = int_to_ptr.vmem [resolvable:$true] %s485_s20 }
  0x3a   : > { %4334 = dma.hbm_to_vmem [thread:$0]  (!%p5173_p12), %s453_s30, 2048, %s455_s26, [#allocation8], %s5000_s19, %s5000_s19, %s6059_s24  }
  0x3b   : > { %s511_s0 = sshll.u32 %s6019_s9, 4  ;;  %s5013_s29 = smov 1   ;;  %s512_s0 = int_to_ptr.hbm [resolvable:$true] %s511_s0 }
  0x3c   : > { %4340 = dma.hbm_to_vmem [thread:$0]  (!%p5173_p12), %s484_s3, 64, %s486_s20, [#allocation11], %s5009_s16, %s5009_s16, %s5013_s29  }
  0x3d   : > { %s5014_s27 = smov [#allocation15]   ;;  %s539_s19 = sshll.u32 %s6021_s11, 4  ;;  %s540_s19 = int_to_ptr.hbm [resolvable:$true] %s539_s19 }
  0x3e   : > { %s513_s8 = sshll.u32 %s5014_s27, 4  ;;  %s568_s26 = sshll.u32 %s6023_s13, 4  ;;  %s514_s8 = int_to_ptr.vmem [resolvable:$true] %s513_s8  ;;  %s569_s26 = int_to_ptr.hbm [resolvable:$true] %s568_s26 }
  0x3f   : > { %4346 = dma.hbm_to_vmem [thread:$0]  (!%p5173_p12), %s512_s0, 64, %s514_s8, [#allocation14], %s5009_s16, %s5009_s16, %s5013_s29  }
  0x40   : > { %s5015_s10 = smov [#allocation18]   ;;  %s5016_s20 = smov [#allocation21]  }
  0x41   : > { %s541_s3 = sshll.u32 %s5015_s10, 4  ;;  %s570_s28 = sshll.u32 %s5016_s20, 4  ;;  %s542_s3 = int_to_ptr.vmem [resolvable:$true] %s541_s3  ;;  %s571_s28 = int_to_ptr.vmem [resolvable:$true] %s570_s28 }
  0x42   : > { %4352 = dma.hbm_to_vmem [thread:$0]  (!%p5173_p12), %s540_s19, 64, %s542_s3, [#allocation17], %s5009_s16, %s5009_s16, %s5013_s29  }
  0x43   : > { %s593_s17 = sshll.u32 %s6025_s15, 4  ;;  %s5017_s0 = smov [#allocation24]   ;;  %s594_s17 = int_to_ptr.hbm [resolvable:$true] %s593_s17 }
  0x44   : > { %4358 = dma.hbm_to_vmem [thread:$0]  (!%p5173_p12), %s569_s26, 256, %s571_s28, [#allocation20]  }
  0x45   : > { %s595_s8 = sshll.u32 %s5017_s0, 4  ;;  %s5018_s21 = smov 32   ;;  %s596_s8 = int_to_ptr.vmem [resolvable:$true] %s595_s8 }
  0x46   : > { %s5019_s30 = smov 2   ;;  %627 = sbr.rel (%p5159_p10) target bundleno = 2881 (0xb41), region = 84 }
  0x47   : > { %4364 = dma.hbm_to_vmem [thread:$0]  (!%p5173_p12), %s594_s17, 128, %s596_s8, [#allocation23], %s5018_s21, %s5018_s21, %s5019_s30  }
  0x4b   : > { %4952 = dma.done.wait (%p4369_p9), [#allocation5], 256  }
  0x4c   : > { %4954 = vsyncadd (%p4369_p9), [#allocation5], 4294967040 }
  0x4d   : > { %4956 = dma.done.wait (%p4369_p9), [#allocation8], 2304  }
  0x4e   : > { %4958 = vsyncadd (%p4369_p9), [#allocation8], 4294964992 }
  0x4f   : > { %4960 = dma.done.wait (%p4369_p9), [#allocation11], 2112  }
  0x50   : > { %4962 = vsyncadd (%p4369_p9), [#allocation11], 4294965184 }
  0x51   : > { %4964 = dma.done.wait (%p4369_p9), [#allocation14], 2112  }
  0x52   : > { %4966 = vsyncadd (%p4369_p9), [#allocation14], 4294965184 }
  0x53   : > { %4968 = dma.done.wait (%p4369_p9), [#allocation17], 2112  }
  0x54   : > { %4970 = vsyncadd (%p4369_p9), [#allocation17], 4294965184 }
  0x55   : > { %4972 = dma.done.wait (%p4369_p9), [#allocation20], 8448  }
  0x56   : > { %4974 = vsyncadd (%p4369_p9), [#allocation20], 4294958848 }
  0x57   : > { %4976 = dma.done.wait (%p4369_p9), [#allocation23], 65664  }
  0x58   : > { %4978 = vsyncadd (%p4369_p9), [#allocation23], 4294901632  ;;  %p743_p13 = scmp.lt.s32.totalorder %s5131_s25, 1  ;;  %vm773_vm0 = vcmask 1043456   ;;  %s6060_s19 = sld [smem:[#allocation41_spill]]  ;;  %v761_v2 = vld [vmem:[#allocation7] sm:$0xff] }
  0x59   : > { %v762_v0 = vld [vmem:[#allocation7 + $0x8] sm:$0xf]  ;;  %v760_v1 = vld [vmem:[#allocation4 + $0x8] sm:$0xf]  ;;  %v759_v3 = vld [vmem:[#allocation4] sm:$0xff]  ;;  %vm763_vm1 = vcmask 97280  }
  0x5a   : > { %s5294_s23 = scalar_select %p743_p13, %s5131_s25, 1  ;;  %4113 = vmatpush.msk.msra.mxu0 %vm773_vm0, %v762_v0  ;;  %4117 = vmatpush.msk.msra.mxu1 %vm773_vm0, %v760_v1  ;;  %vm841_vm2 = vcmask 261120   ;;  %v864_v10 = vld [vmem:[#allocation10 + $0x18] sm:$0xff]  ;;  %v863_v12 = vld [vmem:[#allocation10 + $0x10] sm:$0xff]  ;;  %v5020_v13 = vmov 0.0   ;;  %v862_v15 = vld [vmem:[#allocation10 + $0x8] sm:$0xff] }
  0x5b   : > { %v860_v11 = vld [vmem:[#allocation9 + $0x18] sm:$0xff]  ;;  %845 = vst.msk [vmem:[#allocation2] sm:$0xff] %vm841_vm2, %v5020_v13  ;;  %886 = vmatpush.msra.mxu2 %v864_v10  ;;  %v859_v14 = vld [vmem:[#allocation9 + $0x10] sm:$0xff]  ;;  %v858_v16 = vld [vmem:[#allocation9 + $0x8] sm:$0xff]  ;;  %s5021_s0 = smov 32   ;;  %s5022_s8 = smov 96  }
  0x5c   : > { %s4260_s18 = sshll.u32 %s5294_s23, 5  ;;  %792 = vmatpush.msra.mxu0 %v761_v2  ;;  %830 = vmatpush.msra.mxu1 %v759_v3  ;;  %846 = vst.msk [vmem:[#allocation3] sm:$0xff] %vm841_vm2, %v5020_v13  ;;  %v861_v17 = vld [vmem:[#allocation10] sm:$0xff]  ;;  %s4270_s26 = smul.u32 24, %s5294_s23  ;;  %v936_v19 = vld [vmem:[%s6016_s6 + $0x8] sm:$0xf] }
  0x5d   : > { %921 = vmatpush.msra.mxu3 %v860_v11  ;;  %847 = vst.msk [vmem:[#allocation3 + $0x8] sm:$0xff] %vm841_vm2, %v5020_v13  ;;  %887 = vmatpush.msra.mxu2 %v863_v12  ;;  %v857_v18 = vld [vmem:[#allocation9] sm:$0xff]  ;;  %v935_v20 = vld [vmem:[%s6016_s6] sm:$0xff]  ;;  %s740_s28 = sand.u32 1, %s4989_s22   ;;  %s4261_s17 = sshll.u32 %s5131_s25, 7 }
  0x5e   : > { %s747_s24 = scalar_lea.vmem %s6060_s19, %s4260_s18  ;;  %s5318_s5 = scalar_lea.vmem %s6011_s1, %s4270_s26  ;;  %4127 = vmatpush.msk.msrb.mxu0 %vm773_vm0, %v936_v19  ;;  %v4454_v43 = vld [vmem:[#allocation12] ss:$0 sm:$0xff] }
  0x5f   : > { %v753_v4 = vld [vmem:[%s747_s24 + $0x8] sm:$0xff]  ;;  %v754_v6 = vld [vmem:[%s747_s24 + $0x10] sm:$0xff]  ;;  %v755_v8 = vld [vmem:[%s747_s24 + $0x18] sm:$0xff]  ;;  %922 = vmatpush.msra.mxu3 %v859_v14  ;;  %888 = vmatpush.msra.mxu2 %v862_v15  ;;  %s6061_s21 = sld [smem:[#allocation46_spill]]  ;;  %s3864_s25 = scalar_lea.sflag [#allocation6], %s740_s28 }
  0x60   : > { %v756_v5 = vld [vmem:[%s747_s24 + $0x7] sm:$0xff]  ;;  %4114 = vmatmul.msk.f32.vlgmr.msra.gmra.mxu0 %vm763_vm1, %v753_v4  ;;  %v757_v7 = vld [vmem:[%s747_s24 + $0xf] sm:$0xff]  ;;  %v758_v9 = vld [vmem:[%s747_s24 + $0x17] sm:$0xff] }
  0x61   : > { %4118 = vmatmul.msk.f32.vlgmr.msra.gmra.mxu1 %vm763_vm1, %v756_v5  ;;  %923 = vmatpush.msra.mxu3 %v858_v16  ;;  %v5325_v21 = vld [vmem:[%s5318_s5] sm:$0xff]  ;;  %v5330_v22 = vld [vmem:[%s5318_s5 + $0x8] sm:$0xff]  ;;  %v5335_v25 = vld [vmem:[%s5318_s5 + $0x10] sm:$0xff] }
  0x62   : > { %889 = vmatpush.msra.mxu2 %v861_v17  ;;  %964 = vmatpush.msrb.mxu0 %v935_v20 }
  0x63   : > { %924 = vmatpush.msra.mxu3 %v857_v18 }
  0x65   : > { %s6062_s30 = smov %s6061_s21  ;;  %s3875_s23 = scalar_lea.hbm %s6061_s21, %s4261_s17 }
  0x66   : > { %s3878_s29 = sshll.u32 %s3875_s23, 4  ;;  %s4927_s3 = scalar_lea.hbm %s6062_s30, 256  ;;  %s3879_s29 = int_to_ptr.hbm [resolvable:$true] %s3878_s29 }
  0x67   : > { %s4921_s19 = sshra.s32 %s3879_s29, 4  ;;  %s4922_s19 = int_to_ptr.hbm [resolvable:$true] %s4921_s19 }
  0x68   : > { %4115 = vmatmul.msk.f32.gmra.mxu0 %vm763_vm1, %v754_v6  ;;  %s4923_s24 = scalar_lea.hbm %s4922_s19, 128  ;;  %p4928_p3 = scmp.lt.s32.totalorder %s4922_s19, %s6062_s30 }
  0x69   : > { %4119 = vmatmul.msk.f32.gmra.mxu1 %vm763_vm1, %v757_v7  ;;  %p4924_p0 = scmp.ne.s32.totalorder %s4922_s19, %s4923_s24  ;;  %p4929_p4 = scmp.lt.s32.totalorder %s4927_s3, %s4923_s24 }
  0x6b   : > { %p4925_p1 = pnand %p4924_p0, %p5148_p5  ;;  %p4930_p7 = por %p4929_p4, %p4928_p3 }
  0x6d   : > { %p4926_p2 = pneg %p4925_p1 }
  0x6f   : > { %p4931_p8 = pnand %p4930_p7, %p4926_p2 }
  0x70   : > { %4116 = vmatmul.msk.f32.gmra.mxu0 %vm763_vm1, %v755_v8 }
  0x71   : > { %4120 = vmatmul.msk.f32.gmra.mxu1 %vm763_vm1, %v758_v9 }
  0x78   : > { %4128 = vmatmul.msk.f32.vlgmr.msrb.gmra.mxu0 %vm763_vm1, %v5325_v21 }
  0x80   : > { %4129 = vmatmul.msk.f32.gmra.mxu0 %vm763_vm1, %v5330_v22 }
  0x88   : > { %4130 = vmatmul.msk.f32.gmra.mxu0 %vm763_vm1, %v5335_v25 }
  0xdd   : > { %v794_v23 = vpop.f32.mrf.mxu0 }
  0xde   : > { %v832_v24 = vpop.f32.mrf.mxu1 }
  0xdf   : > { %v833_v26 = vadd.f32 %v832_v24, %v794_v23 }
  0xe1   : > { %842 = vst.msk [vmem:[#allocation2 + $0x8] sm:$0xff] %vm841_vm2, %v833_v26 }
  0xe5   : > { %v797_v27 = vpop.f32.mrf.mxu0 }
  0xe6   : > { %v835_v28 = vpop.f32.mrf.mxu1 }
  0xe7   : > { %v836_v29 = vadd.f32 %v835_v28, %v797_v27 }
  0xe8   : > { %v5340_v30 = vld [vmem:[#allocation2 + $0x8] sm:$0xff] }
  0xe9   : > { %v854_v31 = vld [vmem:[#allocation2 + $0x7] sm:$0xff]  ;;  %843 = vst.msk [vmem:[#allocation2 + $0x10] sm:$0xff] %vm841_vm2, %v836_v29  ;;  %4121 = vmatmul.msk.f32.vlgmr.msra.gmra.mxu2 %vm841_vm2, %v5340_v30 }
  0xea   : > { %4124 = vmatmul.msk.f32.vlgmr.msra.gmra.mxu3 %vm841_vm2, %v854_v31 }
  0xed   : > { %v800_v32 = vpop.f32.mrf.mxu0 }
  0xee   : > { %v838_v33 = vpop.f32.mrf.mxu1 }
  0xef   : > { %v839_v34 = vadd.f32 %v838_v33, %v800_v32 }
  0xf0   : > { %v5346_v35 = vld [vmem:[#allocation2 + $0x10] sm:$0xff] }
  0xf1   : > { %v855_v36 = vld [vmem:[#allocation2 + $0xf] sm:$0xff]  ;;  %844 = vst.msk [vmem:[#allocation2 + $0x18] sm:$0xff] %vm841_vm2, %v839_v34  ;;  %4122 = vmatmul.msk.f32.gmra.mxu2 %vm841_vm2, %v5346_v35 }
  0xf2   : > { %4125 = vmatmul.msk.f32.gmra.mxu3 %vm841_vm2, %v855_v36 }
  0xf5   : > { %v966_v39 = vpop.f32.mrf.mxu0 }
  0xf8   : > { %v5352_v37 = vld [vmem:[#allocation2 + $0x18] sm:$0xff] }
  0xf9   : > { %v856_v38 = vld [vmem:[#allocation2 + $0x17] sm:$0xff]  ;;  %4123 = vmatmul.msk.f32.gmra.mxu2 %vm841_vm2, %v5352_v37 }
  0xfa   : > { %4126 = vmatmul.msk.f32.gmra.mxu3 %vm841_vm2, %v856_v38 }
  0xfd   : > { %v969_v46 = vpop.f32.mrf.mxu0 }
 0x105   : > { %v972_v55 = vpop.f32.mrf.mxu0 }
 0x16c   : > { %v891_v40 = vpop.f32.mrf.mxu2 }
 0x16d   : > { %v926_v41 = vpop.f32.mrf.mxu3 }
 0x16e   : > { %v927_v42 = vadd.f32 %v926_v41, %v891_v40  ;;  %v1122_v40 = vld [vmem:[#allocation16 + $0x10] sm:$0xff]  ;;  %v1121_v41 = vld [vmem:[#allocation16 + $0x8] sm:$0xff] }
 0x170   : > { %v975_v44 = vadd.f32 %v966_v39, %v927_v42  ;;  %v1123_v39 = vld [vmem:[#allocation16 + $0x18] sm:$0xff]  ;;  %v1120_v42 = vld [vmem:[#allocation16] sm:$0xff] }
 0x171   : > { %1140 = vmatpush.msra.mxu0 %v1123_v39  ;;  %4262 = vmatpush.msrb.mxu2 %v1123_v39 }
 0x172   : > { %v982_v45 = vadd.f32 %v4454_v43, %v975_v44 }
 0x173   : > { %1141 = vmatpush.msra.mxu0 %v1122_v40  ;;  %4263 = vmatpush.msrb.mxu2 %v1122_v40  ;;  %v4457_v40 = vld [vmem:[#allocation12 + $0x1] ss:$0 sm:$0xff] }
 0x174   : > { %v4131_v47 = vmul.f32 -1.442695, %v982_v45  ;;  %v894_v48 = vpop.f32.mrf.mxu2 }
 0x175   : > { %v929_v49 = vpop.f32.mrf.mxu3  ;;  %1142 = vmatpush.msra.mxu0 %v1121_v41  ;;  %4264 = vmatpush.msrb.mxu2 %v1121_v41 }
 0x176   : > { %4466 = vpow2.f32 %v4131_v47  ;;  %v930_v50 = vadd.f32 %v929_v49, %v894_v48 }
 0x177   : > { %1143 = vmatpush.msra.mxu0 %v1120_v42  ;;  %4265 = vmatpush.msrb.mxu2 %v1120_v42 }
 0x178   : > { %v976_v51 = vadd.f32 %v969_v46, %v930_v50 }
 0x17a   : > { %v983_v52 = vadd.f32 %v4454_v43, %v976_v51 }
 0x17c   : > { %v4467_v53 = vpop.eup %4466  ;;  %v4132_v54 = vmul.f32 -1.442695, %v983_v52  ;;  %v897_v57 = vpop.f32.mrf.mxu2 }
 0x17d   : > { %v994_v56 = vadd.f32 1.0, %v4467_v53  ;;  %v932_v58 = vpop.f32.mrf.mxu3 }
 0x17e   : > { %4468 = vpow2.f32 %v4132_v54  ;;  %v933_v59 = vadd.f32 %v932_v58, %v897_v57  ;;  %v1064_v57 = vld [vmem:[#allocation13 + $0x8] sm:$0xff]  ;;  %v1063_v58 = vld [vmem:[#allocation13] sm:$0xff] }
 0x17f   : > { %4470 = vrcp.f32 %v994_v56  ;;  %v1008_v4 = vand.u32 2147483648, %v994_v56  ;;  %v1006_v6 = vand.u32 2147483647, %v994_v56  ;;  %vm1002_vm4 = vweird.f32 %v994_v56 }
 0x180   : > { %v977_v60 = vadd.f32 %v972_v55, %v933_v59  ;;  %v1066_v55 = vld [vmem:[#allocation13 + $0x18] sm:$0xff] }
 0x181   : > { %v1009_v11 = vor.u32 1.1754944e-38, %v1008_v4  ;;  %vm1007_vm6 = vcmp.eq.f32.partialorder %v1006_v6, 8.507059e+37  ;;  %1098 = vmatpush.msrb.mxu1 %v1066_v55  ;;  %v1167_v4 = vld [vmem:[#allocation10 + $0x20] sm:$0xff]  ;;  %v4455_v6 = vld [vmem:[#allocation18] ss:$0 sm:$0xff] }
 0x182   : > { %v984_v61 = vadd.f32 %v4454_v43, %v977_v60 }
 0x184   : > { %v4469_v62 = vpop.eup %4468  ;;  %v4133_v63 = vmul.f32 -1.442695, %v984_v61 }
 0x185   : > { %v4471_v0 = vpop.eup %4470  ;;  %v995_v1 = vadd.f32 1.0, %v4469_v62  ;;  %v1170_v62 = vld [vmem:[#allocation10 + $0x38] sm:$0xff] }
 0x186   : > { %4472 = vpow2.f32 %v4133_v63  ;;  %v998_v2 = vmul.f32 %v4471_v0, %v994_v56  ;;  %vm1003_vm3 = vweird.f32 %v4471_v0  ;;  %v1065_v56 = vld [vmem:[#allocation13 + $0x10] sm:$0xff]  ;;  %1192 = vmatpush.msrb.mxu3 %v1170_v62 }
 0x187   : > { %4474 = vrcp.f32 %v995_v1  ;;  %vm1004_vm5 = vmor %vm1002_vm4, %vm1003_vm3  ;;  %v1023_v16 = vand.u32 2147483648, %v995_v1  ;;  %v1021_v18 = vand.u32 2147483647, %v995_v1  ;;  %vm1017_vm8 = vweird.f32 %v995_v1  ;;  %1099 = vmatpush.msrb.mxu1 %v1065_v56  ;;  %v1165_v63 = vld [vmem:[#allocation9 + $0x38] sm:$0xff] }
 0x188   : > { %v999_v3 = vsub.f32 1.0, %v998_v2  ;;  %1227 = vmatpush.msra.mxu2 %v1165_v63  ;;  %v1168_v2 = vld [vmem:[#allocation10 + $0x28] sm:$0xff] }
 0x189   : > { %v1024_v23 = vor.u32 1.1754944e-38, %v1023_v16  ;;  %vm1022_vm10 = vcmp.eq.f32.partialorder %v1021_v18, 8.507059e+37  ;;  %1100 = vmatpush.msrb.mxu1 %v1064_v57 }
 0x18a   : > { %v1000_v5 = vmul.f32 %v4471_v0, %v999_v3  ;;  %v1163_v3 = vld [vmem:[#allocation9 + $0x28] sm:$0xff] }
 0x18b   : > { %1101 = vmatpush.msrb.mxu1 %v1063_v58 }
 0x18c   : > { %v4473_v7 = vpop.eup %4472  ;;  %v1001_v8 = vadd.f32 %v4471_v0, %v1000_v5  ;;  %v1162_v5 = vld [vmem:[#allocation9 + $0x20] sm:$0xff] }
 0x18d   : > { %v4475_v9 = vpop.eup %4474  ;;  %v996_v10 = vadd.f32 1.0, %v4473_v7  ;;  %v1118_v7 = vld [vmem:[#allocation3] sm:$0xff] }
 0x18e   : > { %v1005_v12 = vsel %vm1004_vm5, %v4471_v0, %v1001_v8  ;;  %v1013_v13 = vmul.f32 %v4475_v9, %v995_v1  ;;  %vm1018_vm7 = vweird.f32 %v4475_v9  ;;  %v1169_v0 = vld [vmem:[#allocation10 + $0x30] sm:$0xff] }
 0x18f   : > { %4476 = vrcp.f32 %v996_v10  ;;  %v1010_v14 = vsel %vm1007_vm6, %v1009_v11, %v1005_v12  ;;  %vm1019_vm9 = vmor %vm1017_vm8, %vm1018_vm7  ;;  %v1038_v28 = vand.u32 2147483648, %v996_v10  ;;  %vm1032_vm11 = vweird.f32 %v996_v10  ;;  %v1164_v1 = vld [vmem:[#allocation9 + $0x30] sm:$0xff]  ;;  %1193 = vmatpush.msrb.mxu3 %v1169_v0  ;;  %v4148_v12 = vld [vmem:[%s6016_s6 + $0x10] sm:$0xff] }
 0x190   : > { %1051 = vrot.lane.b32.xlu0 %v1010_v14, %s5021_s0  ;;  %v1014_v15 = vsub.f32 1.0, %v1013_v13  ;;  %v1036_v31 = vand.u32 2147483647, %v996_v10  ;;  %v1042_v43 = vmul.f32 2.0, %v1010_v14  ;;  %1228 = vmatpush.msra.mxu2 %v1164_v1  ;;  %v4456_v13 = vld [vmem:[#allocation15] ss:$0 sm:$0xff] }
 0x191   : > { %v1039_v33 = vor.u32 1.1754944e-38, %v1038_v28  ;;  %1194 = vmatpush.msrb.mxu3 %v1168_v2  ;;  %v1119_v14 = vld [vmem:[#allocation3 + $0x8] sm:$0xff] }
 0x192   : > { %v1015_v17 = vmul.f32 %v4475_v9, %v1014_v15  ;;  %vm1037_vm14 = vcmp.eq.f32.partialorder %v1036_v31, 8.507059e+37  ;;  %v4134_v44 = vadd.f32 -1.0, %v1042_v43  ;;  %1229 = vmatpush.msra.mxu2 %v1163_v3 }
 0x193   : > { %1195 = vmatpush.msrb.mxu3 %v1167_v4 }
 0x194   : > { %v1016_v19 = vadd.f32 %v4475_v9, %v1015_v17  ;;  %1230 = vmatpush.msra.mxu2 %v1162_v5 }
 0x195   : > { %v4477_v20 = vpop.eup %4476 }
 0x196   : > { %v1020_v24 = vsel %vm1019_vm9, %v4475_v9, %v1016_v19  ;;  %v1028_v26 = vmul.f32 %v4477_v20, %v996_v10  ;;  %vm1033_vm12 = vweird.f32 %v4477_v20  ;;  %v4149_v10 = vld [vmem:[%s6016_s6 + $0x18] sm:$0xf] }
 0x197   : > { %v1025_v27 = vsel %vm1022_vm10, %v1024_v23, %v1020_v24  ;;  %vm1034_vm13 = vmor %vm1032_vm11, %vm1033_vm12  ;;  %4150 = vmatpush.msk.msrb.mxu0 %vm773_vm0, %v4149_v10 }
 0x198   : > { %1053 = vrot.lane.b32.xlu0 %v1025_v27, %s5021_s0  ;;  %v1029_v29 = vsub.f32 1.0, %v1028_v26  ;;  %v1043_v47 = vmul.f32 2.0, %v1025_v27 }
 0x199   : > { %1262 = vmatpush.msrb.mxu0 %v4148_v12 }
 0x19a   : > { %v1030_v32 = vmul.f32 %v4477_v20, %v1029_v29  ;;  %v4135_v48 = vadd.f32 -1.0, %v1043_v47 }
 0x19c   : > { %v1031_v34 = vadd.f32 %v4477_v20, %v1030_v32 }
 0x19e   : > { %v1035_v36 = vsel %vm1034_vm13, %v4477_v20, %v1031_v34 }
 0x19f   : > { %v1040_v38 = vsel %vm1037_vm14, %v1039_v33, %v1035_v36 }
 0x1a0   : > { %1055 = vrot.lane.b32.xlu1 %v1040_v38, %s5021_s0  ;;  %v1044_v51 = vmul.f32 2.0, %v1040_v38 }
 0x1a2   : > { %v4136_v52 = vadd.f32 -1.0, %v1044_v51 }
 0x202   : > { %v1052_v45 = vpop.permute.xlu0 %1051 }
 0x203   : > { %v1060_v46 = vmul.f32 %v4134_v44, %v1052_v45 }
 0x205   : > { %1074 = vrot.lane.b32.xlu1 %v1060_v46, %s5022_s8 }
 0x20a   : > { %v1054_v49 = vpop.permute.xlu0 %1053 }
 0x20b   : > { %v1061_v50 = vmul.f32 %v4135_v48, %v1054_v49 }
 0x20d   : > { %1076 = vrot.lane.b32.xlu2 %v1061_v50, %s5022_s8 }
 0x212   : > { %v1056_v53 = vpop.permute.xlu1 %1055 }
 0x213   : > { %v1062_v54 = vmul.f32 %v4136_v52, %v1056_v53 }
 0x215   : > { %1078 = vrot.lane.b32.xlu2 %v1062_v54, %s5022_s8 }
 0x267   : > { %v1077_v59 = vpop.permute.xlu2 %1076 }
 0x268   : > { %4140 = vmatmul.msk.f32.vlgmr.msra.gmra.mxu0 %vm841_vm2, %v1077_v59 }
 0x26f   : > { %v1079_v60 = vpop.permute.xlu2 %1078 }
 0x270   : > { %4141 = vmatmul.msk.f32.vlgmr.msrb.gmra.mxu2 %vm841_vm2, %v1079_v60  ;;  %4151 = vmatmul.msk.f32.vlgmr.msrb.gmra.mxu0 %vm763_vm1, %v5325_v21 }
 0x277   : > { %v1075_v61 = vpop.permute.xlu1 %1074 }
 0x278   : > { %4137 = vmatmul.msk.f32.vlgmr.msrb.gmra.mxu1 %vm841_vm2, %v1075_v61  ;;  %4152 = vmatmul.msk.f32.gmra.mxu0 %vm763_vm1, %v5330_v22 }
 0x280   : > { %4138 = vmatmul.msk.f32.gmra.mxu1 %vm841_vm2, %v1077_v59  ;;  %4153 = vmatmul.msk.f32.gmra.mxu0 %vm763_vm1, %v5335_v25 }
 0x288   : > { %4139 = vmatmul.msk.f32.gmra.mxu1 %vm841_vm2, %v1079_v60 }
 0x2e5   : > { %v1145_v8 = vpop.f32.mrf.mxu0 }
 0x2e6   : > { %v1146_v9 = vadd.f32 %v4455_v6, %v1145_v8 }
 0x2e8   : > { %v1151_v11 = vadd.f32 %v1146_v9, %v1118_v7 }
 0x2ea   : > { %1153 = vst.msk [vmem:[#allocation3] sm:$0xff] %vm841_vm2, %v1151_v11 }
 0x2ed   : > { %v1264_v36 = vpop.f32.mrf.mxu0 }
 0x2f3   : > { %v1148_v15 = vpop.f32.mrf.mxu2 }
 0x2f4   : > { %v1149_v16 = vadd.f32 %v4455_v6, %v1148_v15 }
 0x2f5   : > { %v1103_v17 = vpop.f32.mrf.mxu1  ;;  %v1267_v43 = vpop.f32.mrf.mxu0 }
 0x2f6   : > { %v1152_v18 = vadd.f32 %v1149_v16, %v1119_v14  ;;  %v1104_v19 = vadd.f32 %v4456_v13, %v1103_v17 }
 0x2f8   : > { %1154 = vst.msk [vmem:[#allocation3 + $0x8] sm:$0xff] %vm841_vm2, %v1152_v18  ;;  %v1112_v20 = vadd.f32 %v1104_v19, %v5340_v30 }
 0x2fa   : > { %1115 = vst.msk [vmem:[#allocation2 + $0x8] sm:$0xff] %vm841_vm2, %v1112_v20 }
 0x2fd   : > { %v1106_v23 = vpop.f32.mrf.mxu1  ;;  %v1270_v52 = vpop.f32.mrf.mxu0 }
 0x2fe   : > { %v1107_v24 = vadd.f32 %v4456_v13, %v1106_v23 }
 0x300   : > { %v1113_v26 = vadd.f32 %v1107_v24, %v5346_v35 }
 0x301   : > { %v5386_v27 = vld [vmem:[#allocation2 + $0x8] sm:$0xff] }
 0x302   : > { %v1158_v28 = vld [vmem:[#allocation2 + $0x6] sm:$0xff]  ;;  %1116 = vst.msk [vmem:[#allocation2 + $0x10] sm:$0xff] %vm841_vm2, %v1113_v26  ;;  %4142 = vmatmul.msk.f32.vlgmr.msrb.gmra.mxu3 %vm841_vm2, %v5386_v27 }
 0x303   : > { %4145 = vmatmul.msk.f32.vlgmr.msra.gmra.mxu2 %vm841_vm2, %v1158_v28 }
 0x305   : > { %v1109_v30 = vpop.f32.mrf.mxu1 }
 0x306   : > { %v1110_v29 = vadd.f32 %v4456_v13, %v1109_v30 }
 0x308   : > { %v1114_v31 = vadd.f32 %v1110_v29, %v5352_v37 }
 0x309   : > { %v5393_v32 = vld [vmem:[#allocation2 + $0x10] sm:$0xff] }
 0x30a   : > { %v1159_v33 = vld [vmem:[#allocation2 + $0xe] sm:$0xff]  ;;  %1117 = vst.msk [vmem:[#allocation2 + $0x18] sm:$0xff] %vm841_vm2, %v1114_v31  ;;  %4143 = vmatmul.msk.f32.gmra.mxu3 %vm841_vm2, %v5393_v32 }
 0x30b   : > { %4146 = vmatmul.msk.f32.gmra.mxu2 %vm841_vm2, %v1159_v33 }
 0x311   : > { %v5399_v35 = vld [vmem:[#allocation2 + $0x18] sm:$0xff] }
 0x312   : > { %v1160_v34 = vld [vmem:[#allocation2 + $0x16] sm:$0xff]  ;;  %4144 = vmatmul.msk.f32.gmra.mxu3 %vm841_vm2, %v5399_v35 }
 0x313   : > { %4147 = vmatmul.msk.f32.gmra.mxu2 %vm841_vm2, %v1160_v34 }
 0x385   : > { %v1197_v37 = vpop.f32.mrf.mxu3 }
 0x386   : > { %v1232_v38 = vpop.f32.mrf.mxu2 }
 0x387   : > { %v1233_v39 = vadd.f32 %v1232_v38, %v1197_v37  ;;  %v1424_v37 = vld [vmem:[#allocation16 + $0x30] sm:$0xff]  ;;  %v1423_v38 = vld [vmem:[#allocation16 + $0x28] sm:$0xff] }
 0x389   : > { %v1273_v41 = vadd.f32 %v1264_v36, %v1233_v39  ;;  %v1425_v36 = vld [vmem:[#allocation16 + $0x38] sm:$0xff]  ;;  %v1422_v39 = vld [vmem:[#allocation16 + $0x20] sm:$0xff] }
 0x38a   : > { %4266 = vmatpush.msra.mxu3 %v1425_v36 }
 0x38b   : > { %v1281_v42 = vadd.f32 %v4457_v40, %v1273_v41 }
 0x38c   : > { %4267 = vmatpush.msra.mxu3 %v1424_v37 }
 0x38d   : > { %v4154_v44 = vmul.f32 -1.442695, %v1281_v42  ;;  %v1200_v45 = vpop.f32.mrf.mxu3 }
 0x38e   : > { %v1235_v46 = vpop.f32.mrf.mxu2  ;;  %4268 = vmatpush.msra.mxu3 %v1423_v38 }
 0x38f   : > { %4478 = vpow2.f32 %v4154_v44  ;;  %v1236_v47 = vadd.f32 %v1235_v46, %v1200_v45 }
 0x390   : > { %4269 = vmatpush.msra.mxu3 %v1422_v39 }
 0x391   : > { %v1274_v48 = vadd.f32 %v1267_v43, %v1236_v47 }
 0x393   : > { %v1282_v49 = vadd.f32 %v4457_v40, %v1274_v48 }
 0x395   : > { %v4479_v50 = vpop.eup %4478  ;;  %v4155_v51 = vmul.f32 -1.442695, %v1282_v49  ;;  %v1203_v54 = vpop.f32.mrf.mxu3 }
 0x396   : > { %v1293_v53 = vadd.f32 1.0, %v4479_v50  ;;  %v1238_v55 = vpop.f32.mrf.mxu2 }
 0x397   : > { %4480 = vpow2.f32 %v4155_v51  ;;  %v1239_v56 = vadd.f32 %v1238_v55, %v1203_v54  ;;  %v1364_v54 = vld [vmem:[#allocation13 + $0x28] sm:$0xff]  ;;  %v1363_v55 = vld [vmem:[#allocation13 + $0x20] sm:$0xff] }
 0x398   : > { %4482 = vrcp.f32 %v1293_v53  ;;  %v1307_v1 = vand.u32 2147483648, %v1293_v53  ;;  %v1305_v3 = vand.u32 2147483647, %v1293_v53  ;;  %vm1301_vm3 = vweird.f32 %v1293_v53 }
 0x399   : > { %v1275_v57 = vadd.f32 %v1270_v52, %v1239_v56  ;;  %v1366_v52 = vld [vmem:[#allocation13 + $0x38] sm:$0xff] }
 0x39a   : > { %v1308_v8 = vor.u32 1.1754944e-38, %v1307_v1  ;;  %vm1306_vm5 = vcmp.eq.f32.partialorder %v1305_v3, 8.507059e+37  ;;  %1399 = vmatpush.msra.mxu1 %v1366_v52  ;;  %v1472_v1 = vld [vmem:[#allocation10 + $0x50] sm:$0xff] }
 0x39b   : > { %v1283_v58 = vadd.f32 %v4457_v40, %v1275_v57 }
 0x39d   : > { %v4481_v59 = vpop.eup %4480  ;;  %v4156_v60 = vmul.f32 -1.442695, %v1283_v58 }
 0x39e   : > { %v4483_v61 = vpop.eup %4482  ;;  %v1294_v62 = vadd.f32 1.0, %v4481_v59  ;;  %v4458_v59 = vld [vmem:[#allocation18 + $0x1] ss:$0 sm:$0xff] }
 0x39f   : > { %4484 = vpow2.f32 %v4156_v60  ;;  %v1297_v63 = vmul.f32 %v4483_v61, %v1293_v53  ;;  %vm1302_vm15 = vweird.f32 %v4483_v61  ;;  %v1365_v53 = vld [vmem:[#allocation13 + $0x30] sm:$0xff] }
 0x3a0   : > { %4486 = vrcp.f32 %v1294_v62  ;;  %vm1303_vm4 = vmor %vm1301_vm3, %vm1302_vm15  ;;  %v1322_v13 = vand.u32 2147483648, %v1294_v62  ;;  %v1320_v15 = vand.u32 2147483647, %v1294_v62  ;;  %vm1316_vm7 = vweird.f32 %v1294_v62  ;;  %1400 = vmatpush.msra.mxu1 %v1365_v53  ;;  %v1473_v60 = vld [vmem:[#allocation10 + $0x58] sm:$0xff] }
 0x3a1   : > { %v1298_v0 = vsub.f32 1.0, %v1297_v63  ;;  %1495 = vmatpush.msrb.mxu2 %v1473_v60 }
 0x3a2   : > { %v1323_v18 = vor.u32 1.1754944e-38, %v1322_v13  ;;  %vm1321_vm9 = vcmp.eq.f32.partialorder %v1320_v15, 8.507059e+37  ;;  %1401 = vmatpush.msra.mxu1 %v1364_v54 }
 0x3a3   : > { %v1299_v2 = vmul.f32 %v4483_v61, %v1298_v0  ;;  %v1420_v0 = vld [vmem:[#allocation3 + $0x8] sm:$0xff]  ;;  %1496 = vmatpush.msrb.mxu2 %v1472_v1 }
 0x3a4   : > { %1402 = vmatpush.msra.mxu1 %v1363_v55 }
 0x3a5   : > { %v4485_v4 = vpop.eup %4484  ;;  %v1300_v5 = vadd.f32 %v4483_v61, %v1299_v2  ;;  %v1467_v2 = vld [vmem:[#allocation9 + $0x50] sm:$0xff] }
 0x3a6   : > { %v4487_v6 = vpop.eup %4486  ;;  %v1295_v7 = vadd.f32 1.0, %v4485_v4  ;;  %1443 = vmatpush.msrb.mxu1 %v1425_v36  ;;  %v1471_v4 = vld [vmem:[#allocation10 + $0x48] sm:$0xff] }
 0x3a7   : > { %v1304_v9 = vsel %vm1303_vm4, %v4483_v61, %v1300_v5  ;;  %v1312_v10 = vmul.f32 %v4487_v6, %v1294_v62  ;;  %vm1317_vm6 = vweird.f32 %v4487_v6  ;;  %v1468_v61 = vld [vmem:[#allocation9 + $0x58] sm:$0xff]  ;;  %v1466_v5 = vld [vmem:[#allocation9 + $0x48] sm:$0xff]  ;;  %1497 = vmatpush.msrb.mxu2 %v1471_v4 }
 0x3a8   : > { %4488 = vrcp.f32 %v1295_v7  ;;  %v1309_v11 = vsel %vm1306_vm5, %v1308_v8, %v1304_v9  ;;  %vm1318_vm8 = vmor %vm1316_vm7, %vm1317_vm6  ;;  %v1337_v26 = vand.u32 2147483648, %v1295_v7  ;;  %v1335_v30 = vand.u32 2147483647, %v1295_v7  ;;  %1444 = vmatpush.msrb.mxu1 %v1424_v37  ;;  %1530 = vmatpush.msrb.mxu3 %v1468_v61  ;;  %v4172_v8 = vld [vmem:[%s6016_s6 + $0x28] sm:$0xf]  ;;  %v4171_v9 = vld [vmem:[%s6016_s6 + $0x20] sm:$0xff] }
 0x3a9   : > { %1350 = vrot.lane.b32.xlu0 %v1309_v11, %s5021_s0  ;;  %v1313_v12 = vsub.f32 1.0, %v1312_v10  ;;  %vm1331_vm11 = vweird.f32 %v1295_v7  ;;  %v1341_v44 = vmul.f32 2.0, %v1309_v11  ;;  %4173 = vmatpush.msk.msra.mxu0 %vm773_vm0, %v4172_v8  ;;  %v4459_v10 = vld [vmem:[#allocation15 + $0x1] ss:$0 sm:$0xff] }
 0x3aa   : > { %v1338_v31 = vor.u32 1.1754944e-38, %v1337_v26  ;;  %vm1336_vm13 = vcmp.eq.f32.partialorder %v1335_v30, 8.507059e+37  ;;  %1445 = vmatpush.msrb.mxu1 %v1423_v38  ;;  %1531 = vmatpush.msrb.mxu3 %v1467_v2 }
 0x3ab   : > { %v1314_v14 = vmul.f32 %v4487_v6, %v1313_v12  ;;  %v4157_v45 = vadd.f32 -1.0, %v1341_v44  ;;  %1565 = vmatpush.msra.mxu0 %v4171_v9 }
 0x3ac   : > { %1446 = vmatpush.msrb.mxu1 %v1422_v39  ;;  %1532 = vmatpush.msrb.mxu3 %v1466_v5 }
 0x3ad   : > { %v1315_v16 = vadd.f32 %v4487_v6, %v1314_v14  ;;  %4174 = vmatmul.msk.f32.vlgmr.msra.gmra.mxu0 %vm763_vm1, %v5325_v21 }
 0x3ae   : > { %v4489_v17 = vpop.eup %4488 }
 0x3af   : > { %v1319_v19 = vsel %vm1318_vm8, %v4487_v6, %v1315_v16  ;;  %v1327_v20 = vmul.f32 %v4489_v17, %v1295_v7  ;;  %vm1332_vm10 = vweird.f32 %v4489_v17  ;;  %v1470_v6 = vld [vmem:[#allocation10 + $0x40] sm:$0xff] }
 0x3b0   : > { %v1324_v23 = vsel %vm1321_vm9, %v1323_v18, %v1319_v19  ;;  %vm1333_vm12 = vmor %vm1331_vm11, %vm1332_vm10  ;;  %v1465_v7 = vld [vmem:[#allocation9 + $0x40] sm:$0xff]  ;;  %1498 = vmatpush.msrb.mxu2 %v1470_v6 }
 0x3b1   : > { %1352 = vrot.lane.b32.xlu1 %v1324_v23, %s5021_s0  ;;  %v1328_v24 = vsub.f32 1.0, %v1327_v20  ;;  %v1342_v48 = vmul.f32 2.0, %v1324_v23  ;;  %1533 = vmatpush.msrb.mxu3 %v1465_v7  ;;  %v1419_v23 = vld [vmem:[#allocation3] sm:$0xff] }
 0x3b3   : > { %v1329_v28 = vmul.f32 %v4489_v17, %v1328_v24  ;;  %v4158_v49 = vadd.f32 -1.0, %v1342_v48 }
 0x3b5   : > { %v1330_v29 = vadd.f32 %v4489_v17, %v1329_v28  ;;  %4175 = vmatmul.msk.f32.gmra.mxu0 %vm763_vm1, %v5330_v22 }
 0x3b7   : > { %v1334_v33 = vsel %vm1333_vm12, %v4489_v17, %v1330_v29 }
 0x3b8   : > { %v1339_v34 = vsel %vm1336_vm13, %v1338_v31, %v1334_v33  ;;  %v4460_v33 = vld [vmem:[#allocation12 + $0x2] ss:$0 sm:$0xff] }
 0x3b9   : > { %1354 = vrot.lane.b32.xlu2 %v1339_v34, %s5021_s0  ;;  %v1343_v40 = vmul.f32 2.0, %v1339_v34 }
 0x3bb   : > { %v4159_v41 = vadd.f32 -1.0, %v1343_v40 }
 0x3bd   : > { %4176 = vmatmul.msk.f32.gmra.mxu0 %vm763_vm1, %v5335_v25 }
 0x413   : > { %v1355_v42 = vpop.permute.xlu2 %1354 }
 0x414   : > { %v1361_v43 = vmul.f32 %v4159_v41, %v1355_v42 }
 0x416   : > { %1379 = vrot.lane.b32.xlu2 %v1361_v43, %s5022_s8 }
 0x41b   : > { %v1351_v46 = vpop.permute.xlu0 %1350 }
 0x41c   : > { %v1359_v47 = vmul.f32 %v4157_v45, %v1351_v46 }
 0x41e   : > { %1375 = vrot.lane.b32.xlu0 %v1359_v47, %s5022_s8 }
 0x423   : > { %v1353_v50 = vpop.permute.xlu1 %1352 }
 0x424   : > { %v1360_v51 = vmul.f32 %v4158_v49, %v1353_v50 }
 0x426   : > { %1377 = vrot.lane.b32.xlu1 %v1360_v51, %s5022_s8 }
 0x470   : > { %v1380_v56 = vpop.permute.xlu2 %1379 }
 0x471   : > { %4164 = vmatmul.msk.f32.vlgmr.msra.gmra.mxu3 %vm841_vm2, %v1380_v56 }
 0x490   : > { %v1376_v57 = vpop.permute.xlu0 %1375 }
 0x491   : > { %4160 = vmatmul.msk.f32.vlgmr.msra.gmra.mxu1 %vm841_vm2, %v1376_v57 }
 0x498   : > { %v1378_v58 = vpop.permute.xlu1 %1377 }
 0x499   : > { %4161 = vmatmul.msk.f32.gmra.mxu1 %vm841_vm2, %v1378_v58 }
 0x4a1   : > { %4162 = vmatmul.msk.f32.gmra.mxu1 %vm841_vm2, %v1380_v56 }
 0x4a9   : > { %4163 = vmatmul.msk.f32.vlgmr.msrb.gmra.mxu1 %vm841_vm2, %v1378_v58 }
 0x4f4   : > { %v1451_v62 = vpop.f32.mrf.mxu3 }
 0x4f5   : > { %v1452_v63 = vadd.f32 %v4458_v59, %v1451_v62 }
 0x4f7   : > { %v1455_v3 = vadd.f32 %v1452_v63, %v1420_v0 }
 0x4f9   : > { %1457 = vst.msk [vmem:[#allocation3 + $0x8] sm:$0xff] %vm841_vm2, %v1455_v3 }
 0x50e   : > { %v1404_v11 = vpop.f32.mrf.mxu1 }
 0x50f   : > { %v1405_v12 = vadd.f32 %v4459_v10, %v1404_v11 }
 0x511   : > { %v1413_v13 = vadd.f32 %v1405_v12, %v5386_v27 }
 0x513   : > { %1416 = vst.msk [vmem:[#allocation2 + $0x8] sm:$0xff] %vm841_vm2, %v1413_v13 }
 0x516   : > { %v1407_v14 = vpop.f32.mrf.mxu1 }
 0x517   : > { %v1408_v15 = vadd.f32 %v4459_v10, %v1407_v14 }
 0x519   : > { %v1414_v16 = vadd.f32 %v1408_v15, %v5393_v32 }
 0x51a   : > { %v5432_v17 = vld [vmem:[#allocation2 + $0x8] sm:$0xff] }
 0x51b   : > { %v1461_v21 = vld [vmem:[#allocation2 + $0x4] sm:$0xff]  ;;  %1417 = vst.msk [vmem:[#allocation2 + $0x10] sm:$0xff] %vm841_vm2, %v1414_v16  ;;  %4165 = vmatmul.msk.f32.vlgmr.msrb.gmra.mxu2 %vm841_vm2, %v5432_v17 }
 0x51c   : > { %4168 = vmatmul.msk.f32.vlgmr.msrb.gmra.mxu3 %vm841_vm2, %v1461_v21 }
 0x51e   : > { %v1410_v22 = vpop.f32.mrf.mxu1 }
 0x51f   : > { %v1411_v27 = vadd.f32 %v4459_v10, %v1410_v22 }
 0x521   : > { %v1415_v18 = vadd.f32 %v1411_v27, %v5399_v35  ;;  %v1567_v35 = vpop.f32.mrf.mxu0 }
 0x522   : > { %v5439_v19 = vld [vmem:[#allocation2 + $0x10] sm:$0xff] }
 0x523   : > { %v1462_v25 = vld [vmem:[#allocation2 + $0xc] sm:$0xff]  ;;  %1418 = vst.msk [vmem:[#allocation2 + $0x18] sm:$0xff] %vm841_vm2, %v1415_v18  ;;  %4166 = vmatmul.msk.f32.gmra.mxu2 %vm841_vm2, %v5439_v19 }
 0x524   : > { %4169 = vmatmul.msk.f32.gmra.mxu3 %vm841_vm2, %v1462_v25 }
 0x526   : > { %v1448_v32 = vpop.f32.mrf.mxu1 }
 0x527   : > { %v1449_v20 = vadd.f32 %v4458_v59, %v1448_v32 }
 0x529   : > { %v1454_v24 = vadd.f32 %v1449_v20, %v1419_v23  ;;  %v1570_v37 = vpop.f32.mrf.mxu0 }
 0x52a   : > { %v5445_v26 = vld [vmem:[#allocation2 + $0x18] sm:$0xff] }
 0x52b   : > { %v1463_v28 = vld [vmem:[#allocation2 + $0x14] sm:$0xff]  ;;  %1456 = vst.msk [vmem:[#allocation3] sm:$0xff] %vm841_vm2, %v1454_v24  ;;  %4167 = vmatmul.msk.f32.gmra.mxu2 %vm841_vm2, %v5445_v26 }
 0x52c   : > { %4170 = vmatmul.msk.f32.gmra.mxu3 %vm841_vm2, %v1463_v28 }
 0x531   : > { %v1573_v46 = vpop.f32.mrf.mxu0 }
 0x59e   : > { %v1500_v30 = vpop.f32.mrf.mxu2 }
 0x59f   : > { %v1535_v29 = vpop.f32.mrf.mxu3 }
 0x5a0   : > { %v1536_v31 = vadd.f32 %v1535_v29, %v1500_v30 }
 0x5a2   : > { %v1576_v34 = vadd.f32 %v1567_v35, %v1536_v31 }
 0x5a4   : > { %v1584_v36 = vadd.f32 %v4460_v33, %v1576_v34 }
 0x5a6   : > { %v4177_v38 = vmul.f32 -1.442695, %v1584_v36  ;;  %v1503_v39 = vpop.f32.mrf.mxu2 }
 0x5a7   : > { %v1538_v40 = vpop.f32.mrf.mxu3 }
 0x5a8   : > { %4490 = vpow2.f32 %v4177_v38  ;;  %v1539_v41 = vadd.f32 %v1538_v40, %v1503_v39  ;;  %v1669_v39 = vld [vmem:[#allocation13 + $0x58] sm:$0xff]  ;;  %v1668_v40 = vld [vmem:[#allocation13 + $0x50] sm:$0xff] }
 0x5a9   : > { %1702 = vmatpush.msra.mxu1 %v1669_v39 }
 0x5aa   : > { %v1577_v42 = vadd.f32 %v1570_v37, %v1539_v41  ;;  %v1667_v41 = vld [vmem:[#allocation13 + $0x48] sm:$0xff] }
 0x5ab   : > { %1703 = vmatpush.msra.mxu1 %v1668_v40 }
 0x5ac   : > { %v1585_v43 = vadd.f32 %v4460_v33, %v1577_v42  ;;  %v1666_v42 = vld [vmem:[#allocation13 + $0x40] sm:$0xff] }
 0x5ad   : > { %1704 = vmatpush.msra.mxu1 %v1667_v41 }
 0x5ae   : > { %v4491_v44 = vpop.eup %4490  ;;  %v4178_v45 = vmul.f32 -1.442695, %v1585_v43  ;;  %v1506_v48 = vpop.f32.mrf.mxu2  ;;  %v1728_v43 = vld [vmem:[#allocation16 + $0x58] sm:$0xff] }
 0x5af   : > { %v1596_v47 = vadd.f32 1.0, %v4491_v44  ;;  %v1541_v49 = vpop.f32.mrf.mxu3  ;;  %1705 = vmatpush.msra.mxu1 %v1666_v42  ;;  %v1727_v44 = vld [vmem:[#allocation16 + $0x50] sm:$0xff]  ;;  %1746 = vmatpush.msra.mxu2 %v1728_v43 }
 0x5b0   : > { %4492 = vpow2.f32 %v4178_v45  ;;  %v1542_v50 = vadd.f32 %v1541_v49, %v1506_v48  ;;  %v1726_v45 = vld [vmem:[#allocation16 + $0x48] sm:$0xff] }
 0x5b1   : > { %4494 = vrcp.f32 %v1596_v47  ;;  %v1610_v59 = vand.u32 2147483648, %v1596_v47  ;;  %v1608_v61 = vand.u32 2147483647, %v1596_v47  ;;  %vm1604_vm15 = vweird.f32 %v1596_v47  ;;  %1747 = vmatpush.msra.mxu2 %v1727_v44 }
 0x5b2   : > { %v1578_v51 = vadd.f32 %v1573_v46, %v1542_v50  ;;  %v1725_v46 = vld [vmem:[#allocation16 + $0x40] sm:$0xff] }
 0x5b3   : > { %v1611_v2 = vor.u32 1.1754944e-38, %v1610_v59  ;;  %vm1609_vm4 = vcmp.eq.f32.partialorder %v1608_v61, 8.507059e+37  ;;  %1748 = vmatpush.msra.mxu2 %v1726_v45  ;;  %v4195_v59 = vld [vmem:[%s6016_s6 + $0x38] sm:$0xf]  ;;  %v4514_v61 = vld [vmem:[%s5318_s5] sm:$0xff] }
 0x5b4   : > { %v1586_v52 = vadd.f32 %v4460_v33, %v1578_v51  ;;  %v1768_v51 = vld [vmem:[#allocation9 + $0x70] sm:$0xff]  ;;  %4196 = vmatpush.msk.msrb.mxu1 %vm773_vm0, %v4195_v59 }
 0x5b5   : > { %1749 = vmatpush.msra.mxu2 %v1725_v46 }
 0x5b6   : > { %v4493_v53 = vpop.eup %4492  ;;  %v4179_v54 = vmul.f32 -1.442695, %v1586_v52  ;;  %v1767_v52 = vld [vmem:[#allocation9 + $0x68] sm:$0xff] }
 0x5b7   : > { %v4495_v55 = vpop.eup %4494  ;;  %v1597_v56 = vadd.f32 1.0, %v4493_v53  ;;  %v1766_v53 = vld [vmem:[#allocation9 + $0x60] sm:$0xff] }
 0x5b8   : > { %4496 = vpow2.f32 %v4179_v54  ;;  %v1600_v57 = vmul.f32 %v4495_v55, %v1596_v47  ;;  %vm1605_vm14 = vweird.f32 %v4495_v55  ;;  %v1769_v47 = vld [vmem:[#allocation9 + $0x78] sm:$0xff]  ;;  %v1764_v54 = vld [vmem:[#allocation2] sm:$0xff] }
 0x5b9   : > { %4498 = vrcp.f32 %v1597_v56  ;;  %vm1606_vm3 = vmor %vm1604_vm15, %vm1605_vm14  ;;  %v1625_v7 = vand.u32 2147483648, %v1597_v56  ;;  %v1623_v9 = vand.u32 2147483647, %v1597_v56  ;;  %vm1619_vm6 = vweird.f32 %v1597_v56  ;;  %1825 = vmatpush.msrb.mxu0 %v1769_v47 }
 0x5ba   : > { %v1601_v58 = vsub.f32 1.0, %v1600_v57  ;;  %v1772_v57 = vld [vmem:[#allocation10 + $0x68] sm:$0xff] }
 0x5bb   : > { %v1626_v12 = vor.u32 1.1754944e-38, %v1625_v7  ;;  %vm1624_vm8 = vcmp.eq.f32.partialorder %v1623_v9, 8.507059e+37  ;;  %1826 = vmatpush.msrb.mxu0 %v1768_v51  ;;  %v4462_v7 = vld [vmem:[#allocation18 + $0x2] ss:$0 sm:$0xff] }
 0x5bc   : > { %v1602_v60 = vmul.f32 %v4495_v55, %v1601_v58  ;;  %v1771_v58 = vld [vmem:[#allocation10 + $0x60] sm:$0xff] }
 0x5bd   : > { %1827 = vmatpush.msrb.mxu0 %v1767_v52 }
 0x5be   : > { %v4497_v62 = vpop.eup %4496  ;;  %v1603_v63 = vadd.f32 %v4495_v55, %v1602_v60  ;;  %v4194_v60 = vld [vmem:[%s6016_s6 + $0x30] sm:$0xff] }
 0x5bf   : > { %v4499_v0 = vpop.eup %4498  ;;  %v1598_v1 = vadd.f32 1.0, %v4497_v62  ;;  %1828 = vmatpush.msrb.mxu0 %v1766_v53  ;;  %1860 = vmatpush.msrb.mxu1 %v4194_v60  ;;  %v4461_v62 = vld [vmem:[#allocation15 + $0x2] ss:$0 sm:$0xff] }
 0x5c0   : > { %v1607_v3 = vsel %vm1606_vm3, %v4495_v55, %v1603_v63  ;;  %v1615_v4 = vmul.f32 %v4499_v0, %v1597_v56  ;;  %vm1620_vm5 = vweird.f32 %v4499_v0  ;;  %v1774_v55 = vld [vmem:[#allocation10 + $0x78] sm:$0xff]  ;;  %4191 = vmatmul.msk.f32.vlgmr.msrb.gmra.mxu0 %vm841_vm2, %v1764_v54  ;;  %v1773_v56 = vld [vmem:[#allocation10 + $0x70] sm:$0xff] }
 0x5c1   : > { %4500 = vrcp.f32 %v1598_v1  ;;  %v1612_v5 = vsel %vm1609_vm4, %v1611_v2, %v1607_v3  ;;  %vm1621_vm7 = vmor %vm1619_vm6, %vm1620_vm5  ;;  %v1640_v21 = vand.u32 2147483648, %v1598_v1  ;;  %v1638_v27 = vand.u32 2147483647, %v1598_v1  ;;  %1796 = vmatpush.msra.mxu3 %v1774_v55  ;;  %v4515_v63 = vld [vmem:[%s5318_s5 + $0x8] sm:$0xff]  ;;  %v4516_v3 = vld [vmem:[%s5318_s5 + $0x10] sm:$0xff]  ;;  %s4109_s5 = sshll.u32 %s740_s28, 7 }
 0x5c2   : > { %1653 = vrot.lane.b32.xlu0 %v1612_v5, %s5021_s0  ;;  %v1616_v6 = vsub.f32 1.0, %v1615_v4  ;;  %vm1634_vm10 = vweird.f32 %v1598_v1  ;;  %v1644_v30 = vmul.f32 2.0, %v1612_v5  ;;  %s5887_s27 = scalar_lea.vmem [#allocation25], %s4109_s5 }
 0x5c3   : > { %v1641_v25 = vor.u32 1.1754944e-38, %v1640_v21  ;;  %vm1639_vm12 = vcmp.eq.f32.partialorder %v1638_v27, 8.507059e+37  ;;  %1797 = vmatpush.msra.mxu3 %v1773_v56  ;;  %v1723_v21 = vld [vmem:[#allocation3 + $0x8] sm:$0xff]  ;;  %s3876_s16 = sshll.u32 %s5887_s27, 4  ;;  %s3877_s16 = int_to_ptr.vmem [resolvable:$true] %s3876_s16 }
 0x5c4   : > { %v1617_v8 = vmul.f32 %v4499_v0, %v1616_v6  ;;  %v4180_v29 = vadd.f32 -1.0, %v1644_v30 }
 0x5c5   : > { %1798 = vmatpush.msra.mxu3 %v1772_v57 }
 0x5c6   : > { %v1618_v10 = vadd.f32 %v4499_v0, %v1617_v8 }
 0x5c7   : > { %v4501_v11 = vpop.eup %4500  ;;  %1799 = vmatpush.msra.mxu3 %v1771_v58 }
 0x5c8   : > { %v1622_v13 = vsel %vm1621_vm7, %v4499_v0, %v1618_v10  ;;  %v1630_v14 = vmul.f32 %v4501_v11, %v1598_v1  ;;  %vm1635_vm9 = vweird.f32 %v4501_v11  ;;  %v1722_v10 = vld [vmem:[#allocation3] sm:$0xff] }
 0x5c9   : > { %v1627_v15 = vsel %vm1624_vm8, %v1626_v12, %v1622_v13  ;;  %vm1636_vm11 = vmor %vm1634_vm10, %vm1635_vm9 }
 0x5ca   : > { %1655 = vrot.lane.b32.xlu1 %v1627_v15, %s5021_s0  ;;  %v1631_v16 = vsub.f32 1.0, %v1630_v14  ;;  %v1645_v34 = vmul.f32 2.0, %v1627_v15 }
 0x5cc   : > { %v1632_v22 = vmul.f32 %v4501_v11, %v1631_v16  ;;  %v4181_v36 = vadd.f32 -1.0, %v1645_v34 }
 0x5ce   : > { %v1633_v18 = vadd.f32 %v4501_v11, %v1632_v22 }
 0x5d0   : > { %v1637_v32 = vsel %vm1636_vm11, %v4501_v11, %v1633_v18 }
 0x5d1   : > { %v1642_v20 = vsel %vm1639_vm12, %v1641_v25, %v1637_v32 }
 0x5d2   : > { %1657 = vrot.lane.b32.xlu2 %v1642_v20, %s5021_s0  ;;  %v1646_v23 = vmul.f32 2.0, %v1642_v20 }
 0x5d4   : > { %v4182_v24 = vadd.f32 -1.0, %v1646_v23  ;;  %v4463_v23 = vld [vmem:[#allocation12 + $0x3] ss:$0 sm:$0xff] }
 0x62c   : > { %v1658_v28 = vpop.permute.xlu2 %1657 }
 0x62d   : > { %v1664_v35 = vmul.f32 %v4182_v24, %v1658_v28 }
 0x62f   : > { %1682 = vrot.lane.b32.xlu2 %v1664_v35, %s5022_s8 }
 0x634   : > { %v1654_v31 = vpop.permute.xlu0 %1653 }
 0x635   : > { %v1662_v33 = vmul.f32 %v4180_v29, %v1654_v31 }
 0x637   : > { %1678 = vrot.lane.b32.xlu0 %v1662_v33, %s5022_s8 }
 0x63c   : > { %v1656_v37 = vpop.permute.xlu1 %1655 }
 0x63d   : > { %v1663_v38 = vmul.f32 %v4181_v36, %v1656_v37  ;;  %v1830_v18 = vpop.f32.mrf.mxu0 }
 0x63f   : > { %1680 = vrot.lane.b32.xlu1 %v1663_v38, %s5022_s8 }
 0x689   : > { %v1683_v50 = vpop.permute.xlu2 %1682 }
 0x6a9   : > { %v1679_v48 = vpop.permute.xlu0 %1678 }
 0x6aa   : > { %4183 = vmatmul.msk.f32.vlgmr.msra.gmra.mxu1 %vm841_vm2, %v1679_v48 }
 0x6b1   : > { %v1681_v49 = vpop.permute.xlu1 %1680 }
 0x6b2   : > { %4184 = vmatmul.msk.f32.gmra.mxu1 %vm841_vm2, %v1681_v49  ;;  %4186 = vmatmul.msk.f32.vlgmr.msra.gmra.mxu2 %vm841_vm2, %v1681_v49 }
 0x6ba   : > { %4185 = vmatmul.msk.f32.gmra.mxu1 %vm841_vm2, %v1683_v50  ;;  %4187 = vmatmul.msk.f32.gmra.mxu2 %vm841_vm2, %v1683_v50 }
 0x6c2   : > { %4197 = vmatmul.msk.f32.vlgmr.msrb.gmra.mxu1 %vm763_vm1, %v4514_v61 }
 0x6ca   : > { %4198 = vmatmul.msk.f32.gmra.mxu1 %vm763_vm1, %v4515_v63 }
 0x6d2   : > { %4199 = vmatmul.msk.f32.gmra.mxu1 %vm763_vm1, %v4516_v3 }
 0x727   : > { %v1707_v0 = vpop.f32.mrf.mxu1 }
 0x728   : > { %v1708_v1 = vadd.f32 %v4461_v62, %v1707_v0 }
 0x72a   : > { %v1716_v2 = vadd.f32 %v1708_v1, %v5432_v17 }
 0x72c   : > { %1719 = vst.msk [vmem:[#allocation2 + $0x8] sm:$0xff] %vm841_vm2, %v1716_v2 }
 0x72f   : > { %v1710_v4 = vpop.f32.mrf.mxu1 }
 0x730   : > { %v1711_v5 = vadd.f32 %v4461_v62, %v1710_v4 }
 0x732   : > { %v1717_v6 = vadd.f32 %v1711_v5, %v5439_v19 }
 0x733   : > { %v5479_v8 = vld [vmem:[#allocation2 + $0x8] sm:$0xff] }
 0x734   : > { %1720 = vst.msk [vmem:[#allocation2 + $0x10] sm:$0xff] %vm841_vm2, %v1717_v6  ;;  %4188 = vmatmul.msk.f32.vlgmr.msra.gmra.mxu3 %vm841_vm2, %v5479_v8  ;;  %4192 = vmatmul.msk.f32.gmra.mxu0 %vm841_vm2, %v5479_v8 }
 0x735   : > { %v1751_v17 = vpop.f32.mrf.mxu2 }
 0x736   : > { %v1752_v9 = vadd.f32 %v4462_v7, %v1751_v17 }
 0x737   : > { %v1713_v11 = vpop.f32.mrf.mxu1 }
 0x738   : > { %v1757_v12 = vadd.f32 %v1752_v9, %v1722_v10  ;;  %v1714_v13 = vadd.f32 %v4461_v62, %v1713_v11 }
 0x73a   : > { %1759 = vst.msk [vmem:[#allocation3] sm:$0xff] %vm841_vm2, %v1757_v12  ;;  %v1718_v19 = vadd.f32 %v1714_v13, %v5445_v26 }
 0x73b   : > { %v5488_v14 = vld [vmem:[#allocation2 + $0x10] sm:$0xff] }
 0x73c   : > { %1721 = vst.msk [vmem:[#allocation2 + $0x18] sm:$0xff] %vm841_vm2, %v1718_v19  ;;  %4189 = vmatmul.msk.f32.gmra.mxu3 %vm841_vm2, %v5488_v14  ;;  %4193 = vmatmul.msk.f32.gmra.mxu0 %vm841_vm2, %v5488_v14 }
 0x73d   : > { %v1754_v15 = vpop.f32.mrf.mxu2 }
 0x73e   : > { %v1755_v16 = vadd.f32 %v4462_v7, %v1754_v15 }
 0x73f   : > { %v1862_v26 = vpop.f32.mrf.mxu1 }
 0x740   : > { %v1758_v22 = vadd.f32 %v1755_v16, %v1723_v21  ;;  %v2023_v16 = vld [vmem:[#allocation16 + $0x78] sm:$0xff]  ;;  %v2022_v21 = vld [vmem:[#allocation16 + $0x70] sm:$0xff] }
 0x741   : > { %2041 = vmatpush.msrb.mxu3 %v2023_v16  ;;  %v2083_v16 = vld [vmem:[#allocation19 + $0xb8] sm:$0xff] }
 0x742   : > { %1760 = vst.msk [vmem:[#allocation3 + $0x8] sm:$0xff] %vm841_vm2, %v1758_v22  ;;  %v2021_v22 = vld [vmem:[#allocation16 + $0x68] sm:$0xff] }
 0x743   : > { %v5496_v27 = vld [vmem:[#allocation2 + $0x18] sm:$0xff]  ;;  %2042 = vmatpush.msrb.mxu3 %v2022_v21 }
 0x744   : > { %4190 = vmatmul.msk.f32.gmra.mxu3 %vm841_vm2, %v5496_v27  ;;  %v2064_v21 = vld [vmem:[#allocation19 + $0x20] sm:$0xff] }
 0x745   : > { %2043 = vmatpush.msrb.mxu3 %v2021_v22  ;;  %v2065_v22 = vld [vmem:[#allocation19 + $0x28] sm:$0xff] }
 0x747   : > { %v1865_v24 = vpop.f32.mrf.mxu1 }
 0x74f   : > { %v1868_v37 = vpop.f32.mrf.mxu1 }
 0x7b1   : > { %v1833_v28 = vpop.f32.mrf.mxu0 }
 0x7b7   : > { %v1801_v25 = vpop.f32.mrf.mxu3 }
 0x7b8   : > { %v1831_v32 = vadd.f32 %v1830_v18, %v1801_v25 }
 0x7b9   : > { %v1836_v38 = vpop.f32.mrf.mxu0 }
 0x7ba   : > { %v1871_v20 = vadd.f32 %v1862_v26, %v1831_v32  ;;  %v2020_v26 = vld [vmem:[#allocation16 + $0x60] sm:$0xff] }
 0x7bb   : > { %2044 = vmatpush.msrb.mxu3 %v2020_v26  ;;  %v2066_v26 = vld [vmem:[#allocation19 + $0x30] sm:$0xff] }
 0x7bc   : > { %v1879_v35 = vadd.f32 %v4463_v23, %v1871_v20 }
 0x7be   : > { %v4200_v33 = vmul.f32 -1.442695, %v1879_v35 }
 0x7bf   : > { %v1804_v30 = vpop.f32.mrf.mxu3 }
 0x7c0   : > { %v1834_v29 = vadd.f32 %v1833_v28, %v1804_v30  ;;  %4502 = vpow2.f32 %v4200_v33 }
 0x7c2   : > { %v1872_v31 = vadd.f32 %v1865_v24, %v1834_v29 }
 0x7c4   : > { %v1880_v34 = vadd.f32 %v4463_v23, %v1872_v31 }
 0x7c6   : > { %v4201_v36 = vmul.f32 -1.442695, %v1880_v34  ;;  %v4503_v43 = vpop.eup %4502  ;;  %v1964_v34 = vld [vmem:[#allocation13 + $0x78] sm:$0xff] }
 0x7c7   : > { %v1807_v39 = vpop.f32.mrf.mxu3  ;;  %v1891_v47 = vadd.f32 1.0, %v4503_v43  ;;  %1997 = vmatpush.msrb.mxu2 %v1964_v34  ;;  %v2109_v43 = vld [vmem:[#allocation19 + $0x188] sm:$0xff]  ;;  %v2100_v34 = vld [vmem:[#allocation19 + $0x140] sm:$0xff] }
 0x7c8   : > { %4504 = vpow2.f32 %v4201_v36  ;;  %v1837_v40 = vadd.f32 %v1836_v38, %v1807_v39  ;;  %v1963_v36 = vld [vmem:[#allocation13 + $0x70] sm:$0xff]  ;;  %v1961_v38 = vld [vmem:[#allocation13 + $0x60] sm:$0xff]  ;;  %2201 = vmatpush.msra.mxu1 %v2109_v43 }
 0x7c9   : > { %v1905_v11 = vand.u32 2147483648, %v1891_v47  ;;  %vm1899_vm7 = vweird.f32 %v1891_v47  ;;  %v1903_v12 = vand.u32 2147483647, %v1891_v47  ;;  %1998 = vmatpush.msrb.mxu2 %v1963_v36  ;;  %v2101_v36 = vld [vmem:[#allocation19 + $0x148] sm:$0xff]  ;;  %v2087_v43 = vld [vmem:[#allocation19 + $0xd8] sm:$0xff] }
 0x7ca   : > { %v1873_v41 = vadd.f32 %v1868_v37, %v1837_v40  ;;  %v1962_v37 = vld [vmem:[#allocation13 + $0x68] sm:$0xff] }
 0x7cb   : > { %v1906_v19 = vor.u32 1.1754944e-38, %v1905_v11  ;;  %vm1904_vm9 = vcmp.eq.f32.partialorder %v1903_v12, 8.507059e+37  ;;  %1999 = vmatpush.msrb.mxu2 %v1962_v37  ;;  %v2098_v11 = vld [vmem:[#allocation19 + $0x130] sm:$0xff]  ;;  %v2099_v12 = vld [vmem:[#allocation19 + $0x138] sm:$0xff] }
 0x7cc   : > { %v1881_v42 = vadd.f32 %v4463_v23, %v1873_v41 }
 0x7cd   : > { %2000 = vmatpush.msrb.mxu2 %v1961_v38 }
 0x7ce   : > { %v4505_v44 = vpop.eup %4504  ;;  %v4202_v45 = vmul.f32 -1.442695, %v1881_v42  ;;  %v2108_v42 = vld [vmem:[#allocation19 + $0x180] sm:$0xff] }
 0x7cf   : > { %v1892_v46 = vadd.f32 1.0, %v4505_v44  ;;  %v2110_v44 = vld [vmem:[#allocation19 + $0x190] sm:$0xff]  ;;  %2178 = vmatpush.msra.mxu0 %v2108_v42 }
 0x7d0   : > { %4506 = vpow2.f32 %v4202_v45  ;;  %v2111_v45 = vld [vmem:[#allocation19 + $0x198] sm:$0xff]  ;;  %2224 = vmatpush.msra.mxu2 %v2110_v44  ;;  %v2086_v42 = vld [vmem:[#allocation19 + $0xd0] sm:$0xff]  ;;  %v2068_v44 = vld [vmem:[#allocation19 + $0x40] sm:$0xff] }
 0x7d1   : > { %4508 = vrcp.f32 %v1892_v46  ;;  %v1920_v54 = vand.u32 2147483648, %v1892_v46  ;;  %v1918_v56 = vand.u32 2147483647, %v1892_v46  ;;  %vm1914_vm1 = vweird.f32 %v1892_v46  ;;  %2247 = vmatpush.msra.mxu3 %v2111_v45  ;;  %v2069_v45 = vld [vmem:[#allocation19 + $0x48] sm:$0xff] }
 0x7d2   : > { %4510 = vrcp.f32 %v1891_v47 }
 0x7d3   : > { %v1921_v60 = vor.u32 1.1754944e-38, %v1920_v54  ;;  %vm1919_vm14 = vcmp.eq.f32.partialorder %v1918_v56, 8.507059e+37  ;;  %v2060_v54 = vld [vmem:[#allocation19] sm:$0xff]  ;;  %v2062_v56 = vld [vmem:[#allocation19 + $0x10] sm:$0xff] }
 0x7d6   : > { %v4507_v48 = vpop.eup %4506 }
 0x7d7   : > { %v4509_v49 = vpop.eup %4508  ;;  %v1893_v50 = vadd.f32 1.0, %v4507_v48  ;;  %v2094_v48 = vld [vmem:[#allocation19 + $0x110] sm:$0xff] }
 0x7d8   : > { %v1910_v51 = vmul.f32 %v4509_v49, %v1892_v46  ;;  %v4511_v53 = vpop.eup %4510  ;;  %vm1915_vm0 = vweird.f32 %v4509_v49  ;;  %v2092_v46 = vld [vmem:[#allocation19 + $0x100] sm:$0xff]  ;;  %2225 = vmatpush.msra.mxu2 %v2094_v48 }
 0x7d9   : > { %4512 = vrcp.f32 %v1893_v50  ;;  %v1895_v58 = vmul.f32 %v4511_v53, %v1891_v47  ;;  %vm1916_vm13 = vmor %vm1914_vm1, %vm1915_vm0  ;;  %v1935_v2 = vand.u32 2147483648, %v1893_v50  ;;  %v1933_v4 = vand.u32 2147483647, %v1893_v50  ;;  %v2093_v47 = vld [vmem:[#allocation19 + $0x108] sm:$0xff]  ;;  %2179 = vmatpush.msra.mxu0 %v2092_v46  ;;  %v2071_v46 = vld [vmem:[#allocation19 + $0x58] sm:$0xff] }
 0x7da   : > { %v1911_v52 = vsub.f32 1.0, %v1910_v51  ;;  %vm1929_vm3 = vweird.f32 %v1893_v50  ;;  %vm1900_vm6 = vweird.f32 %v4511_v53  ;;  %2202 = vmatpush.msra.mxu1 %v2093_v47  ;;  %v2077_v51 = vld [vmem:[#allocation19 + $0x88] sm:$0xff] }
 0x7db   : > { %v1896_v1 = vsub.f32 1.0, %v1895_v58  ;;  %v1936_v7 = vor.u32 1.1754944e-38, %v1935_v2  ;;  %vm1934_vm5 = vcmp.eq.f32.partialorder %v1933_v4, 8.507059e+37  ;;  %vm1901_vm8 = vmor %vm1899_vm7, %vm1900_vm6  ;;  %v4464_v58 = vld [vmem:[#allocation18 + $0x3] ss:$0 sm:$0xff]  ;;  %v2112_v4 = vld [vmem:[#allocation19 + $0x1a0] sm:$0xff] }
 0x7dc   : > { %v1912_v55 = vmul.f32 %v4509_v49, %v1911_v52  ;;  %v2078_v52 = vld [vmem:[#allocation19 + $0x90] sm:$0xff]  ;;  %2203 = vmatpush.msra.mxu1 %v2077_v51 }
 0x7dd   : > { %v1897_v6 = vmul.f32 %v4511_v53, %v1896_v1  ;;  %2226 = vmatpush.msra.mxu2 %v2078_v52  ;;  %v4465_v1 = vld [vmem:[#allocation15 + $0x3] ss:$0 sm:$0xff]  ;;  %v2122_v51 = vld [vmem:[#allocation19 + $0x1f0] sm:$0xff] }
 0x7de   : > { %v1913_v57 = vadd.f32 %v4509_v49, %v1912_v55  ;;  %v2061_v55 = vld [vmem:[#allocation19 + $0x8] sm:$0xff]  ;;  %v2123_v52 = vld [vmem:[#allocation19 + $0x1f8] sm:$0xff] }
 0x7df   : > { %v4513_v59 = vpop.eup %4512  ;;  %v1898_v10 = vadd.f32 %v4511_v53, %v1897_v6  ;;  %2204 = vmatpush.msra.mxu1 %v2061_v55  ;;  %2227 = vmatpush.msra.mxu2 %v2062_v56  ;;  %v2114_v6 = vld [vmem:[#allocation19 + $0x1b0] sm:$0xff]  ;;  %v2107_v56 = vld [vmem:[#allocation19 + $0x178] sm:$0xff] }
 0x7e0   : > { %v1917_v61 = vsel %vm1916_vm13, %v4509_v49, %v1913_v57  ;;  %v1925_v62 = vmul.f32 %v4513_v59, %v1893_v50  ;;  %vm1930_vm15 = vweird.f32 %v4513_v59  ;;  %v2095_v49 = vld [vmem:[#allocation19 + $0x118] sm:$0xff]  ;;  %v2076_v50 = vld [vmem:[#allocation19 + $0x80] sm:$0xff]  ;;  %v2106_v55 = vld [vmem:[#allocation19 + $0x170] sm:$0xff] }
 0x7e1   : > { %v1922_v63 = vsel %vm1919_vm14, %v1921_v60, %v1917_v61  ;;  %vm1931_vm4 = vmor %vm1929_vm3, %vm1930_vm15  ;;  %v1902_v13 = vsel %vm1901_vm8, %v4511_v53, %v1898_v10  ;;  %2248 = vmatpush.msra.mxu3 %v2095_v49  ;;  %2180 = vmatpush.msra.mxu0 %v2076_v50  ;;  %v2079_v53 = vld [vmem:[#allocation19 + $0x98] sm:$0xff]  ;;  %v2017_v61 = vld [vmem:[#allocation3] sm:$0xff] }
 0x7e2   : > { %1950 = vrot.lane.b32.xlu0 %v1922_v63, %s5021_s0  ;;  %v1926_v0 = vsub.f32 1.0, %v1925_v62  ;;  %v1907_v15 = vsel %vm1904_vm9, %v1906_v19, %v1902_v13  ;;  %v1940_v18 = vmul.f32 2.0, %v1922_v63  ;;  %v2063_v57 = vld [vmem:[#allocation19 + $0x18] sm:$0xff]  ;;  %v2080_v13 = vld [vmem:[#allocation19 + $0xa0] sm:$0xff]  ;;  %v2081_v19 = vld [vmem:[#allocation19 + $0xa8] sm:$0xff] }
 0x7e3   : > { %v1939_v30 = vmul.f32 2.0, %v1907_v15  ;;  %2249 = vmatpush.msra.mxu3 %v2079_v53  ;;  %2181 = vmatpush.msra.mxu0 %v2060_v54  ;;  %v2120_v49 = vld [vmem:[#allocation19 + $0x1e0] sm:$0xff]  ;;  %v2121_v50 = vld [vmem:[#allocation19 + $0x1e8] sm:$0xff] }
 0x7e4   : > { %v1927_v3 = vmul.f32 %v4513_v59, %v1926_v0  ;;  %v4204_v25 = vadd.f32 -1.0, %v1940_v18  ;;  %v2104_v53 = vld [vmem:[#allocation19 + $0x160] sm:$0xff]  ;;  %v2105_v54 = vld [vmem:[#allocation19 + $0x168] sm:$0xff] }
 0x7e5   : > { %v4203_v29 = vadd.f32 -1.0, %v1939_v30  ;;  %2250 = vmatpush.msra.mxu3 %v2063_v57  ;;  %2270 = vmatpush.msrb.mxu0 %v2112_v4  ;;  %v2116_v30 = vld [vmem:[#allocation19 + $0x1c0] sm:$0xff] }
 0x7e6   : > { %v1928_v5 = vadd.f32 %v4513_v59, %v1927_v3  ;;  %v2088_v57 = vld [vmem:[#allocation19 + $0xe0] sm:$0xff] }
 0x7e7   : > { %v2660_v4 = vld [vmem:[#allocation22 + $0x2f0] sm:$0xff] }
 0x7e8   : > { %v1932_v17 = vsel %vm1931_vm4, %v4513_v59, %v1928_v5  ;;  %v2113_v5 = vld [vmem:[#allocation19 + $0x1a8] sm:$0xff] }
 0x7e9   : > { %v1937_v9 = vsel %vm1934_vm5, %v1936_v7, %v1932_v17  ;;  %2293 = vmatpush.msrb.mxu1 %v2113_v5  ;;  %v2115_v7 = vld [vmem:[#allocation19 + $0x1b8] sm:$0xff]  ;;  %v2096_v17 = vld [vmem:[#allocation19 + $0x120] sm:$0xff] }
 0x7ea   : > { %1952 = vrot.lane.b32.xlu1 %v1937_v9, %s5021_s0  ;;  %v1941_v23 = vmul.f32 2.0, %v1937_v9  ;;  %v2097_v9 = vld [vmem:[#allocation19 + $0x128] sm:$0xff]  ;;  %2271 = vmatpush.msrb.mxu0 %v2096_v17  ;;  %v2692_v5 = vld [vmem:[#allocation22 + $0x3f0] sm:$0xff]  ;;  %v2658_v17 = vld [vmem:[#allocation22 + $0x2e0] sm:$0xff] }
 0x7eb   : > { %2294 = vmatpush.msrb.mxu1 %v2097_v9  ;;  %v2690_v9 = vld [vmem:[#allocation22 + $0x3e0] sm:$0xff] }
 0x7ec   : > { %v4205_v24 = vadd.f32 -1.0, %v1941_v23  ;;  %2272 = vmatpush.msrb.mxu0 %v2080_v13  ;;  %v2018_v23 = vld [vmem:[#allocation3 + $0x8] sm:$0xff]  ;;  %v2688_v13 = vld [vmem:[#allocation22 + $0x3d0] sm:$0xff] }
 0x7ed   : > { %2295 = vmatpush.msrb.mxu1 %v2081_v19  ;;  %v2590_v19 = vld [vmem:[#allocation22 + $0xc0] sm:$0xff] }
 0x7ee   : > { %2273 = vmatpush.msrb.mxu0 %v2064_v21  ;;  %v2686_v21 = vld [vmem:[#allocation22 + $0x3c0] sm:$0xff] }
 0x7ef   : > { %2296 = vmatpush.msrb.mxu1 %v2065_v22  ;;  %v2588_v22 = vld [vmem:[#allocation22 + $0xb0] sm:$0xff] }
 0x7f2   : > { %1948 = vrot.lane.b32.xlu1 %v1907_v15, %s5021_s0  ;;  %v2082_v15 = vld [vmem:[#allocation19 + $0xb0] sm:$0xff] }
 0x854   : > { %v1951_v32 = vpop.permute.xlu0 %1950 }
 0x855   : > { %v1958_v20 = vmul.f32 %v4204_v25, %v1951_v32 }
 0x857   : > { %1975 = vrot.lane.b32.xlu2 %v1958_v20, %s5022_s8 }
 0x85c   : > { %v1953_v28 = vpop.permute.xlu1 %1952 }
 0x85d   : > { %v1959_v35 = vmul.f32 %v4205_v24, %v1953_v28 }
 0x85f   : > { %1977 = vrot.lane.b32.xlu0 %v1959_v35, %s5022_s8 }
 0x864   : > { %v1949_v31 = vpop.permute.xlu1 %1948 }
 0x865   : > { %v1957_v33 = vmul.f32 %v4203_v29, %v1949_v31  ;;  %v2117_v29 = vld [vmem:[#allocation19 + $0x1c8] sm:$0xff]  ;;  %v2118_v31 = vld [vmem:[#allocation19 + $0x1d0] sm:$0xff] }
 0x867   : > { %1973 = vrot.lane.b32.xlu2 %v1957_v33, %s5022_s8  ;;  %v2119_v33 = vld [vmem:[#allocation19 + $0x1d8] sm:$0xff] }
 0x8b1   : > { %v1976_v39 = vpop.permute.xlu2 %1975 }
 0x8b2   : > { %4209 = vmatmul.msk.f32.vlgmr.msrb.gmra.mxu3 %vm841_vm2, %v1976_v39 }
 0x8b3   : > { %2339 = vmatpush.msrb.mxu3 %v2115_v7  ;;  %v2626_v7 = vld [vmem:[#allocation22 + $0x1e0] sm:$0xff] }
 0x8b5   : > { %2340 = vmatpush.msrb.mxu3 %v2099_v12  ;;  %v2656_v12 = vld [vmem:[#allocation22 + $0x2d0] sm:$0xff] }
 0x8b7   : > { %2341 = vmatpush.msrb.mxu3 %v2083_v16  ;;  %v2654_v16 = vld [vmem:[#allocation22 + $0x2c0] sm:$0xff] }
 0x8c1   : > { %v1974_v40 = vpop.permute.xlu2 %1973 }
 0x8c2   : > { %4206 = vmatmul.msk.f32.vlgmr.msrb.gmra.mxu2 %vm841_vm2, %v1974_v40  ;;  %v2084_v40 = vld [vmem:[#allocation19 + $0xc0] sm:$0xff] }
 0x8c3   : > { %2316 = vmatpush.msrb.mxu2 %v2114_v6  ;;  %v2594_v6 = vld [vmem:[#allocation22 + $0xe0] sm:$0xff] }
 0x8c5   : > { %2317 = vmatpush.msrb.mxu2 %v2098_v11  ;;  %v2624_v11 = vld [vmem:[#allocation22 + $0x1d0] sm:$0xff] }
 0x8c7   : > { %2318 = vmatpush.msrb.mxu2 %v2082_v15  ;;  %v2622_v15 = vld [vmem:[#allocation22 + $0x1c0] sm:$0xff] }
 0x8c9   : > { %2319 = vmatpush.msrb.mxu2 %v2066_v26  ;;  %v2620_v26 = vld [vmem:[#allocation22 + $0x1b0] sm:$0xff] }
 0x8ca   : > { %4207 = vmatmul.msk.f32.gmra.mxu2 %vm841_vm2, %v1976_v39  ;;  %v2103_v39 = vld [vmem:[#allocation19 + $0x158] sm:$0xff] }
 0x8d1   : > { %v1978_v41 = vpop.permute.xlu0 %1977 }
 0x8d2   : > { %4208 = vmatmul.msk.f32.gmra.mxu2 %vm841_vm2, %v1978_v41  ;;  %4210 = vmatmul.msk.f32.gmra.mxu3 %vm841_vm2, %v1978_v41  ;;  %v2085_v41 = vld [vmem:[#allocation19 + $0xc8] sm:$0xff] }
 0x935   : > { %v2046_v59 = vpop.f32.mrf.mxu3 }
 0x936   : > { %v2047_v60 = vadd.f32 %v4464_v58, %v2046_v59  ;;  %v2090_v59 = vld [vmem:[#allocation19 + $0xf0] sm:$0xff] }
 0x938   : > { %v2052_v62 = vadd.f32 %v2047_v60, %v2017_v61  ;;  %v2091_v60 = vld [vmem:[#allocation19 + $0xf8] sm:$0xff]  ;;  %v2072_v61 = vld [vmem:[#allocation19 + $0x60] sm:$0xff] }
 0x93a   : > { %2054 = vst.msk [vmem:[#allocation3] sm:$0xff] %vm841_vm2, %v2052_v62  ;;  %v2073_v62 = vld [vmem:[#allocation19 + $0x68] sm:$0xff] }
 0x941   : > { %v2056_v63 = vld [vmem:[#allocation3] sm:$0xff] }
 0x942   : > { %v5512_v0 = vmax.f32 %v2056_v63, 0.0  ;;  %v2074_v63 = vld [vmem:[#allocation19 + $0x70] sm:$0xff] }
 0x944   : > { %4211 = vmatmul.msk.f32.vlgmr.msra.gmra.mxu0 %vm841_vm2, %v5512_v0  ;;  %4213 = vmatmul.msk.f32.vlgmr.msra.gmra.mxu1 %vm841_vm2, %v5512_v0 }
 0x945   : > { %4215 = vmatmul.msk.f32.vlgmr.msra.gmra.mxu2 %vm841_vm2, %v5512_v0  ;;  %4217 = vmatmul.msk.f32.vlgmr.msra.gmra.mxu3 %vm841_vm2, %v5512_v0  ;;  %v2002_v2 = vpop.f32.mrf.mxu2 }
 0x946   : > { %v2003_v3 = vadd.f32 %v4465_v1, %v2002_v2  ;;  %2362 = vmatpush.msra.mxu0 %v2116_v30  ;;  %2385 = vmatpush.msra.mxu1 %v2117_v29  ;;  %v2596_v2 = vld [vmem:[#allocation22 + $0xf0] sm:$0xff]  ;;  %v2582_v29 = vld [vmem:[#allocation22 + $0x80] sm:$0xff] }
 0x947   : > { %2408 = vmatpush.msra.mxu2 %v2118_v31  ;;  %v2680_v30 = vld [vmem:[#allocation22 + $0x390] sm:$0xff]  ;;  %v2614_v31 = vld [vmem:[#allocation22 + $0x180] sm:$0xff] }
 0x948   : > { %v2011_v10 = vadd.f32 %v2003_v3, %v5479_v8  ;;  %v2067_v8 = vld [vmem:[#allocation19 + $0x38] sm:$0xff]  ;;  %2363 = vmatpush.msra.mxu0 %v2100_v34  ;;  %2386 = vmatpush.msra.mxu1 %v2101_v36  ;;  %v2628_v3 = vld [vmem:[#allocation22 + $0x1f0] sm:$0xff]  ;;  %v2678_v34 = vld [vmem:[#allocation22 + $0x380] sm:$0xff] }
 0x949   : > { %2342 = vmatpush.msrb.mxu3 %v2067_v8  ;;  %v2652_v8 = vld [vmem:[#allocation22 + $0x2b0] sm:$0xff] }
 0x94a   : > { %2014 = vst.msk [vmem:[#allocation2 + $0x8] sm:$0xff] %vm841_vm2, %v2011_v10  ;;  %2364 = vmatpush.msra.mxu0 %v2084_v40  ;;  %2387 = vmatpush.msra.mxu1 %v2085_v41  ;;  %v2592_v10 = vld [vmem:[#allocation22 + $0xd0] sm:$0xff]  ;;  %v2642_v40 = vld [vmem:[#allocation22 + $0x260] sm:$0xff] }
 0x94b   : > { %2431 = vmatpush.msra.mxu3 %v2119_v33  ;;  %v2646_v33 = vld [vmem:[#allocation22 + $0x280] sm:$0xff]  ;;  %v2580_v36 = vld [vmem:[#allocation22 + $0x70] sm:$0xff] }
 0x94c   : > { %2365 = vmatpush.msra.mxu0 %v2068_v44  ;;  %2388 = vmatpush.msra.mxu1 %v2069_v45  ;;  %v2674_v41 = vld [vmem:[#allocation22 + $0x360] sm:$0xff]  ;;  %v2640_v44 = vld [vmem:[#allocation22 + $0x250] sm:$0xff] }
 0x94d   : > { %v2005_v18 = vpop.f32.mrf.mxu2  ;;  %2432 = vmatpush.msra.mxu3 %v2103_v39  ;;  %v2578_v39 = vld [vmem:[#allocation22 + $0x60] sm:$0xff]  ;;  %v2672_v45 = vld [vmem:[#allocation22 + $0x350] sm:$0xff] }
 0x94e   : > { %v2006_v25 = vadd.f32 %v4465_v1, %v2005_v18  ;;  %v2684_v18 = vld [vmem:[#allocation22 + $0x3b0] sm:$0xff] }
 0x94f   : > { %2433 = vmatpush.msra.mxu3 %v2087_v43  ;;  %v2608_v43 = vld [vmem:[#allocation22 + $0x150] sm:$0xff] }
 0x950   : > { %v2012_v32 = vadd.f32 %v2006_v25, %v5488_v14  ;;  %v2102_v14 = vld [vmem:[#allocation19 + $0x150] sm:$0xff] }
 0x951   : > { %2409 = vmatpush.msra.mxu2 %v2102_v14  ;;  %2434 = vmatpush.msra.mxu3 %v2071_v46  ;;  %v2586_v25 = vld [vmem:[#allocation22 + $0xa0] sm:$0xff]  ;;  %v2676_v14 = vld [vmem:[#allocation22 + $0x370] sm:$0xff] }
 0x952   : > { %2015 = vst.msk [vmem:[#allocation2 + $0x10] sm:$0xff] %vm841_vm2, %v2012_v32  ;;  %v2618_v32 = vld [vmem:[#allocation22 + $0x1a0] sm:$0xff] }
 0x953   : > { %2410 = vmatpush.msra.mxu2 %v2086_v42  ;;  %v2576_v42 = vld [vmem:[#allocation22 + $0x50] sm:$0xff]  ;;  %v2606_v46 = vld [vmem:[#allocation22 + $0x140] sm:$0xff] }
 0x955   : > { %v2008_v20 = vpop.f32.mrf.mxu2  ;;  %v2049_v24 = vpop.f32.mrf.mxu3 }
 0x956   : > { %v2009_v28 = vadd.f32 %v4465_v1, %v2008_v20  ;;  %v2050_v35 = vadd.f32 %v4464_v58, %v2049_v24  ;;  %v2089_v58 = vld [vmem:[#allocation19 + $0xe8] sm:$0xff]  ;;  %v2075_v1 = vld [vmem:[#allocation19 + $0x78] sm:$0xff]  ;;  %v2650_v20 = vld [vmem:[#allocation22 + $0x2a0] sm:$0xff] }
 0x957   : > { %v2584_v24 = vld [vmem:[#allocation22 + $0x90] sm:$0xff] }
 0x958   : > { %v2013_v37 = vadd.f32 %v2009_v28, %v5496_v27  ;;  %v2053_v38 = vadd.f32 %v2050_v35, %v2018_v23  ;;  %v2070_v27 = vld [vmem:[#allocation19 + $0x50] sm:$0xff]  ;;  %v2616_v28 = vld [vmem:[#allocation22 + $0x190] sm:$0xff] }
 0x959   : > { %2411 = vmatpush.msra.mxu2 %v2070_v27  ;;  %v2682_v23 = vld [vmem:[#allocation22 + $0x3a0] sm:$0xff]  ;;  %v2648_v35 = vld [vmem:[#allocation22 + $0x290] sm:$0xff] }
 0x95a   : > { %2016 = vst.msk [vmem:[#allocation2 + $0x18] sm:$0xff] %vm841_vm2, %v2013_v37  ;;  %v2612_v37 = vld [vmem:[#allocation22 + $0x170] sm:$0xff]  ;;  %v2574_v27 = vld [vmem:[#allocation22 + $0x40] sm:$0xff] }
 0x95b   : > { %2055 = vst.msk [vmem:[#allocation3 + $0x8] sm:$0xff] %vm841_vm2, %v2053_v38  ;;  %v2644_v38 = vld [vmem:[#allocation22 + $0x270] sm:$0xff] }
 0x962   : > { %v2057_v47 = vld [vmem:[#allocation3 + $0x8] sm:$0xff] }
 0x963   : > { %v5529_v48 = vmax.f32 %v2057_v47, 0.0  ;;  %v2638_v47 = vld [vmem:[#allocation22 + $0x240] sm:$0xff] }
 0x965   : > { %4212 = vmatmul.msk.f32.gmra.mxu0 %vm841_vm2, %v5529_v48  ;;  %4214 = vmatmul.msk.f32.gmra.mxu1 %vm841_vm2, %v5529_v48 }
 0x966   : > { %4216 = vmatmul.msk.f32.gmra.mxu2 %vm841_vm2, %v5529_v48  ;;  %4218 = vmatmul.msk.f32.gmra.mxu3 %vm841_vm2, %v5529_v48 }
 0x96d   : > { %4219 = vmatmul.msk.f32.vlgmr.msrb.gmra.mxu0 %vm841_vm2, %v5512_v0  ;;  %4221 = vmatmul.msk.f32.vlgmr.msrb.gmra.mxu1 %vm841_vm2, %v5512_v0 }
 0x96e   : > { %4223 = vmatmul.msk.f32.vlgmr.msrb.gmra.mxu2 %vm841_vm2, %v5512_v0  ;;  %4225 = vmatmul.msk.f32.vlgmr.msrb.gmra.mxu3 %vm841_vm2, %v5512_v0 }
 0x96f   : > { %2454 = vmatpush.msrb.mxu0 %v2120_v49  ;;  %2477 = vmatpush.msrb.mxu1 %v2121_v50  ;;  %v2670_v49 = vld [vmem:[#allocation22 + $0x340] sm:$0xff]  ;;  %v2572_v50 = vld [vmem:[#allocation22 + $0x30] sm:$0xff] }
 0x970   : > { %2500 = vmatpush.msrb.mxu2 %v2122_v51  ;;  %2523 = vmatpush.msrb.mxu3 %v2123_v52  ;;  %v2604_v51 = vld [vmem:[#allocation22 + $0x130] sm:$0xff] }
 0x971   : > { %2455 = vmatpush.msrb.mxu0 %v2104_v53  ;;  %2478 = vmatpush.msrb.mxu1 %v2105_v54  ;;  %v2668_v52 = vld [vmem:[#allocation22 + $0x330] sm:$0xff]  ;;  %v2570_v53 = vld [vmem:[#allocation22 + $0x20] sm:$0xff] }
 0x972   : > { %2501 = vmatpush.msrb.mxu2 %v2106_v55  ;;  %2524 = vmatpush.msrb.mxu3 %v2107_v56  ;;  %v2602_v54 = vld [vmem:[#allocation22 + $0x120] sm:$0xff] }
 0x973   : > { %2456 = vmatpush.msrb.mxu0 %v2088_v57  ;;  %2479 = vmatpush.msrb.mxu1 %v2089_v58  ;;  %v2634_v55 = vld [vmem:[#allocation22 + $0x220] sm:$0xff]  ;;  %v2568_v57 = vld [vmem:[#allocation22 + $0x10] sm:$0xff] }
 0x974   : > { %2502 = vmatpush.msrb.mxu2 %v2090_v59  ;;  %2525 = vmatpush.msrb.mxu3 %v2091_v60  ;;  %v2666_v56 = vld [vmem:[#allocation22 + $0x320] sm:$0xff]  ;;  %v2600_v58 = vld [vmem:[#allocation22 + $0x110] sm:$0xff] }
 0x975   : > { %4220 = vmatmul.msk.f32.gmra.mxu0 %vm841_vm2, %v5529_v48  ;;  %4222 = vmatmul.msk.f32.gmra.mxu1 %vm841_vm2, %v5529_v48  ;;  %v2632_v59 = vld [vmem:[#allocation22 + $0x210] sm:$0xff] }
 0x976   : > { %4224 = vmatmul.msk.f32.gmra.mxu2 %vm841_vm2, %v5529_v48  ;;  %4226 = vmatmul.msk.f32.gmra.mxu3 %vm841_vm2, %v5529_v48  ;;  %v2664_v60 = vld [vmem:[#allocation22 + $0x310] sm:$0xff] }
 0x977   : > { %2457 = vmatpush.msrb.mxu0 %v2072_v61  ;;  %2480 = vmatpush.msrb.mxu1 %v2073_v62  ;;  %v2566_v61 = vld [vmem:[#allocation22] sm:$0xff] }
 0x978   : > { %2503 = vmatpush.msrb.mxu2 %v2074_v63  ;;  %2526 = vmatpush.msrb.mxu3 %v2075_v1  ;;  %v2598_v62 = vld [vmem:[#allocation22 + $0x100] sm:$0xff]  ;;  %v2597_v63 = vld [vmem:[#allocation22 + $0xf8] sm:$0xff] }
 0x979   : > { %v2629_v1 = vld [vmem:[#allocation22 + $0x1f8] sm:$0xff] }
 0x97d   : > { %4227 = vmatmul.msk.f32.vlgmr.msra.gmra.mxu0 %vm841_vm2, %v5512_v0  ;;  %4229 = vmatmul.msk.f32.vlgmr.msra.gmra.mxu1 %vm841_vm2, %v5512_v0 }
 0x97e   : > { %4231 = vmatmul.msk.f32.vlgmr.msra.gmra.mxu2 %vm841_vm2, %v5512_v0  ;;  %4233 = vmatmul.msk.f32.vlgmr.msra.gmra.mxu3 %vm841_vm2, %v5512_v0 }
 0x97f   : > { %2700 = vmatpush.msra.mxu0 %v2596_v2  ;;  %2723 = vmatpush.msra.mxu1 %v2628_v3  ;;  %v2630_v2 = vld [vmem:[#allocation22 + $0x200] sm:$0xff] }
 0x980   : > { %2746 = vmatpush.msra.mxu2 %v2660_v4  ;;  %2769 = vmatpush.msra.mxu3 %v2692_v5  ;;  %v2662_v3 = vld [vmem:[#allocation22 + $0x300] sm:$0xff]  ;;  %v2595_v4 = vld [vmem:[#allocation22 + $0xe8] sm:$0xff] }
 0x981   : > { %2701 = vmatpush.msra.mxu0 %v2594_v6  ;;  %2724 = vmatpush.msra.mxu1 %v2626_v7  ;;  %v2627_v5 = vld [vmem:[#allocation22 + $0x1e8] sm:$0xff]  ;;  %v2661_v6 = vld [vmem:[#allocation22 + $0x2f8] sm:$0xff] }
 0x982   : > { %2747 = vmatpush.msra.mxu2 %v2658_v17  ;;  %2770 = vmatpush.msra.mxu3 %v2690_v9  ;;  %v2693_v7 = vld [vmem:[#allocation22 + $0x3f8] sm:$0xff] }
 0x983   : > { %2702 = vmatpush.msra.mxu0 %v2592_v10  ;;  %2725 = vmatpush.msra.mxu1 %v2624_v11  ;;  %v2593_v17 = vld [vmem:[#allocation22 + $0xd8] sm:$0xff]  ;;  %v2659_v10 = vld [vmem:[#allocation22 + $0x2e8] sm:$0xff] }
 0x984   : > { %2748 = vmatpush.msra.mxu2 %v2656_v12  ;;  %2771 = vmatpush.msra.mxu3 %v2688_v13  ;;  %v2625_v9 = vld [vmem:[#allocation22 + $0x1d8] sm:$0xff]  ;;  %v2691_v11 = vld [vmem:[#allocation22 + $0x3e8] sm:$0xff] }
 0x985   : > { %4228 = vmatmul.msk.f32.gmra.mxu0 %vm841_vm2, %v5529_v48  ;;  %4230 = vmatmul.msk.f32.gmra.mxu1 %vm841_vm2, %v5529_v48  ;;  %v2591_v12 = vld [vmem:[#allocation22 + $0xc8] sm:$0xff] }
 0x986   : > { %4232 = vmatmul.msk.f32.gmra.mxu2 %vm841_vm2, %v5529_v48  ;;  %4234 = vmatmul.msk.f32.gmra.mxu3 %vm841_vm2, %v5529_v48  ;;  %v2623_v13 = vld [vmem:[#allocation22 + $0x1c8] sm:$0xff] }
 0x987   : > { %2703 = vmatpush.msra.mxu0 %v2590_v19  ;;  %2726 = vmatpush.msra.mxu1 %v2622_v15  ;;  %v2657_v19 = vld [vmem:[#allocation22 + $0x2d8] sm:$0xff] }
 0x988   : > { %2749 = vmatpush.msra.mxu2 %v2654_v16  ;;  %2772 = vmatpush.msra.mxu3 %v2686_v21  ;;  %v2689_v15 = vld [vmem:[#allocation22 + $0x3d8] sm:$0xff] }
 0x989   : > { %2704 = vmatpush.msra.mxu0 %v2588_v22  ;;  %2727 = vmatpush.msra.mxu1 %v2620_v26  ;;  %v2589_v16 = vld [vmem:[#allocation22 + $0xb8] sm:$0xff]  ;;  %v2655_v22 = vld [vmem:[#allocation22 + $0x2c8] sm:$0xff] }
 0x98a   : > { %2750 = vmatpush.msra.mxu2 %v2652_v8  ;;  %2773 = vmatpush.msra.mxu3 %v2684_v18  ;;  %v2621_v21 = vld [vmem:[#allocation22 + $0x1b8] sm:$0xff]  ;;  %v2687_v26 = vld [vmem:[#allocation22 + $0x3c8] sm:$0xff] }
 0x98b   : > { %2705 = vmatpush.msra.mxu0 %v2586_v25  ;;  %2728 = vmatpush.msra.mxu1 %v2618_v32  ;;  %v2587_v8 = vld [vmem:[#allocation22 + $0xa8] sm:$0xff]  ;;  %v2653_v25 = vld [vmem:[#allocation22 + $0x2b8] sm:$0xff] }
 0x98c   : > { %2751 = vmatpush.msra.mxu2 %v2650_v20  ;;  %2774 = vmatpush.msra.mxu3 %v2682_v23  ;;  %v2619_v18 = vld [vmem:[#allocation22 + $0x1a8] sm:$0xff]  ;;  %v2685_v32 = vld [vmem:[#allocation22 + $0x3b8] sm:$0xff] }
 0x98d   : > { %4235 = vmatmul.msk.f32.vlgmr.msrb.gmra.mxu0 %vm841_vm2, %v5512_v0  ;;  %4237 = vmatmul.msk.f32.vlgmr.msrb.gmra.mxu1 %vm841_vm2, %v5512_v0  ;;  %v2585_v20 = vld [vmem:[#allocation22 + $0x98] sm:$0xff] }
 0x98e   : > { %4239 = vmatmul.msk.f32.vlgmr.msrb.gmra.mxu2 %vm841_vm2, %v5512_v0  ;;  %4241 = vmatmul.msk.f32.vlgmr.msrb.gmra.mxu3 %vm841_vm2, %v5512_v0  ;;  %v2610_v0 = vld [vmem:[#allocation22 + $0x160] sm:$0xff]  ;;  %v2617_v23 = vld [vmem:[#allocation22 + $0x198] sm:$0xff] }
 0x98f   : > { %2706 = vmatpush.msra.mxu0 %v2584_v24  ;;  %2729 = vmatpush.msra.mxu1 %v2616_v28  ;;  %v2651_v24 = vld [vmem:[#allocation22 + $0x2a8] sm:$0xff] }
 0x990   : > { %2752 = vmatpush.msra.mxu2 %v2648_v35  ;;  %2775 = vmatpush.msra.mxu3 %v2680_v30  ;;  %v2683_v28 = vld [vmem:[#allocation22 + $0x3a8] sm:$0xff] }
 0x991   : > { %2707 = vmatpush.msra.mxu0 %v2582_v29  ;;  %2730 = vmatpush.msra.mxu1 %v2614_v31  ;;  %v2583_v35 = vld [vmem:[#allocation22 + $0x88] sm:$0xff]  ;;  %v2649_v29 = vld [vmem:[#allocation22 + $0x298] sm:$0xff] }
 0x992   : > { %2753 = vmatpush.msra.mxu2 %v2646_v33  ;;  %2776 = vmatpush.msra.mxu3 %v2678_v34  ;;  %v2615_v30 = vld [vmem:[#allocation22 + $0x188] sm:$0xff]  ;;  %v2681_v31 = vld [vmem:[#allocation22 + $0x398] sm:$0xff] }
 0x993   : > { %2708 = vmatpush.msra.mxu0 %v2580_v36  ;;  %2731 = vmatpush.msra.mxu1 %v2612_v37  ;;  %v2581_v33 = vld [vmem:[#allocation22 + $0x78] sm:$0xff]  ;;  %v2647_v36 = vld [vmem:[#allocation22 + $0x288] sm:$0xff] }
 0x994   : > { %2754 = vmatpush.msra.mxu2 %v2644_v38  ;;  %2777 = vmatpush.msra.mxu3 %v2676_v14  ;;  %v2613_v34 = vld [vmem:[#allocation22 + $0x178] sm:$0xff]  ;;  %v2679_v37 = vld [vmem:[#allocation22 + $0x388] sm:$0xff] }
 0x995   : > { %4236 = vmatmul.msk.f32.gmra.mxu0 %vm841_vm2, %v5529_v48  ;;  %4238 = vmatmul.msk.f32.gmra.mxu1 %vm841_vm2, %v5529_v48  ;;  %v2579_v38 = vld [vmem:[#allocation22 + $0x68] sm:$0xff] }
 0x996   : > { %4240 = vmatmul.msk.f32.gmra.mxu2 %vm841_vm2, %v5529_v48  ;;  %4242 = vmatmul.msk.f32.gmra.mxu3 %vm841_vm2, %v5529_v48  ;;  %v2636_v48 = vld [vmem:[#allocation22 + $0x230] sm:$0xff]  ;;  %v2611_v14 = vld [vmem:[#allocation22 + $0x168] sm:$0xff] }
 0x997   : > { %2709 = vmatpush.msra.mxu0 %v2578_v39  ;;  %2732 = vmatpush.msra.mxu1 %v2610_v0  ;;  %v2645_v39 = vld [vmem:[#allocation22 + $0x278] sm:$0xff] }
 0x998   : > { %2755 = vmatpush.msra.mxu2 %v2642_v40  ;;  %2778 = vmatpush.msra.mxu3 %v2674_v41  ;;  %v2677_v0 = vld [vmem:[#allocation22 + $0x378] sm:$0xff] }
 0x999   : > { %2710 = vmatpush.msra.mxu0 %v2576_v42  ;;  %2733 = vmatpush.msra.mxu1 %v2608_v43  ;;  %v2577_v40 = vld [vmem:[#allocation22 + $0x58] sm:$0xff]  ;;  %v2643_v42 = vld [vmem:[#allocation22 + $0x268] sm:$0xff] }
 0x99a   : > { %2756 = vmatpush.msra.mxu2 %v2640_v44  ;;  %2779 = vmatpush.msra.mxu3 %v2672_v45  ;;  %v2609_v41 = vld [vmem:[#allocation22 + $0x158] sm:$0xff]  ;;  %v2675_v43 = vld [vmem:[#allocation22 + $0x368] sm:$0xff] }
 0x99b   : > { %2711 = vmatpush.msra.mxu0 %v2574_v27  ;;  %2734 = vmatpush.msra.mxu1 %v2606_v46  ;;  %v2575_v44 = vld [vmem:[#allocation22 + $0x48] sm:$0xff]  ;;  %v2641_v27 = vld [vmem:[#allocation22 + $0x258] sm:$0xff] }
 0x99c   : > { %2757 = vmatpush.msra.mxu2 %v2638_v47  ;;  %2780 = vmatpush.msra.mxu3 %v2670_v49  ;;  %v2607_v45 = vld [vmem:[#allocation22 + $0x148] sm:$0xff]  ;;  %v2673_v46 = vld [vmem:[#allocation22 + $0x358] sm:$0xff] }
 0x99d   : > { %2712 = vmatpush.msra.mxu0 %v2572_v50  ;;  %2735 = vmatpush.msra.mxu1 %v2604_v51  ;;  %v2573_v47 = vld [vmem:[#allocation22 + $0x38] sm:$0xff]  ;;  %v2639_v50 = vld [vmem:[#allocation22 + $0x248] sm:$0xff] }
 0x99e   : > { %2758 = vmatpush.msra.mxu2 %v2636_v48  ;;  %2781 = vmatpush.msra.mxu3 %v2668_v52  ;;  %v2605_v49 = vld [vmem:[#allocation22 + $0x138] sm:$0xff]  ;;  %v2671_v51 = vld [vmem:[#allocation22 + $0x348] sm:$0xff]  ;;  %v5587_v48 = vld [vmem:[#allocation21] sm:$0xff] }
 0x99f   : > { %2713 = vmatpush.msra.mxu0 %v2570_v53  ;;  %2736 = vmatpush.msra.mxu1 %v2602_v54  ;;  %v2571_v52 = vld [vmem:[#allocation22 + $0x28] sm:$0xff]  ;;  %v2637_v54 = vld [vmem:[#allocation22 + $0x238] sm:$0xff] }
 0x9a0   : > { %2759 = vmatpush.msra.mxu2 %v2634_v55  ;;  %2782 = vmatpush.msra.mxu3 %v2666_v56  ;;  %v2603_v53 = vld [vmem:[#allocation22 + $0x128] sm:$0xff]  ;;  %v2669_v55 = vld [vmem:[#allocation22 + $0x338] sm:$0xff] }
 0x9a1   : > { %2714 = vmatpush.msra.mxu0 %v2568_v57  ;;  %2737 = vmatpush.msra.mxu1 %v2600_v58  ;;  %v2569_v56 = vld [vmem:[#allocation22 + $0x18] sm:$0xff]  ;;  %v2128_v58 = vperm.slane %v5587_v48, 0 }
 0x9a2   : > { %2760 = vmatpush.msra.mxu2 %v2632_v59  ;;  %2783 = vmatpush.msra.mxu3 %v2664_v60  ;;  %v2601_v57 = vld [vmem:[#allocation22 + $0x118] sm:$0xff]  ;;  %v2129_v59 = vperm.slane %v5587_v48, 1  ;;  %v2635_v60 = vld [vmem:[#allocation22 + $0x228] sm:$0xff] }
 0x9a3   : > { %2715 = vmatpush.msra.mxu0 %v2566_v61  ;;  %2738 = vmatpush.msra.mxu1 %v2598_v62  ;;  %v2667_v61 = vld [vmem:[#allocation22 + $0x328] sm:$0xff] }
 0x9a4   : > { %2761 = vmatpush.msra.mxu2 %v2630_v2  ;;  %2784 = vmatpush.msra.mxu3 %v2662_v3  ;;  %v2567_v62 = vld [vmem:[#allocation22 + $0x8] sm:$0xff]  ;;  %v2665_v2 = vld [vmem:[#allocation22 + $0x318] sm:$0xff] }
 0x9a5   : > { %2792 = vmatpush.msrb.mxu0 %v2597_v63  ;;  %2815 = vmatpush.msrb.mxu1 %v2629_v1  ;;  %v2599_v63 = vld [vmem:[#allocation22 + $0x108] sm:$0xff]  ;;  %v2633_v1 = vld [vmem:[#allocation22 + $0x218] sm:$0xff] }
 0x9a6   : > { %2838 = vmatpush.msrb.mxu2 %v2661_v6  ;;  %2861 = vmatpush.msrb.mxu3 %v2693_v7  ;;  %v2631_v7 = vld [vmem:[#allocation22 + $0x208] sm:$0xff] }
 0x9a7   : > { %2793 = vmatpush.msrb.mxu0 %v2595_v4  ;;  %2816 = vmatpush.msrb.mxu1 %v2627_v5 }
 0x9a8   : > { %2839 = vmatpush.msrb.mxu2 %v2659_v10  ;;  %2862 = vmatpush.msrb.mxu3 %v2691_v11  ;;  %v2919_v11 = vld [vmem:[#allocation22 + $0x4f0] sm:$0xff] }
 0x9a9   : > { %2794 = vmatpush.msrb.mxu0 %v2593_v17  ;;  %2817 = vmatpush.msrb.mxu1 %v2625_v9  ;;  %v2663_v17 = vld [vmem:[#allocation22 + $0x308] sm:$0xff] }
 0x9aa   : > { %2840 = vmatpush.msrb.mxu2 %v2657_v19  ;;  %2863 = vmatpush.msrb.mxu3 %v2689_v15  ;;  %v2131_v19 = vperm.slane %v5587_v48, 3  ;;  %v2917_v15 = vld [vmem:[#allocation22 + $0x4e0] sm:$0xff] }
 0x9ab   : > { %2795 = vmatpush.msrb.mxu0 %v2591_v12  ;;  %2818 = vmatpush.msrb.mxu1 %v2623_v13  ;;  %v2951_v12 = vld [vmem:[#allocation22 + $0x5f0] sm:$0xff]  ;;  %v2130_v13 = vperm.slane %v5587_v48, 2 }
 0x9ac   : > { %2841 = vmatpush.msrb.mxu2 %v2655_v22  ;;  %2864 = vmatpush.msrb.mxu3 %v2687_v26  ;;  %v2915_v26 = vld [vmem:[#allocation22 + $0x4d0] sm:$0xff] }
 0x9ad   : > { %2796 = vmatpush.msrb.mxu0 %v2589_v16  ;;  %2819 = vmatpush.msrb.mxu1 %v2621_v21  ;;  %v2949_v16 = vld [vmem:[#allocation22 + $0x5e0] sm:$0xff] }
 0x9ae   : > { %2842 = vmatpush.msrb.mxu2 %v2653_v25  ;;  %2865 = vmatpush.msrb.mxu3 %v2685_v32 }
 0x9af   : > { %2797 = vmatpush.msrb.mxu0 %v2587_v8  ;;  %2820 = vmatpush.msrb.mxu1 %v2619_v18  ;;  %v2947_v8 = vld [vmem:[#allocation22 + $0x5d0] sm:$0xff] }
 0x9b0   : > { %2843 = vmatpush.msrb.mxu2 %v2651_v24  ;;  %2866 = vmatpush.msrb.mxu3 %v2683_v28  ;;  %v2945_v24 = vld [vmem:[#allocation22 + $0x5c0] sm:$0xff]  ;;  %v2983_v28 = vld [vmem:[#allocation22 + $0x6f0] sm:$0xff] }
 0x9b1   : > { %2798 = vmatpush.msrb.mxu0 %v2585_v20  ;;  %2821 = vmatpush.msrb.mxu1 %v2617_v23  ;;  %v2913_v23 = vld [vmem:[#allocation22 + $0x4c0] sm:$0xff] }
 0x9b2   : > { %2844 = vmatpush.msrb.mxu2 %v2649_v29  ;;  %2867 = vmatpush.msrb.mxu3 %v2681_v31  ;;  %v2943_v29 = vld [vmem:[#allocation22 + $0x5b0] sm:$0xff]  ;;  %v2981_v31 = vld [vmem:[#allocation22 + $0x6e0] sm:$0xff] }
 0x9b3   : > { %2799 = vmatpush.msrb.mxu0 %v2583_v35  ;;  %2822 = vmatpush.msrb.mxu1 %v2615_v30  ;;  %v3015_v35 = vld [vmem:[#allocation22 + $0x7f0] sm:$0xff] }
 0x9b4   : > { %2845 = vmatpush.msrb.mxu2 %v2647_v36  ;;  %2868 = vmatpush.msrb.mxu3 %v2679_v37  ;;  %v2911_v30 = vld [vmem:[#allocation22 + $0x4b0] sm:$0xff]  ;;  %v2941_v36 = vld [vmem:[#allocation22 + $0x5a0] sm:$0xff] }
 0x9b5   : > { %2800 = vmatpush.msrb.mxu0 %v2581_v33  ;;  %2823 = vmatpush.msrb.mxu1 %v2613_v34  ;;  %v3013_v33 = vld [vmem:[#allocation22 + $0x7e0] sm:$0xff]  ;;  %v2979_v37 = vld [vmem:[#allocation22 + $0x6d0] sm:$0xff] }
 0x9b6   : > { %2846 = vmatpush.msrb.mxu2 %v2645_v39  ;;  %2869 = vmatpush.msrb.mxu3 %v2677_v0  ;;  %v2909_v34 = vld [vmem:[#allocation22 + $0x4a0] sm:$0xff]  ;;  %v2939_v39 = vld [vmem:[#allocation22 + $0x590] sm:$0xff] }
 0x9b7   : > { %2801 = vmatpush.msrb.mxu0 %v2579_v38  ;;  %2824 = vmatpush.msrb.mxu1 %v2611_v14  ;;  %v3011_v38 = vld [vmem:[#allocation22 + $0x7d0] sm:$0xff]  ;;  %v2977_v0 = vld [vmem:[#allocation22 + $0x6c0] sm:$0xff] }
 0x9b8   : > { %2847 = vmatpush.msrb.mxu2 %v2643_v42  ;;  %2870 = vmatpush.msrb.mxu3 %v2675_v43  ;;  %v2907_v14 = vld [vmem:[#allocation22 + $0x490] sm:$0xff]  ;;  %v2937_v42 = vld [vmem:[#allocation22 + $0x580] sm:$0xff] }
 0x9b9   : > { %2802 = vmatpush.msrb.mxu0 %v2577_v40  ;;  %2825 = vmatpush.msrb.mxu1 %v2609_v41  ;;  %v3009_v40 = vld [vmem:[#allocation22 + $0x7c0] sm:$0xff]  ;;  %v2975_v43 = vld [vmem:[#allocation22 + $0x6b0] sm:$0xff] }
 0x9ba   : > { %2848 = vmatpush.msrb.mxu2 %v2641_v27  ;;  %2871 = vmatpush.msrb.mxu3 %v2673_v46  ;;  %v2905_v41 = vld [vmem:[#allocation22 + $0x480] sm:$0xff]  ;;  %v2935_v27 = vld [vmem:[#allocation22 + $0x570] sm:$0xff] }
 0x9bb   : > { %2803 = vmatpush.msrb.mxu0 %v2575_v44  ;;  %2826 = vmatpush.msrb.mxu1 %v2607_v45  ;;  %v3007_v44 = vld [vmem:[#allocation22 + $0x7b0] sm:$0xff]  ;;  %v2973_v46 = vld [vmem:[#allocation22 + $0x6a0] sm:$0xff] }
 0x9bc   : > { %2849 = vmatpush.msrb.mxu2 %v2639_v50  ;;  %2872 = vmatpush.msrb.mxu3 %v2671_v51  ;;  %v2903_v45 = vld [vmem:[#allocation22 + $0x470] sm:$0xff]  ;;  %v2933_v50 = vld [vmem:[#allocation22 + $0x560] sm:$0xff] }
 0x9bd   : > { %2804 = vmatpush.msrb.mxu0 %v2573_v47  ;;  %2827 = vmatpush.msrb.mxu1 %v2605_v49  ;;  %v3005_v47 = vld [vmem:[#allocation22 + $0x7a0] sm:$0xff]  ;;  %v2971_v51 = vld [vmem:[#allocation22 + $0x690] sm:$0xff] }
 0x9be   : > { %2850 = vmatpush.msrb.mxu2 %v2637_v54  ;;  %2873 = vmatpush.msrb.mxu3 %v2669_v55  ;;  %v2901_v49 = vld [vmem:[#allocation22 + $0x460] sm:$0xff]  ;;  %v2931_v54 = vld [vmem:[#allocation22 + $0x550] sm:$0xff] }
 0x9bf   : > { %2805 = vmatpush.msrb.mxu0 %v2571_v52  ;;  %2828 = vmatpush.msrb.mxu1 %v2603_v53  ;;  %v3003_v52 = vld [vmem:[#allocation22 + $0x790] sm:$0xff]  ;;  %v2969_v55 = vld [vmem:[#allocation22 + $0x680] sm:$0xff] }
 0x9c0   : > { %2851 = vmatpush.msrb.mxu2 %v2635_v60  ;;  %2874 = vmatpush.msrb.mxu3 %v2667_v61  ;;  %v2899_v53 = vld [vmem:[#allocation22 + $0x450] sm:$0xff]  ;;  %v2929_v60 = vld [vmem:[#allocation22 + $0x540] sm:$0xff] }
 0x9c1   : > { %2806 = vmatpush.msrb.mxu0 %v2569_v56  ;;  %2829 = vmatpush.msrb.mxu1 %v2601_v57  ;;  %v2183_v3 = vpop.f32.mrf.mxu0  ;;  %v2206_v4 = vpop.f32.mrf.mxu1  ;;  %v3001_v56 = vld [vmem:[#allocation22 + $0x780] sm:$0xff]  ;;  %v2967_v61 = vld [vmem:[#allocation22 + $0x670] sm:$0xff] }
 0x9c2   : > { %v5593_v5 = vadd.f32 %v2183_v3, %v2128_v58  ;;  %v5597_v6 = vadd.f32 %v2206_v4, %v2129_v59  ;;  %2852 = vmatpush.msrb.mxu2 %v2633_v1  ;;  %2875 = vmatpush.msrb.mxu3 %v2665_v2  ;;  %v2897_v57 = vld [vmem:[#allocation22 + $0x440] sm:$0xff]  ;;  %v2927_v1 = vld [vmem:[#allocation22 + $0x530] sm:$0xff] }
 0x9c3   : > { %2807 = vmatpush.msrb.mxu0 %v2567_v62  ;;  %2830 = vmatpush.msrb.mxu1 %v2599_v63  ;;  %v2999_v62 = vld [vmem:[#allocation22 + $0x770] sm:$0xff]  ;;  %v2965_v2 = vld [vmem:[#allocation22 + $0x660] sm:$0xff] }
 0x9c4   : > { %v2534_v9 = vmax.f32 %v5593_v5, 0.0  ;;  %v2535_v10 = vmax.f32 %v5597_v6, 0.0  ;;  %2853 = vmatpush.msrb.mxu2 %v2631_v7  ;;  %2876 = vmatpush.msrb.mxu3 %v2663_v17  ;;  %v2895_v63 = vld [vmem:[#allocation22 + $0x430] sm:$0xff]  ;;  %v2997_v3 = vld [vmem:[#allocation22 + $0x760] sm:$0xff]  ;;  %v2914_v6 = vld [vmem:[#allocation22 + $0x4c8] sm:$0xff] }
 0x9c5   : > { %v2893_v4 = vld [vmem:[#allocation22 + $0x420] sm:$0xff]  ;;  %v2963_v17 = vld [vmem:[#allocation22 + $0x650] sm:$0xff] }
 0x9c6   : > { %2716 = vmatmul.f32.vlgmr.msra.gmra.mxu0 %v2534_v9  ;;  %2739 = vmatmul.f32.vlgmr.msra.gmra.mxu1 %v2535_v10  ;;  %v2925_v7 = vld [vmem:[#allocation22 + $0x520] sm:$0xff] }
 0x9c7   : > { %3024 = vmatpush.msra.mxu0 %v2919_v11  ;;  %3047 = vmatpush.msra.mxu1 %v2951_v12  ;;  %v2995_v11 = vld [vmem:[#allocation22 + $0x750] sm:$0xff] }
 0x9c8   : > { %v2229_v21 = vpop.f32.mrf.mxu2  ;;  %v2252_v22 = vpop.f32.mrf.mxu3  ;;  %v2891_v12 = vld [vmem:[#allocation22 + $0x410] sm:$0xff] }
 0x9c9   : > { %v5609_v18 = vadd.f32 %v2229_v21, %v2130_v13  ;;  %v5613_v25 = vadd.f32 %v2252_v22, %v2131_v19  ;;  %3025 = vmatpush.msra.mxu0 %v2917_v15  ;;  %3048 = vmatpush.msra.mxu1 %v2949_v16  ;;  %v2923_v15 = vld [vmem:[#allocation22 + $0x510] sm:$0xff]  ;;  %v2961_v22 = vld [vmem:[#allocation22 + $0x640] sm:$0xff] }
 0x9cb   : > { %v2536_v32 = vmax.f32 %v5609_v18, 0.0  ;;  %v2537_v20 = vmax.f32 %v5613_v25, 0.0  ;;  %3026 = vmatpush.msra.mxu0 %v2915_v26  ;;  %3049 = vmatpush.msra.mxu1 %v2947_v8  ;;  %v2993_v26 = vld [vmem:[#allocation22 + $0x740] sm:$0xff] }
 0x9cd   : > { %2762 = vmatmul.f32.vlgmr.msra.gmra.mxu2 %v2536_v32  ;;  %2785 = vmatmul.f32.vlgmr.msra.gmra.mxu3 %v2537_v20 }
 0x9ce   : > { %3027 = vmatpush.msra.mxu0 %v2913_v23  ;;  %3050 = vmatpush.msra.mxu1 %v2945_v24  ;;  %v2889_v24 = vld [vmem:[#allocation22 + $0x400] sm:$0xff] }
 0x9cf   : > { %3070 = vmatpush.msra.mxu2 %v2983_v28  ;;  %3093 = vmatpush.msra.mxu3 %v3015_v35  ;;  %v2921_v28 = vld [vmem:[#allocation22 + $0x500] sm:$0xff] }
 0x9d0   : > { %3028 = vmatpush.msra.mxu0 %v2911_v30  ;;  %3051 = vmatpush.msra.mxu1 %v2943_v29  ;;  %v2959_v29 = vld [vmem:[#allocation22 + $0x630] sm:$0xff] }
 0x9d1   : > { %3071 = vmatpush.msra.mxu2 %v2981_v31  ;;  %3094 = vmatpush.msra.mxu3 %v3013_v33  ;;  %v2991_v31 = vld [vmem:[#allocation22 + $0x730] sm:$0xff] }
 0x9d2   : > { %3029 = vmatpush.msra.mxu0 %v2909_v34  ;;  %3052 = vmatpush.msra.mxu1 %v2941_v36  ;;  %v2955_v36 = vld [vmem:[#allocation22 + $0x610] sm:$0xff] }
 0x9d3   : > { %3072 = vmatpush.msra.mxu2 %v2979_v37  ;;  %3095 = vmatpush.msra.mxu3 %v3011_v38  ;;  %v2987_v37 = vld [vmem:[#allocation22 + $0x710] sm:$0xff] }
 0x9d4   : > { %3030 = vmatpush.msra.mxu0 %v2907_v14  ;;  %3053 = vmatpush.msra.mxu1 %v2939_v39 }
 0x9d5   : > { %3073 = vmatpush.msra.mxu2 %v2977_v0  ;;  %3096 = vmatpush.msra.mxu3 %v3009_v40 }
 0x9d6   : > { %3031 = vmatpush.msra.mxu0 %v2905_v41  ;;  %3054 = vmatpush.msra.mxu1 %v2937_v42  ;;  %v2920_v42 = vld [vmem:[#allocation22 + $0x4f8] sm:$0xff] }
 0x9d7   : > { %3074 = vmatpush.msra.mxu2 %v2975_v43  ;;  %3097 = vmatpush.msra.mxu3 %v3007_v44  ;;  %v2952_v43 = vld [vmem:[#allocation22 + $0x5f8] sm:$0xff]  ;;  %v2918_v44 = vld [vmem:[#allocation22 + $0x4e8] sm:$0xff] }
 0x9d8   : > { %3032 = vmatpush.msra.mxu0 %v2903_v45  ;;  %3055 = vmatpush.msra.mxu1 %v2935_v27  ;;  %v2950_v45 = vld [vmem:[#allocation22 + $0x5e8] sm:$0xff] }
 0x9d9   : > { %3075 = vmatpush.msra.mxu2 %v2973_v46  ;;  %3098 = vmatpush.msra.mxu3 %v3005_v47  ;;  %v2916_v47 = vld [vmem:[#allocation22 + $0x4d8] sm:$0xff] }
 0x9da   : > { %3033 = vmatpush.msra.mxu0 %v2901_v49  ;;  %3056 = vmatpush.msra.mxu1 %v2933_v50  ;;  %v2948_v49 = vld [vmem:[#allocation22 + $0x5d8] sm:$0xff] }
 0x9db   : > { %3076 = vmatpush.msra.mxu2 %v2971_v51  ;;  %3099 = vmatpush.msra.mxu3 %v3003_v52  ;;  %v3016_v51 = vld [vmem:[#allocation22 + $0x7f8] sm:$0xff] }
 0x9dc   : > { %3034 = vmatpush.msra.mxu0 %v2899_v53  ;;  %3057 = vmatpush.msra.mxu1 %v2931_v54  ;;  %v2912_v52 = vld [vmem:[#allocation22 + $0x4b8] sm:$0xff]  ;;  %v2982_v54 = vld [vmem:[#allocation22 + $0x6e8] sm:$0xff] }
 0x9dd   : > { %3077 = vmatpush.msra.mxu2 %v2969_v55  ;;  %3100 = vmatpush.msra.mxu3 %v3001_v56  ;;  %v2944_v53 = vld [vmem:[#allocation22 + $0x5b8] sm:$0xff]  ;;  %v3014_v55 = vld [vmem:[#allocation22 + $0x7e8] sm:$0xff]  ;;  %v2132_v56 = vperm.slane %v5587_v48, 4 }
 0x9de   : > { %3035 = vmatpush.msra.mxu0 %v2897_v57  ;;  %3058 = vmatpush.msra.mxu1 %v2929_v60  ;;  %v2133_v57 = vperm.slane %v5587_v48, 5  ;;  %v2980_v60 = vld [vmem:[#allocation22 + $0x6d8] sm:$0xff] }
 0x9df   : > { %3078 = vmatpush.msra.mxu2 %v2967_v61  ;;  %3101 = vmatpush.msra.mxu3 %v2999_v62  ;;  %v3012_v61 = vld [vmem:[#allocation22 + $0x7d8] sm:$0xff] }
 0x9e0   : > { %3036 = vmatpush.msra.mxu0 %v2895_v63  ;;  %3059 = vmatpush.msra.mxu1 %v2927_v1  ;;  %v2908_v1 = vld [vmem:[#allocation22 + $0x498] sm:$0xff] }
 0x9e1   : > { %3079 = vmatpush.msra.mxu2 %v2965_v2  ;;  %3102 = vmatpush.msra.mxu3 %v2997_v3  ;;  %v2940_v2 = vld [vmem:[#allocation22 + $0x598] sm:$0xff]  ;;  %v2978_v3 = vld [vmem:[#allocation22 + $0x6c8] sm:$0xff] }
 0x9e2   : > { %v2186_v16 = vpop.f32.mrf.mxu0  ;;  %v2209_v21 = vpop.f32.mrf.mxu1  ;;  %3037 = vmatpush.msra.mxu0 %v2893_v4  ;;  %3060 = vmatpush.msra.mxu1 %v2925_v7  ;;  %v3010_v4 = vld [vmem:[#allocation22 + $0x7c8] sm:$0xff] }
 0x9e3   : > { %v5623_v8 = vadd.f32 %v2186_v16, %v2128_v58  ;;  %v5627_v23 = vadd.f32 %v2209_v21, %v2129_v59  ;;  %3080 = vmatpush.msra.mxu2 %v2963_v17  ;;  %3103 = vmatpush.msra.mxu3 %v2995_v11  ;;  %v2957_v58 = vld [vmem:[#allocation22 + $0x620] sm:$0xff]  ;;  %v2906_v11 = vld [vmem:[#allocation22 + $0x488] sm:$0xff]  ;;  %v3008_v16 = vld [vmem:[#allocation22 + $0x7b8] sm:$0xff]  ;;  %v2134_v21 = vperm.slane %v5587_v48, 6 }
 0x9e4   : > { %3038 = vmatpush.msra.mxu0 %v2891_v12  ;;  %3061 = vmatpush.msra.mxu1 %v2923_v15  ;;  %v2989_v59 = vld [vmem:[#allocation22 + $0x720] sm:$0xff]  ;;  %v2938_v12 = vld [vmem:[#allocation22 + $0x588] sm:$0xff]  ;;  %v2976_v15 = vld [vmem:[#allocation22 + $0x6b8] sm:$0xff] }
 0x9e5   : > { %v2550_v35 = vmax.f32 %v5623_v8, 0.0  ;;  %v2551_v30 = vmax.f32 %v5627_v23, 0.0  ;;  %3081 = vmatpush.msra.mxu2 %v2961_v22  ;;  %3104 = vmatpush.msra.mxu3 %v2993_v26  ;;  %v2135_v22 = vperm.slane %v5587_v48, 7  ;;  %v2904_v23 = vld [vmem:[#allocation22 + $0x478] sm:$0xff] }
 0x9e6   : > { %3039 = vmatpush.msra.mxu0 %v2889_v24  ;;  %3062 = vmatpush.msra.mxu1 %v2921_v28  ;;  %v2936_v24 = vld [vmem:[#allocation22 + $0x578] sm:$0xff] }
 0x9e7   : > { %2719 = vmatmul.f32.gmra.mxu0 %v2550_v35  ;;  %2742 = vmatmul.f32.gmra.mxu1 %v2551_v30 }
 0x9e8   : > { %3082 = vmatpush.msra.mxu2 %v2959_v29  ;;  %3105 = vmatpush.msra.mxu3 %v2991_v31  ;;  %v3006_v29 = vld [vmem:[#allocation22 + $0x7a8] sm:$0xff] }
 0x9e9   : > { %v2232_v33 = vpop.f32.mrf.mxu2  ;;  %v2255_v34 = vpop.f32.mrf.mxu3 }
 0x9ea   : > { %v5637_v38 = vadd.f32 %v2232_v33, %v2130_v13  ;;  %v5641_v14 = vadd.f32 %v2255_v34, %v2131_v19  ;;  %v5643_v39 = vpop.f32.mrf.mxu0  ;;  %v5645_v0 = vpop.f32.mrf.mxu1  ;;  %3083 = vmatpush.msra.mxu2 %v2957_v58  ;;  %3106 = vmatpush.msra.mxu3 %v2989_v59  ;;  %v2953_v13 = vld [vmem:[#allocation22 + $0x600] sm:$0xff]  ;;  %v2902_v59 = vld [vmem:[#allocation22 + $0x468] sm:$0xff] }
 0x9eb   : > { %v2985_v19 = vld [vmem:[#allocation22 + $0x700] sm:$0xff]  ;;  %v5686_v7 = vadd.f32 %v5643_v39, %v2132_v56  ;;  %v5691_v17 = vadd.f32 %v5645_v0, %v2133_v57  ;;  %v2934_v33 = vld [vmem:[#allocation22 + $0x568] sm:$0xff]  ;;  %v2932_v39 = vld [vmem:[#allocation22 + $0x558] sm:$0xff] }
 0x9ec   : > { %v2552_v40 = vmax.f32 %v5637_v38, 0.0  ;;  %v2553_v41 = vmax.f32 %v5641_v14, 0.0  ;;  %3084 = vmatpush.msra.mxu2 %v2955_v36  ;;  %3107 = vmatpush.msra.mxu3 %v2987_v37  ;;  %v2972_v37 = vld [vmem:[#allocation22 + $0x698] sm:$0xff] }
 0x9ed   : > { %v2538_v26 = vmax.f32 %v5686_v7, 0.0  ;;  %v2539_v8 = vmax.f32 %v5691_v17, 0.0  ;;  %v3004_v38 = vld [vmem:[#allocation22 + $0x798] sm:$0xff]  ;;  %v3238_v7 = vld [vmem:[#allocation22 + $0x8c0] sm:$0xff] }
 0x9ee   : > { %2765 = vmatmul.f32.gmra.mxu2 %v2552_v40  ;;  %2788 = vmatmul.f32.gmra.mxu3 %v2553_v41  ;;  %v2900_v14 = vld [vmem:[#allocation22 + $0x458] sm:$0xff]  ;;  %v3270_v17 = vld [vmem:[#allocation22 + $0x9c0] sm:$0xff] }
 0x9ef   : > { %2808 = vmatmul.f32.vlgmr.msrb.gmra.mxu0 %v2534_v9  ;;  %2831 = vmatmul.f32.vlgmr.msrb.gmra.mxu1 %v2535_v10  ;;  %v2946_v9 = vld [vmem:[#allocation22 + $0x5c8] sm:$0xff]  ;;  %v2984_v10 = vld [vmem:[#allocation22 + $0x6f8] sm:$0xff] }
 0x9f0   : > { %3116 = vmatpush.msrb.mxu0 %v2920_v42  ;;  %3139 = vmatpush.msrb.mxu1 %v2952_v43  ;;  %v5723_v0 = vld [vmem:[#allocation21 + $0x8] sm:$0xff] }
 0x9f1   : > { %v5657_v27 = vpop.f32.mrf.mxu2  ;;  %v5659_v46 = vpop.f32.mrf.mxu3  ;;  %3085 = vmatpush.msra.mxu2 %v2953_v13  ;;  %3108 = vmatpush.msra.mxu3 %v2985_v19  ;;  %v2140_v13 = vperm.slane %v5723_v0, 4  ;;  %v2141_v19 = vperm.slane %v5723_v0, 5 }
 0x9f2   : > { %3117 = vmatpush.msrb.mxu0 %v2918_v44  ;;  %3140 = vmatpush.msrb.mxu1 %v2950_v45  ;;  %v5661_v50 = vpop.f32.mrf.mxu0  ;;  %v5663_v5 = vpop.f32.mrf.mxu1  ;;  %v5716_v34 = vadd.f32 %v5657_v27, %v2134_v21  ;;  %v5721_v36 = vadd.f32 %v5659_v46, %v2135_v22  ;;  %v2898_v27 = vld [vmem:[#allocation22 + $0x448] sm:$0xff] }
 0x9f3   : > { %v5728_v42 = vadd.f32 %v5661_v50, %v2132_v56  ;;  %v5733_v43 = vadd.f32 %v5663_v5, %v2133_v57  ;;  %v2930_v46 = vld [vmem:[#allocation22 + $0x548] sm:$0xff] }
 0x9f4   : > { %3118 = vmatpush.msrb.mxu0 %v2916_v47  ;;  %3141 = vmatpush.msrb.mxu1 %v2948_v49  ;;  %v2540_v44 = vmax.f32 %v5716_v34, 0.0  ;;  %v2541_v45 = vmax.f32 %v5721_v36, 0.0  ;;  %v2968_v47 = vld [vmem:[#allocation22 + $0x678] sm:$0xff]  ;;  %v2966_v56 = vld [vmem:[#allocation22 + $0x668] sm:$0xff]  ;;  %v3264_v34 = vld [vmem:[#allocation22 + $0x990] sm:$0xff] }
 0x9f5   : > { %v3000_v49 = vld [vmem:[#allocation22 + $0x778] sm:$0xff]  ;;  %v2998_v57 = vld [vmem:[#allocation22 + $0x768] sm:$0xff]  ;;  %v3302_v36 = vld [vmem:[#allocation22 + $0xac0] sm:$0xff] }
 0x9f6   : > { %2854 = vmatmul.f32.vlgmr.msrb.gmra.mxu2 %v2536_v32  ;;  %2877 = vmatmul.f32.vlgmr.msrb.gmra.mxu3 %v2537_v20  ;;  %v2910_v32 = vld [vmem:[#allocation22 + $0x4a8] sm:$0xff] }
 0x9f7   : > { %3119 = vmatpush.msrb.mxu0 %v2914_v6  ;;  %3142 = vmatpush.msrb.mxu1 %v2946_v9  ;;  %v2942_v20 = vld [vmem:[#allocation22 + $0x5a8] sm:$0xff] }
 0x9f8   : > { %3162 = vmatpush.msrb.mxu2 %v2984_v10  ;;  %3185 = vmatpush.msrb.mxu3 %v3016_v51  ;;  %v2554_v10 = vmax.f32 %v5728_v42, 0.0  ;;  %v2555_v51 = vmax.f32 %v5733_v43, 0.0  ;;  %v3228_v42 = vld [vmem:[#allocation22 + $0x870] sm:$0xff] }
 0x9f9   : > { %2811 = vmatmul.f32.gmra.mxu0 %v2550_v35  ;;  %2834 = vmatmul.f32.gmra.mxu1 %v2551_v30  ;;  %v5675_v18 = vpop.f32.mrf.mxu2  ;;  %v5677_v25 = vpop.f32.mrf.mxu3  ;;  %v2974_v30 = vld [vmem:[#allocation22 + $0x6a8] sm:$0xff]  ;;  %v3260_v43 = vld [vmem:[#allocation22 + $0x970] sm:$0xff] }
 0x9fa   : > { %3120 = vmatpush.msrb.mxu0 %v2912_v52  ;;  %3143 = vmatpush.msrb.mxu1 %v2944_v53  ;;  %v5679_v62 = vpop.f32.mrf.mxu0  ;;  %v5681_v63 = vpop.f32.mrf.mxu1  ;;  %v2896_v52 = vld [vmem:[#allocation22 + $0x438] sm:$0xff] }
 0x9fb   : > { %3163 = vmatpush.msrb.mxu2 %v2982_v54  ;;  %3186 = vmatpush.msrb.mxu3 %v3014_v55  ;;  %v2928_v53 = vld [vmem:[#allocation22 + $0x538] sm:$0xff] }
 0x9fc   : > { %3121 = vmatpush.msrb.mxu0 %v2910_v32  ;;  %3144 = vmatpush.msrb.mxu1 %v2942_v20  ;;  %v2894_v32 = vld [vmem:[#allocation22 + $0x428] sm:$0xff] }
 0x9fd   : > { %3164 = vmatpush.msrb.mxu2 %v2980_v60  ;;  %3187 = vmatpush.msrb.mxu3 %v3012_v61  ;;  %v2926_v20 = vld [vmem:[#allocation22 + $0x528] sm:$0xff]  ;;  %v5764_v60 = vadd.f32 %v5675_v18, %v2134_v21  ;;  %v5769_v61 = vadd.f32 %v5677_v25, %v2135_v22 }
 0x9fe   : > { %3122 = vmatpush.msrb.mxu0 %v2908_v1  ;;  %3145 = vmatpush.msrb.mxu1 %v2940_v2  ;;  %v2964_v1 = vld [vmem:[#allocation22 + $0x658] sm:$0xff]  ;;  %v2962_v18 = vld [vmem:[#allocation22 + $0x648] sm:$0xff] }
 0x9ff   : > { %3165 = vmatpush.msrb.mxu2 %v2978_v3  ;;  %3188 = vmatpush.msrb.mxu3 %v3010_v4  ;;  %v2996_v2 = vld [vmem:[#allocation22 + $0x758] sm:$0xff]  ;;  %v2142_v3 = vperm.slane %v5723_v0, 6  ;;  %v2143_v4 = vperm.slane %v5723_v0, 7  ;;  %v2557_v21 = vmax.f32 %v5769_v61, 0.0  ;;  %v2890_v22 = vld [vmem:[#allocation22 + $0x408] sm:$0xff]  ;;  %v3292_v61 = vld [vmem:[#allocation22 + $0xa70] sm:$0xff] }
 0xa00   : > { %2857 = vmatmul.f32.gmra.mxu2 %v2552_v40  ;;  %2880 = vmatmul.f32.gmra.mxu3 %v2553_v41  ;;  %v2970_v40 = vld [vmem:[#allocation22 + $0x688] sm:$0xff] }
 0xa01   : > { %3123 = vmatpush.msrb.mxu0 %v2906_v11  ;;  %3146 = vmatpush.msrb.mxu1 %v2938_v12  ;;  %v5701_v28 = vpop.f32.mrf.mxu2  ;;  %v5703_v35 = vpop.f32.mrf.mxu3  ;;  %v3002_v41 = vld [vmem:[#allocation22 + $0x788] sm:$0xff]  ;;  %v2892_v11 = vld [vmem:[#allocation22 + $0x418] sm:$0xff] }
 0xa02   : > { %3166 = vmatpush.msrb.mxu2 %v2976_v15  ;;  %3189 = vmatpush.msrb.mxu3 %v3008_v16  ;;  %v5705_v31 = vpop.f32.mrf.mxu0  ;;  %v5707_v58 = vpop.f32.mrf.mxu1  ;;  %v2924_v12 = vld [vmem:[#allocation22 + $0x518] sm:$0xff]  ;;  %v2994_v15 = vld [vmem:[#allocation22 + $0x748] sm:$0xff]  ;;  %v2556_v16 = vmax.f32 %v5764_v60, 0.0  ;;  %v3222_v60 = vld [vmem:[#allocation22 + $0x840] sm:$0xff] }
 0xa03   : > { %3040 = vmatmul.f32.vlgmr.msra.gmra.mxu0 %v2538_v26  ;;  %3063 = vmatmul.f32.vlgmr.msra.gmra.mxu1 %v2539_v8 }
 0xa04   : > { %3124 = vmatpush.msrb.mxu0 %v2904_v23  ;;  %3147 = vmatpush.msrb.mxu1 %v2936_v24  ;;  %v2922_v23 = vld [vmem:[#allocation22 + $0x508] sm:$0xff] }
 0xa05   : > { %3167 = vmatpush.msrb.mxu2 %v2974_v30  ;;  %3190 = vmatpush.msrb.mxu3 %v3006_v29 }
 0xa06   : > { %3125 = vmatpush.msrb.mxu0 %v2902_v59  ;;  %3148 = vmatpush.msrb.mxu1 %v2934_v33  ;;  %v2960_v33 = vld [vmem:[#allocation22 + $0x638] sm:$0xff] }
 0xa07   : > { %3168 = vmatpush.msrb.mxu2 %v2972_v37  ;;  %3191 = vmatpush.msrb.mxu3 %v3004_v38  ;;  %v2992_v37 = vld [vmem:[#allocation22 + $0x738] sm:$0xff] }
 0xa08   : > { %3126 = vmatpush.msrb.mxu0 %v2900_v14  ;;  %3149 = vmatpush.msrb.mxu1 %v2932_v39  ;;  %v3244_v39 = vld [vmem:[#allocation22 + $0x8f0] sm:$0xff] }
 0xa09   : > { %3169 = vmatpush.msrb.mxu2 %v2970_v40  ;;  %3192 = vmatpush.msrb.mxu3 %v3002_v41  ;;  %v5739_v50 = vpop.f32.mrf.mxu2  ;;  %v5741_v5 = vpop.f32.mrf.mxu3  ;;  %v3276_v40 = vld [vmem:[#allocation22 + $0x9f0] sm:$0xff]  ;;  %v2958_v41 = vld [vmem:[#allocation22 + $0x628] sm:$0xff] }
 0xa0a   : > { %3086 = vmatmul.f32.vlgmr.msra.gmra.mxu2 %v2540_v44  ;;  %3109 = vmatmul.f32.vlgmr.msra.gmra.mxu3 %v2541_v45  ;;  %v2459_v6 = vpop.f32.mrf.mxu0  ;;  %v2482_v9 = vpop.f32.mrf.mxu1 }
 0xa0b   : > { %3127 = vmatpush.msrb.mxu0 %v2898_v27  ;;  %3150 = vmatpush.msrb.mxu1 %v2930_v46  ;;  %v5751_v54 = vadd.f32 %v2459_v6, %v2140_v13  ;;  %v5755_v55 = vadd.f32 %v2482_v9, %v2141_v19  ;;  %v2990_v27 = vld [vmem:[#allocation22 + $0x728] sm:$0xff]  ;;  %v3274_v46 = vld [vmem:[#allocation22 + $0x9e0] sm:$0xff]  ;;  %v3272_v6 = vld [vmem:[#allocation22 + $0x9d0] sm:$0xff] }
 0xa0c   : > { %3170 = vmatpush.msrb.mxu2 %v2968_v47  ;;  %3193 = vmatpush.msrb.mxu3 %v3000_v49  ;;  %v2988_v47 = vld [vmem:[#allocation22 + $0x718] sm:$0xff]  ;;  %v3240_v49 = vld [vmem:[#allocation22 + $0x8d0] sm:$0xff] }
 0xa0d   : > { %3043 = vmatmul.f32.gmra.mxu0 %v2554_v10  ;;  %3066 = vmatmul.f32.gmra.mxu1 %v2555_v51 }
 0xa0e   : > { %3128 = vmatpush.msrb.mxu0 %v2896_v52  ;;  %3151 = vmatpush.msrb.mxu1 %v2928_v53  ;;  %v2954_v53 = vld [vmem:[#allocation22 + $0x608] sm:$0xff] }
 0xa0f   : > { %3171 = vmatpush.msrb.mxu2 %v2966_v56  ;;  %3194 = vmatpush.msrb.mxu3 %v2998_v57  ;;  %v2986_v56 = vld [vmem:[#allocation22 + $0x708] sm:$0xff] }
 0xa10   : > { %3129 = vmatpush.msrb.mxu0 %v2894_v32  ;;  %3152 = vmatpush.msrb.mxu1 %v2926_v20  ;;  %v3236_v20 = vld [vmem:[#allocation22 + $0x8b0] sm:$0xff] }
 0xa11   : > { %3172 = vmatpush.msrb.mxu2 %v2964_v1  ;;  %3195 = vmatpush.msrb.mxu3 %v2996_v2  ;;  %v2505_v48 = vpop.f32.mrf.mxu2  ;;  %v2528_v25 = vpop.f32.mrf.mxu3  ;;  %v3268_v1 = vld [vmem:[#allocation22 + $0x9b0] sm:$0xff]  ;;  %v3306_v2 = vld [vmem:[#allocation22 + $0xae0] sm:$0xff] }
 0xa12   : > { %3130 = vmatpush.msrb.mxu0 %v2892_v11  ;;  %3153 = vmatpush.msrb.mxu1 %v2924_v12  ;;  %v5775_v24 = vadd.f32 %v2505_v48, %v2142_v3  ;;  %v5777_v30 = vadd.f32 %v2528_v25, %v2143_v4  ;;  %v2462_v29 = vpop.f32.mrf.mxu0  ;;  %v2485_v59 = vpop.f32.mrf.mxu1  ;;  %v3266_v11 = vld [vmem:[#allocation22 + $0x9a0] sm:$0xff]  ;;  %v3304_v12 = vld [vmem:[#allocation22 + $0xad0] sm:$0xff] }
 0xa13   : > { %3173 = vmatpush.msrb.mxu2 %v2962_v18  ;;  %3196 = vmatpush.msrb.mxu3 %v2994_v15  ;;  %v5781_v38 = vadd.f32 %v2462_v29, %v2140_v13  ;;  %v5785_v14 = vadd.f32 %v2485_v59, %v2141_v19  ;;  %v3242_v13 = vld [vmem:[#allocation22 + $0x8e0] sm:$0xff]  ;;  %v2956_v19 = vld [vmem:[#allocation22 + $0x618] sm:$0xff]  ;;  %v3336_v18 = vld [vmem:[#allocation22 + $0xbd0] sm:$0xff] }
 0xa14   : > { %3089 = vmatmul.f32.gmra.mxu2 %v2556_v16  ;;  %3112 = vmatmul.f32.gmra.mxu3 %v2557_v21  ;;  %v3232_v15 = vld [vmem:[#allocation22 + $0x890] sm:$0xff]  ;;  %v3262_v48 = vld [vmem:[#allocation22 + $0x980] sm:$0xff] }
 0xa15   : > { %3131 = vmatpush.msrb.mxu0 %v2890_v22  ;;  %3154 = vmatpush.msrb.mxu1 %v2922_v23  ;;  %v3300_v25 = vld [vmem:[#allocation22 + $0xab0] sm:$0xff]  ;;  %v3226_v23 = vld [vmem:[#allocation22 + $0x860] sm:$0xff] }
 0xa16   : > { %3174 = vmatpush.msrb.mxu2 %v2960_v33  ;;  %3197 = vmatpush.msrb.mxu3 %v2992_v37  ;;  %v3332_v22 = vld [vmem:[#allocation22 + $0xbb0] sm:$0xff]  ;;  %v3258_v29 = vld [vmem:[#allocation22 + $0x960] sm:$0xff] }
 0xa17   : > { %3349 = vmatpush.msra.mxu0 %v3244_v39  ;;  %3372 = vmatpush.msra.mxu1 %v3276_v40  ;;  %v3296_v59 = vld [vmem:[#allocation22 + $0xa90] sm:$0xff]  ;;  %v3294_v40 = vld [vmem:[#allocation22 + $0xa80] sm:$0xff] }
 0xa18   : > { %3132 = vmatmul.f32.vlgmr.msrb.gmra.mxu0 %v2538_v26  ;;  %3155 = vmatmul.f32.vlgmr.msrb.gmra.mxu1 %v2539_v8  ;;  %v3308_v26 = vld [vmem:[#allocation22 + $0xaf0] sm:$0xff] }
 0xa19   : > { %3175 = vmatpush.msrb.mxu2 %v2958_v41  ;;  %3198 = vmatpush.msrb.mxu3 %v2990_v27  ;;  %v2508_v9 = vpop.f32.mrf.mxu2  ;;  %v2531_v52 = vpop.f32.mrf.mxu3  ;;  %v3340_v8 = vld [vmem:[#allocation22 + $0xbf0] sm:$0xff]  ;;  %v3326_v41 = vld [vmem:[#allocation22 + $0xb80] sm:$0xff] }
 0xa1a   : > { %3350 = vmatpush.msra.mxu0 %v3242_v13  ;;  %3373 = vmatpush.msra.mxu1 %v3274_v46  ;;  %v5795_v57 = vadd.f32 %v2508_v9, %v2142_v3  ;;  %v5797_v32 = vadd.f32 %v2531_v52, %v2143_v4  ;;  %v3338_v3 = vld [vmem:[#allocation22 + $0xbe0] sm:$0xff]  ;;  %v3328_v33 = vld [vmem:[#allocation22 + $0xb90] sm:$0xff]  ;;  %v2136_v46 = vperm.slane %v5723_v0, 0 }
 0xa1b   : > { %3176 = vmatpush.msrb.mxu2 %v2956_v19  ;;  %3199 = vmatpush.msrb.mxu3 %v2988_v47  ;;  %v3234_v4 = vld [vmem:[#allocation22 + $0x8a0] sm:$0xff]  ;;  %v3224_v37 = vld [vmem:[#allocation22 + $0x850] sm:$0xff]  ;;  %v2137_v19 = vperm.slane %v5723_v0, 1 }
 0xa1c   : > { %3351 = vmatpush.msra.mxu0 %v3240_v49  ;;  %3374 = vmatpush.msra.mxu1 %v3272_v6  ;;  %v3256_v39 = vld [vmem:[#allocation22 + $0x950] sm:$0xff]  ;;  %v3290_v47 = vld [vmem:[#allocation22 + $0xa60] sm:$0xff] }
 0xa1d   : > { %3177 = vmatpush.msrb.mxu2 %v2954_v53  ;;  %3200 = vmatpush.msrb.mxu3 %v2986_v56  ;;  %v3220_v27 = vld [vmem:[#allocation22 + $0x830] sm:$0xff]  ;;  %v3322_v49 = vld [vmem:[#allocation22 + $0xb60] sm:$0xff] }
 0xa1e   : > { %3352 = vmatpush.msra.mxu0 %v3238_v7  ;;  %3375 = vmatpush.msra.mxu1 %v3270_v17  ;;  %v3252_v13 = vld [vmem:[#allocation22 + $0x930] sm:$0xff]  ;;  %v3218_v6 = vld [vmem:[#allocation22 + $0x820] sm:$0xff]  ;;  %v5816_v17 = vadd.f32 %v5679_v62, %v2136_v46  ;;  %v2138_v62 = vperm.slane %v5723_v0, 2 }
 0xa1f   : > { %3395 = vmatpush.msra.mxu2 %v3308_v26  ;;  %3418 = vmatpush.msra.mxu3 %v3340_v8  ;;  %v3250_v9 = vld [vmem:[#allocation22 + $0x920] sm:$0xff]  ;;  %v3288_v52 = vld [vmem:[#allocation22 + $0xa50] sm:$0xff]  ;;  %v5821_v26 = vadd.f32 %v5681_v63, %v2137_v19 }
 0xa20   : > { %3178 = vmatmul.f32.vlgmr.msrb.gmra.mxu2 %v2540_v44  ;;  %3201 = vmatmul.f32.vlgmr.msrb.gmra.mxu3 %v2541_v45  ;;  %v3334_v44 = vld [vmem:[#allocation22 + $0xbc0] sm:$0xff]  ;;  %v3320_v53 = vld [vmem:[#allocation22 + $0xb50] sm:$0xff]  ;;  %v2542_v63 = vmax.f32 %v5816_v17, 0.0 }
 0xa21   : > { %3353 = vmatpush.msra.mxu0 %v3236_v20  ;;  %3376 = vmatpush.msra.mxu1 %v3268_v1  ;;  %v3230_v45 = vld [vmem:[#allocation22 + $0x880] sm:$0xff]  ;;  %v3216_v56 = vld [vmem:[#allocation22 + $0x810] sm:$0xff] }
 0xa22   : > { %3396 = vmatpush.msra.mxu2 %v3306_v2  ;;  %3419 = vmatpush.msra.mxu3 %v3338_v3  ;;  %v3248_v7 = vld [vmem:[#allocation22 + $0x910] sm:$0xff]  ;;  %v3286_v8 = vld [vmem:[#allocation22 + $0xa40] sm:$0xff] }
 0xa23   : > { %3135 = vmatmul.f32.gmra.mxu0 %v2554_v10  ;;  %3158 = vmatmul.f32.gmra.mxu1 %v2555_v51  ;;  %v3298_v10 = vld [vmem:[#allocation22 + $0xaa0] sm:$0xff]  ;;  %v3284_v3 = vld [vmem:[#allocation22 + $0xa30] sm:$0xff] }
 0xa24   : > { %3354 = vmatpush.msra.mxu0 %v3234_v4  ;;  %3377 = vmatpush.msra.mxu1 %v3266_v11  ;;  %v3330_v51 = vld [vmem:[#allocation22 + $0xba0] sm:$0xff]  ;;  %v3316_v4 = vld [vmem:[#allocation22 + $0xb30] sm:$0xff]  ;;  %v2139_v11 = vperm.slane %v5723_v0, 3 }
 0xa25   : > { %3397 = vmatpush.msra.mxu2 %v3304_v12  ;;  %3420 = vmatpush.msra.mxu3 %v3336_v18  ;;  %v3318_v20 = vld [vmem:[#allocation22 + $0xb40] sm:$0xff]  ;;  %v2543_v12 = vmax.f32 %v5821_v26, 0.0  ;;  %v3245_v18 = vld [vmem:[#allocation22 + $0x8f8] sm:$0xff] }
 0xa26   : > { %3355 = vmatpush.msra.mxu0 %v3232_v15  ;;  %3378 = vmatpush.msra.mxu1 %v3264_v34  ;;  %v3214_v1 = vld [vmem:[#allocation22 + $0x800] sm:$0xff]  ;;  %v3277_v15 = vld [vmem:[#allocation22 + $0x9f8] sm:$0xff] }
 0xa27   : > { %3398 = vmatpush.msra.mxu2 %v3302_v36  ;;  %3421 = vmatpush.msra.mxu3 %v3334_v44  ;;  %v3246_v2 = vld [vmem:[#allocation22 + $0x900] sm:$0xff]  ;;  %v3243_v44 = vld [vmem:[#allocation22 + $0x8e8] sm:$0xff] }
 0xa28   : > { %3356 = vmatpush.msra.mxu0 %v3230_v45  ;;  %3379 = vmatpush.msra.mxu1 %v3262_v48  ;;  %v3282_v34 = vld [vmem:[#allocation22 + $0xa20] sm:$0xff]  ;;  %v3275_v45 = vld [vmem:[#allocation22 + $0x9e8] sm:$0xff]  ;;  %v5834_v48 = vadd.f32 %v5701_v28, %v2138_v62  ;;  %v5844_v28 = vadd.f32 %v5705_v31, %v2136_v46  ;;  %v3341_v31 = vld [vmem:[#allocation22 + $0xbf8] sm:$0xff]  ;;  %v5868_v46 = vadd.f32 %v5739_v50, %v2138_v62 }
 0xa29   : > { %3399 = vmatpush.msra.mxu2 %v3300_v25  ;;  %3422 = vmatpush.msra.mxu3 %v3332_v22  ;;  %v3314_v36 = vld [vmem:[#allocation22 + $0xb20] sm:$0xff]  ;;  %v5839_v25 = vadd.f32 %v5703_v35, %v2139_v11  ;;  %v3280_v22 = vld [vmem:[#allocation22 + $0xa10] sm:$0xff]  ;;  %v5849_v35 = vadd.f32 %v5707_v58, %v2137_v19  ;;  %v5873_v19 = vadd.f32 %v5741_v5, %v2139_v11  ;;  %v3335_v50 = vld [vmem:[#allocation22 + $0xbc8] sm:$0xff] }
 0xa2a   : > { %3181 = vmatmul.f32.gmra.mxu2 %v2556_v16  ;;  %3204 = vmatmul.f32.gmra.mxu3 %v2557_v21  ;;  %v3254_v16 = vld [vmem:[#allocation22 + $0x940] sm:$0xff]  ;;  %v3324_v21 = vld [vmem:[#allocation22 + $0xb70] sm:$0xff]  ;;  %v2558_v58 = vmax.f32 %v5844_v28, 0.0  ;;  %v2560_v0 = vmax.f32 %v5868_v46, 0.0  ;;  %v3299_v62 = vld [vmem:[#allocation22 + $0xaa8] sm:$0xff] }
 0xa2b   : > { %3357 = vmatpush.msra.mxu0 %v3228_v42  ;;  %3380 = vmatpush.msra.mxu1 %v3260_v43  ;;  %v3312_v42 = vld [vmem:[#allocation22 + $0xb10] sm:$0xff]  ;;  %v3241_v43 = vld [vmem:[#allocation22 + $0x8d8] sm:$0xff]  ;;  %v2561_v5 = vmax.f32 %v5873_v19, 0.0  ;;  %v3331_v11 = vld [vmem:[#allocation22 + $0xba8] sm:$0xff] }
 0xa2c   : > { %3400 = vmatpush.msra.mxu2 %v3298_v10  ;;  %3423 = vmatpush.msra.mxu3 %v3330_v51  ;;  %v3273_v10 = vld [vmem:[#allocation22 + $0x9d8] sm:$0xff]  ;;  %v3278_v51 = vld [vmem:[#allocation22 + $0xa00] sm:$0xff]  ;;  %v3621_v19 = vld [vmem:[#allocation22 + $0xe90] sm:$0xff] }
 0xa2d   : > { %3358 = vmatpush.msra.mxu0 %v3226_v23  ;;  %3381 = vmatpush.msra.mxu1 %v3258_v29  ;;  %v3310_v23 = vld [vmem:[#allocation22 + $0xb00] sm:$0xff]  ;;  %v2544_v29 = vmax.f32 %v5834_v48, 0.0 }
 0xa2e   : > { %3401 = vmatpush.msra.mxu2 %v3296_v59  ;;  %3424 = vmatpush.msra.mxu3 %v3328_v33  ;;  %v2545_v59 = vmax.f32 %v5839_v25, 0.0  ;;  %v3239_v33 = vld [vmem:[#allocation22 + $0x8c8] sm:$0xff]  ;;  %v3563_v17 = vld [vmem:[#allocation22 + $0xcc0] sm:$0xff]  ;;  %v3629_v25 = vld [vmem:[#allocation22 + $0xed0] sm:$0xff] }
 0xa2f   : > { %3359 = vmatpush.msra.mxu0 %v3224_v37  ;;  %3382 = vmatpush.msra.mxu1 %v3256_v39  ;;  %v3271_v37 = vld [vmem:[#allocation22 + $0x9c8] sm:$0xff]  ;;  %v3309_v39 = vld [vmem:[#allocation22 + $0xaf8] sm:$0xff]  ;;  %v3595_v26 = vld [vmem:[#allocation22 + $0xdc0] sm:$0xff] }
 0xa30   : > { %3402 = vmatpush.msra.mxu2 %v3294_v40  ;;  %3425 = vmatpush.msra.mxu3 %v3326_v41  ;;  %v2559_v40 = vmax.f32 %v5849_v35, 0.0  ;;  %v3237_v41 = vld [vmem:[#allocation22 + $0x8b8] sm:$0xff]  ;;  %v3559_v48 = vld [vmem:[#allocation22 + $0xca0] sm:$0xff] }
 0xa31   : > { %3360 = vmatpush.msra.mxu0 %v3222_v60  ;;  %3383 = vmatpush.msra.mxu1 %v3254_v16  ;;  %v3269_v60 = vld [vmem:[#allocation22 + $0x9b8] sm:$0xff]  ;;  %v3307_v16 = vld [vmem:[#allocation22 + $0xae8] sm:$0xff]  ;;  %v3583_v46 = vld [vmem:[#allocation22 + $0xd60] sm:$0xff] }
 0xa32   : > { %3403 = vmatpush.msra.mxu2 %v3292_v61  ;;  %3426 = vmatpush.msra.mxu3 %v3324_v21  ;;  %v3339_v61 = vld [vmem:[#allocation22 + $0xbe8] sm:$0xff]  ;;  %v5859_v21 = vld [vmem:[#allocation24] sm:$0x3] }
 0xa33   : > { %3361 = vmatpush.msra.mxu0 %v3220_v27  ;;  %3384 = vmatpush.msra.mxu1 %v3252_v13  ;;  %v3235_v27 = vld [vmem:[#allocation22 + $0x8a8] sm:$0xff] }
 0xa34   : > { %3404 = vmatpush.msra.mxu2 %v3290_v47  ;;  %3427 = vmatpush.msra.mxu3 %v3322_v49  ;;  %v3267_v13 = vld [vmem:[#allocation22 + $0x9a8] sm:$0xff]  ;;  %v3305_v47 = vld [vmem:[#allocation22 + $0xad8] sm:$0xff] }
 0xa35   : > { %3362 = vmatpush.msra.mxu0 %v3218_v6  ;;  %3385 = vmatpush.msra.mxu1 %v3250_v9  ;;  %v3337_v49 = vld [vmem:[#allocation22 + $0xbd8] sm:$0xff] }
 0xa36   : > { %3405 = vmatpush.msra.mxu2 %v3288_v52  ;;  %3428 = vmatpush.msra.mxu3 %v3320_v53  ;;  %v3233_v6 = vld [vmem:[#allocation22 + $0x898] sm:$0xff]  ;;  %v2696_v52 = vperm.slane %v5859_v21, 0  ;;  %v3303_v53 = vld [vmem:[#allocation22 + $0xac8] sm:$0xff] }
 0xa37   : > { %3363 = vmatpush.msra.mxu0 %v3216_v56  ;;  %3386 = vmatpush.msra.mxu1 %v3248_v7  ;;  %v3265_v9 = vld [vmem:[#allocation22 + $0x998] sm:$0xff]  ;;  %v3231_v7 = vld [vmem:[#allocation22 + $0x888] sm:$0xff] }
 0xa38   : > { %3406 = vmatpush.msra.mxu2 %v3286_v8  ;;  %3429 = vmatpush.msra.mxu3 %v3318_v20  ;;  %v3263_v8 = vld [vmem:[#allocation22 + $0x988] sm:$0xff]  ;;  %v3301_v20 = vld [vmem:[#allocation22 + $0xab8] sm:$0xff] }
 0xa39   : > { %3364 = vmatpush.msra.mxu0 %v3214_v1  ;;  %3387 = vmatpush.msra.mxu1 %v3246_v2  ;;  %v3333_v1 = vld [vmem:[#allocation22 + $0xbb8] sm:$0xff] }
 0xa3a   : > { %3407 = vmatpush.msra.mxu2 %v3284_v3  ;;  %3430 = vmatpush.msra.mxu3 %v3316_v4  ;;  %v3229_v3 = vld [vmem:[#allocation22 + $0x878] sm:$0xff] }
 0xa3b   : > { %3365 = vmatmul.f32.vlgmr.msra.gmra.mxu0 %v2542_v63  ;;  %3388 = vmatmul.f32.vlgmr.msra.gmra.mxu1 %v2543_v12  ;;  %v3261_v4 = vld [vmem:[#allocation22 + $0x978] sm:$0xff] }
 0xa3c   : > { %3441 = vmatpush.msrb.mxu0 %v3245_v18  ;;  %3464 = vmatpush.msrb.mxu1 %v3277_v15  ;;  %v3227_v18 = vld [vmem:[#allocation22 + $0x868] sm:$0xff] }
 0xa3d   : > { %3408 = vmatpush.msra.mxu2 %v3282_v34  ;;  %3431 = vmatpush.msra.mxu3 %v3314_v36  ;;  %v3259_v15 = vld [vmem:[#allocation22 + $0x968] sm:$0xff]  ;;  %v3297_v36 = vld [vmem:[#allocation22 + $0xa98] sm:$0xff] }
 0xa3e   : > { %3442 = vmatpush.msrb.mxu0 %v3243_v44  ;;  %3465 = vmatpush.msrb.mxu1 %v3275_v45  ;;  %v3329_v44 = vld [vmem:[#allocation22 + $0xb98] sm:$0xff] }
 0xa3f   : > { %3409 = vmatpush.msra.mxu2 %v3280_v22  ;;  %3432 = vmatpush.msra.mxu3 %v3312_v42  ;;  %v3225_v22 = vld [vmem:[#allocation22 + $0x858] sm:$0xff] }
 0xa40   : > { %3443 = vmatpush.msrb.mxu0 %v3241_v43  ;;  %3466 = vmatpush.msrb.mxu1 %v3273_v10  ;;  %v3257_v42 = vld [vmem:[#allocation22 + $0x958] sm:$0xff]  ;;  %v3295_v10 = vld [vmem:[#allocation22 + $0xa88] sm:$0xff] }
 0xa41   : > { %3410 = vmatpush.msra.mxu2 %v3278_v51  ;;  %3433 = vmatpush.msra.mxu3 %v3310_v23  ;;  %v3327_v51 = vld [vmem:[#allocation22 + $0xb88] sm:$0xff] }
 0xa42   : > { %3411 = vmatmul.f32.vlgmr.msra.gmra.mxu2 %v2544_v29  ;;  %3434 = vmatmul.f32.vlgmr.msra.gmra.mxu3 %v2545_v59 }
 0xa43   : > { %3444 = vmatpush.msrb.mxu0 %v3239_v33  ;;  %3467 = vmatpush.msrb.mxu1 %v3271_v37  ;;  %v2717_v56 = vpop.f32.mrf.mxu0  ;;  %v2740_v34 = vpop.f32.mrf.mxu1  ;;  %v3223_v33 = vld [vmem:[#allocation22 + $0x848] sm:$0xff] }
 0xa44   : > { %3487 = vmatpush.msrb.mxu2 %v3309_v39  ;;  %3510 = vmatpush.msrb.mxu3 %v3341_v31  ;;  %v2718_v2 = vadd.f32 %v2717_v56, %v2696_v52  ;;  %v3255_v37 = vld [vmem:[#allocation22 + $0x948] sm:$0xff]  ;;  %v3293_v31 = vld [vmem:[#allocation22 + $0xa78] sm:$0xff] }
 0xa45   : > { %3368 = vmatmul.f32.gmra.mxu0 %v2558_v58  ;;  %3391 = vmatmul.f32.gmra.mxu1 %v2559_v40  ;;  %v3287_v56 = vld [vmem:[#allocation22 + $0xa48] sm:$0xff] }
 0xa46   : > { %3445 = vmatpush.msrb.mxu0 %v3237_v41  ;;  %3468 = vmatpush.msrb.mxu1 %v3269_v60  ;;  %v2741_v45 = vadd.f32 %v2740_v34, %v2718_v2  ;;  %v3325_v41 = vld [vmem:[#allocation22 + $0xb78] sm:$0xff] }
 0xa47   : > { %3488 = vmatpush.msrb.mxu2 %v3307_v16  ;;  %3511 = vmatpush.msrb.mxu3 %v3339_v61  ;;  %v3221_v16 = vld [vmem:[#allocation22 + $0x838] sm:$0xff] }
 0xa48   : > { %3446 = vmatpush.msrb.mxu0 %v3235_v27  ;;  %3469 = vmatpush.msrb.mxu1 %v3267_v13  ;;  %v3253_v61 = vld [vmem:[#allocation22 + $0x938] sm:$0xff]  ;;  %v3291_v27 = vld [vmem:[#allocation22 + $0xa68] sm:$0xff] }
 0xa49   : > { %3489 = vmatpush.msrb.mxu2 %v3305_v47  ;;  %3512 = vmatpush.msrb.mxu3 %v3337_v49  ;;  %v3323_v13 = vld [vmem:[#allocation22 + $0xb68] sm:$0xff]  ;;  %v3317_v2 = vld [vmem:[#allocation22 + $0xb38] sm:$0xff] }
 0xa4a   : > { %3447 = vmatpush.msrb.mxu0 %v3233_v6  ;;  %3470 = vmatpush.msrb.mxu1 %v3265_v9  ;;  %v3219_v47 = vld [vmem:[#allocation22 + $0x828] sm:$0xff]  ;;  %v3289_v6 = vld [vmem:[#allocation22 + $0xa58] sm:$0xff] }
 0xa4b   : > { %3490 = vmatpush.msrb.mxu2 %v3303_v53  ;;  %3513 = vmatpush.msrb.mxu3 %v3335_v50  ;;  %v3251_v49 = vld [vmem:[#allocation22 + $0x928] sm:$0xff]  ;;  %v3321_v9 = vld [vmem:[#allocation22 + $0xb58] sm:$0xff] }
 0xa4c   : > { %3414 = vmatmul.f32.gmra.mxu2 %v2560_v0  ;;  %3437 = vmatmul.f32.gmra.mxu3 %v2561_v5  ;;  %v3217_v53 = vld [vmem:[#allocation22 + $0x818] sm:$0xff] }
 0xa4d   : > { %3448 = vmatpush.msrb.mxu0 %v3231_v7  ;;  %3471 = vmatpush.msrb.mxu1 %v3263_v8  ;;  %v3249_v50 = vld [vmem:[#allocation22 + $0x918] sm:$0xff]  ;;  %v3319_v7 = vld [vmem:[#allocation22 + $0xb48] sm:$0xff] }
 0xa4e   : > { %3491 = vmatpush.msrb.mxu2 %v3301_v20  ;;  %3514 = vmatpush.msrb.mxu3 %v3333_v1  ;;  %v3215_v8 = vld [vmem:[#allocation22 + $0x808] sm:$0xff]  ;;  %v3285_v1 = vld [vmem:[#allocation22 + $0xa38] sm:$0xff] }
 0xa4f   : > { %3449 = vmatpush.msrb.mxu0 %v3229_v3  ;;  %3472 = vmatpush.msrb.mxu1 %v3261_v4  ;;  %v3247_v20 = vld [vmem:[#allocation22 + $0x908] sm:$0xff]  ;;  %v3569_v3 = vld [vmem:[#allocation22 + $0xcf0] sm:$0xff]  ;;  %v3281_v34 = vld [vmem:[#allocation22 + $0xa18] sm:$0xff] }
 0xa50   : > { %3492 = vmatpush.msrb.mxu2 %v3299_v62  ;;  %3515 = vmatpush.msrb.mxu3 %v3331_v11  ;;  %v2763_v43 = vpop.f32.mrf.mxu2  ;;  %v2786_v39 = vpop.f32.mrf.mxu3  ;;  %v3601_v4 = vld [vmem:[#allocation22 + $0xdf0] sm:$0xff]  ;;  %v3283_v62 = vld [vmem:[#allocation22 + $0xa28] sm:$0xff] }
 0xa51   : > { %3450 = vmatpush.msrb.mxu0 %v3227_v18  ;;  %3473 = vmatpush.msrb.mxu1 %v3259_v15  ;;  %v2764_v23 = vadd.f32 %v2763_v43, %v2741_v45  ;;  %v3315_v11 = vld [vmem:[#allocation22 + $0xb28] sm:$0xff]  ;;  %v3567_v18 = vld [vmem:[#allocation22 + $0xce0] sm:$0xff]  ;;  %v3597_v45 = vld [vmem:[#allocation22 + $0xdd0] sm:$0xff] }
 0xa52   : > { %3493 = vmatpush.msrb.mxu2 %v3297_v36  ;;  %3516 = vmatpush.msrb.mxu3 %v3329_v44  ;;  %v3599_v15 = vld [vmem:[#allocation22 + $0xde0] sm:$0xff]  ;;  %v3313_v36 = vld [vmem:[#allocation22 + $0xb18] sm:$0xff]  ;;  %v3565_v44 = vld [vmem:[#allocation22 + $0xcd0] sm:$0xff] }
 0xa53   : > { %3451 = vmatpush.msrb.mxu0 %v3225_v22  ;;  %3474 = vmatpush.msrb.mxu1 %v3257_v42  ;;  %v2787_v60 = vadd.f32 %v2786_v39, %v2764_v23  ;;  %v3279_v22 = vld [vmem:[#allocation22 + $0xa08] sm:$0xff]  ;;  %v3631_v23 = vld [vmem:[#allocation22 + $0xee0] sm:$0xff]  ;;  %v3589_v39 = vld [vmem:[#allocation22 + $0xd90] sm:$0xff] }
 0xa54   : > { %3494 = vmatpush.msrb.mxu2 %v3295_v10  ;;  %3517 = vmatpush.msrb.mxu3 %v3327_v51  ;;  %v3311_v42 = vld [vmem:[#allocation22 + $0xb08] sm:$0xff]  ;;  %v3561_v10 = vld [vmem:[#allocation22 + $0xcb0] sm:$0xff] }
 0xa55   : > { %3452 = vmatpush.msrb.mxu0 %v3223_v33  ;;  %3475 = vmatpush.msrb.mxu1 %v3255_v37  ;;  %2884 = vst [vmem:[%s5887_s27] sm:$0xff] %v2787_v60  ;;  %v3593_v51 = vld [vmem:[#allocation22 + $0xdb0] sm:$0xff]  ;;  %v3663_v33 = vld [vmem:[#allocation22 + $0xfe0] sm:$0xff] }
 0xa56   : > { %3495 = vmatpush.msrb.mxu2 %v3293_v31  ;;  %3518 = vmatpush.msrb.mxu3 %v3325_v41  ;;  %v3557_v37 = vld [vmem:[#allocation22 + $0xc90] sm:$0xff]  ;;  %v3627_v31 = vld [vmem:[#allocation22 + $0xec0] sm:$0xff] }
 0xa57   : > { %3453 = vmatpush.msrb.mxu0 %v3221_v16  ;;  %3476 = vmatpush.msrb.mxu1 %v3253_v61  ;;  %v3659_v41 = vld [vmem:[#allocation22 + $0xfc0] sm:$0xff]  ;;  %v3625_v60 = vld [vmem:[#allocation22 + $0xeb0] sm:$0xff] }
 0xa58   : > { %3496 = vmatpush.msrb.mxu2 %v3291_v27  ;;  %3519 = vmatpush.msrb.mxu3 %v3323_v13  ;;  %v3657_v16 = vld [vmem:[#allocation22 + $0xfb0] sm:$0xff]  ;;  %v2697_v13 = vperm.slane %v5859_v21, 1  ;;  %v3607_v21 = vld [vmem:[#allocation22 + $0xe20] sm:$0xff] }
 0xa59   : > { %3454 = vmatpush.msrb.mxu0 %v3219_v47  ;;  %3477 = vmatpush.msrb.mxu1 %v3251_v49  ;;  %v3553_v61 = vld [vmem:[#allocation22 + $0xc70] sm:$0xff]  ;;  %v3623_v49 = vld [vmem:[#allocation22 + $0xea0] sm:$0xff] }
 0xa5a   : > { %3497 = vmatpush.msrb.mxu2 %v3289_v6  ;;  %3520 = vmatpush.msrb.mxu3 %v3321_v9  ;;  %v3585_v27 = vld [vmem:[#allocation22 + $0xd70] sm:$0xff]  ;;  %v3655_v6 = vld [vmem:[#allocation22 + $0xfa0] sm:$0xff] }
 0xa5b   : > { %3455 = vmatpush.msrb.mxu0 %v3217_v53  ;;  %3478 = vmatpush.msrb.mxu1 %v3249_v50  ;;  %v3551_v50 = vld [vmem:[#allocation22 + $0xc60] sm:$0xff] }
 0xa5c   : > { %3498 = vmatpush.msrb.mxu2 %v3287_v56  ;;  %3521 = vmatpush.msrb.mxu3 %v3319_v7  ;;  %v3549_v56 = vld [vmem:[#allocation22 + $0xc50] sm:$0xff] }
 0xa5d   : > { %3456 = vmatpush.msrb.mxu0 %v3215_v8  ;;  %3479 = vmatpush.msrb.mxu1 %v3247_v20  ;;  %v3581_v7 = vld [vmem:[#allocation22 + $0xd50] sm:$0xff] }
 0xa5e   : > { %3499 = vmatpush.msrb.mxu2 %v3285_v1  ;;  %3522 = vmatpush.msrb.mxu3 %v3317_v2  ;;  %v3619_v1 = vld [vmem:[#allocation22 + $0xe80] sm:$0xff] }
 0xa5f   : > { %3457 = vmatmul.f32.vlgmr.msrb.gmra.mxu0 %v2542_v63  ;;  %3480 = vmatmul.f32.vlgmr.msrb.gmra.mxu1 %v2543_v12  ;;  %v3633_v63 = vld [vmem:[#allocation22 + $0xef0] sm:$0xff]  ;;  %v3651_v2 = vld [vmem:[#allocation22 + $0xf80] sm:$0xff] }
 0xa60   : > { %3674 = vmatpush.msra.mxu0 %v3569_v3  ;;  %3697 = vmatpush.msra.mxu1 %v3601_v4  ;;  %v3665_v12 = vld [vmem:[#allocation22 + $0xff0] sm:$0xff]  ;;  %v3547_v3 = vld [vmem:[#allocation22 + $0xc40] sm:$0xff] }
 0xa61   : > { %3500 = vmatpush.msrb.mxu2 %v3283_v62  ;;  %3523 = vmatpush.msrb.mxu3 %v3315_v11  ;;  %v3579_v4 = vld [vmem:[#allocation22 + $0xd40] sm:$0xff]  ;;  %v3617_v62 = vld [vmem:[#allocation22 + $0xe70] sm:$0xff] }
 0xa62   : > { %3675 = vmatpush.msra.mxu0 %v3567_v18  ;;  %3698 = vmatpush.msra.mxu1 %v3599_v15  ;;  %v3649_v11 = vld [vmem:[#allocation22 + $0xf70] sm:$0xff] }
 0xa63   : > { %3501 = vmatpush.msrb.mxu2 %v3281_v34  ;;  %3524 = vmatpush.msrb.mxu3 %v3313_v36  ;;  %v3545_v15 = vld [vmem:[#allocation22 + $0xc30] sm:$0xff] }
 0xa64   : > { %3676 = vmatpush.msra.mxu0 %v3565_v44  ;;  %3699 = vmatpush.msra.mxu1 %v3597_v45  ;;  %v2720_v43 = vpop.f32.mrf.mxu0  ;;  %v2743_v35 = vpop.f32.mrf.mxu1  ;;  %v3577_v34 = vld [vmem:[#allocation22 + $0xd30] sm:$0xff]  ;;  %v3615_v44 = vld [vmem:[#allocation22 + $0xe60] sm:$0xff] }
 0xa65   : > { %3502 = vmatpush.msrb.mxu2 %v3279_v22  ;;  %3525 = vmatpush.msrb.mxu3 %v3311_v42  ;;  %v2721_v28 = vadd.f32 %v2720_v43, %v2696_v52  ;;  %v3647_v45 = vld [vmem:[#allocation22 + $0xf60] sm:$0xff] }
 0xa66   : > { %3503 = vmatmul.f32.vlgmr.msrb.gmra.mxu2 %v2544_v29  ;;  %3526 = vmatmul.f32.vlgmr.msrb.gmra.mxu3 %v2545_v59  ;;  %v3591_v29 = vld [vmem:[#allocation22 + $0xda0] sm:$0xff]  ;;  %v3661_v59 = vld [vmem:[#allocation22 + $0xfd0] sm:$0xff] }
 0xa67   : > { %3677 = vmatpush.msra.mxu0 %v3563_v17  ;;  %3700 = vmatpush.msra.mxu1 %v3595_v26  ;;  %v2744_v52 = vadd.f32 %v2743_v35, %v2721_v28  ;;  %v3543_v42 = vld [vmem:[#allocation22 + $0xc20] sm:$0xff]  ;;  %v2547_v28 = vmax.f32 %v5755_v55, 0.0  ;;  %v3570_v35 = vld [vmem:[#allocation22 + $0xcf8] sm:$0xff] }
 0xa68   : > { %3720 = vmatpush.msra.mxu2 %v3633_v63  ;;  %3743 = vmatpush.msra.mxu3 %v3665_v12  ;;  %v3575_v17 = vld [vmem:[#allocation22 + $0xd20] sm:$0xff]  ;;  %v3613_v63 = vld [vmem:[#allocation22 + $0xe50] sm:$0xff] }
 0xa69   : > { %3460 = vmatmul.f32.gmra.mxu0 %v2558_v58  ;;  %3483 = vmatmul.f32.gmra.mxu1 %v2559_v40  ;;  %v3555_v58 = vld [vmem:[#allocation22 + $0xc80] sm:$0xff]  ;;  %v3645_v12 = vld [vmem:[#allocation22 + $0xf50] sm:$0xff] }
 0xa6a   : > { %3678 = vmatpush.msra.mxu0 %v3561_v10  ;;  %3701 = vmatpush.msra.mxu1 %v3593_v51  ;;  %v3587_v40 = vld [vmem:[#allocation22 + $0xd80] sm:$0xff]  ;;  %v3541_v51 = vld [vmem:[#allocation22 + $0xc10] sm:$0xff] }
 0xa6b   : > { %3721 = vmatpush.msra.mxu2 %v3631_v23  ;;  %3744 = vmatpush.msra.mxu3 %v3663_v33  ;;  %v3573_v23 = vld [vmem:[#allocation22 + $0xd10] sm:$0xff] }
 0xa6c   : > { %3679 = vmatpush.msra.mxu0 %v3559_v48  ;;  %3702 = vmatpush.msra.mxu1 %v3591_v29  ;;  %v2809_v47 = vpop.f32.mrf.mxu0  ;;  %v2832_v18 = vpop.f32.mrf.mxu1  ;;  %v3611_v48 = vld [vmem:[#allocation22 + $0xe40] sm:$0xff] }
 0xa6d   : > { %3722 = vmatpush.msra.mxu2 %v3629_v25  ;;  %3745 = vmatpush.msra.mxu3 %v3661_v59  ;;  %v2810_v8 = vadd.f32 %v2809_v47, %v2697_v13  ;;  %v3643_v29 = vld [vmem:[#allocation22 + $0xf40] sm:$0xff]  ;;  %v3605_v47 = vld [vmem:[#allocation22 + $0xe10] sm:$0xff] }
 0xa6e   : > { %3680 = vmatpush.msra.mxu0 %v3557_v37  ;;  %3703 = vmatpush.msra.mxu1 %v3589_v39  ;;  %v3539_v25 = vld [vmem:[#allocation22 + $0xc00] sm:$0xff]  ;;  %v3609_v39 = vld [vmem:[#allocation22 + $0xe30] sm:$0xff] }
 0xa6f   : > { %3723 = vmatpush.msra.mxu2 %v3627_v31  ;;  %3746 = vmatpush.msra.mxu3 %v3659_v41  ;;  %v2833_v36 = vadd.f32 %v2832_v18, %v2810_v8  ;;  %v3571_v59 = vld [vmem:[#allocation22 + $0xd00] sm:$0xff]  ;;  %v3641_v31 = vld [vmem:[#allocation22 + $0xf30] sm:$0xff]  ;;  %v2546_v41 = vmax.f32 %v5751_v54, 0.0  ;;  %v2549_v8 = vmax.f32 %v5777_v30, 0.0  ;;  %v3562_v18 = vld [vmem:[#allocation22 + $0xcb8] sm:$0xff] }
 0xa70   : > { %3506 = vmatmul.f32.gmra.mxu2 %v2560_v0  ;;  %3529 = vmatmul.f32.gmra.mxu3 %v2561_v5  ;;  %v3653_v5 = vld [vmem:[#allocation22 + $0xf90] sm:$0xff] }
 0xa71   : > { %3681 = vmatpush.msra.mxu0 %v3555_v58  ;;  %3704 = vmatpush.msra.mxu1 %v3587_v40  ;;  %v2766_v9 = vpop.f32.mrf.mxu2  ;;  %v2789_v53 = vpop.f32.mrf.mxu3  ;;  %v3602_v58 = vld [vmem:[#allocation22 + $0xdf8] sm:$0xff] }
 0xa72   : > { %3724 = vmatpush.msra.mxu2 %v3625_v60  ;;  %3747 = vmatpush.msra.mxu3 %v3657_v16  ;;  %v2767_v0 = vadd.f32 %v2766_v9, %v2744_v52  ;;  %v5917_v60 = vld [vmem:[#allocation24 + $0x2] sm:$0x3]  ;;  %v3600_v52 = vld [vmem:[#allocation22 + $0xde8] sm:$0xff] }
 0xa73   : > { %3682 = vmatpush.msra.mxu0 %v3553_v61  ;;  %3705 = vmatpush.msra.mxu1 %v3585_v27  ;;  %v3639_v16 = vld [vmem:[#allocation22 + $0xf20] sm:$0xff]  ;;  %v3568_v27 = vld [vmem:[#allocation22 + $0xce8] sm:$0xff] }
 0xa74   : > { %3725 = vmatpush.msra.mxu2 %v3623_v49  ;;  %3748 = vmatpush.msra.mxu3 %v3655_v6  ;;  %v2790_v20 = vadd.f32 %v2789_v53, %v2767_v0  ;;  %v3637_v49 = vld [vmem:[#allocation22 + $0xf10] sm:$0xff]  ;;  %v3020_v6 = vperm.slane %v5917_v60, 0  ;;  %v3566_v53 = vld [vmem:[#allocation22 + $0xcd8] sm:$0xff] }
 0xa75   : > { %3683 = vmatpush.msra.mxu0 %v3551_v50  ;;  %3706 = vmatpush.msra.mxu1 %v3583_v46  ;;  %v3598_v50 = vld [vmem:[#allocation22 + $0xdd8] sm:$0xff] }
 0xa76   : > { %3726 = vmatpush.msra.mxu2 %v3621_v19  ;;  %3749 = vmatpush.msra.mxu3 %v3653_v5  ;;  %2886 = vst [vmem:[%s5887_s27 + $0x10] sm:$0xff] %v2790_v20  ;;  %v2812_v43 = vpop.f32.mrf.mxu0  ;;  %v2835_v40 = vpop.f32.mrf.mxu1  ;;  %v3603_v19 = vld [vmem:[#allocation22 + $0xe00] sm:$0xff]  ;;  %v3564_v20 = vld [vmem:[#allocation22 + $0xcc8] sm:$0xff] }
 0xa77   : > { %3684 = vmatpush.msra.mxu0 %v3549_v56  ;;  %3707 = vmatpush.msra.mxu1 %v3581_v7  ;;  %v2813_v37 = vadd.f32 %v2812_v43, %v2697_v13  ;;  %v3635_v5 = vld [vmem:[#allocation22 + $0xf00] sm:$0xff]  ;;  %v2548_v7 = vmax.f32 %v5775_v24, 0.0  ;;  %v3558_v43 = vld [vmem:[#allocation22 + $0xc98] sm:$0xff] }
 0xa78   : > { %3727 = vmatpush.msra.mxu2 %v3619_v1  ;;  %3750 = vmatpush.msra.mxu3 %v3651_v2  ;;  %v3596_v1 = vld [vmem:[#allocation22 + $0xdc8] sm:$0xff]  ;;  %v3343_v24 = vld [vmem:[#allocation24 + $0x4] sm:$0x3] }
 0xa79   : > { %3685 = vmatpush.msra.mxu0 %v3547_v3  ;;  %3708 = vmatpush.msra.mxu1 %v3579_v4  ;;  %v2855_v22 = vpop.f32.mrf.mxu2  ;;  %v2878_v10 = vpop.f32.mrf.mxu3  ;;  %v2836_v61 = vadd.f32 %v2835_v40, %v2813_v37  ;;  %v3634_v3 = vld [vmem:[#allocation22 + $0xef8] sm:$0xff]  ;;  %v3556_v37 = vld [vmem:[#allocation22 + $0xc88] sm:$0xff]  ;;  %v3345_v30 = vperm.slane %v3343_v24, 0 }
 0xa7a   : > { %3728 = vmatpush.msra.mxu2 %v3617_v62  ;;  %3751 = vmatpush.msra.mxu3 %v3649_v11  ;;  %v2856_v26 = vadd.f32 %v2855_v22, %v2833_v36  ;;  %v3666_v4 = vld [vmem:[#allocation22 + $0xff8] sm:$0xff]  ;;  %v2562_v62 = vmax.f32 %v5781_v38, 0.0  ;;  %v2563_v11 = vmax.f32 %v5785_v14, 0.0  ;;  %v3632_v36 = vld [vmem:[#allocation22 + $0xee8] sm:$0xff] }
 0xa7b   : > { %3686 = vmatpush.msra.mxu0 %v3545_v15  ;;  %3709 = vmatpush.msra.mxu1 %v3577_v34  ;;  %v3594_v15 = vld [vmem:[#allocation22 + $0xdb8] sm:$0xff]  ;;  %v3560_v22 = vld [vmem:[#allocation22 + $0xca8] sm:$0xff] }
 0xa7c   : > { %3729 = vmatpush.msra.mxu2 %v3615_v44  ;;  %3752 = vmatpush.msra.mxu3 %v3647_v45  ;;  %v2879_v33 = vadd.f32 %v2878_v10, %v2856_v26  ;;  %v3664_v44 = vld [vmem:[#allocation22 + $0xfe8] sm:$0xff]  ;;  %v3630_v26 = vld [vmem:[#allocation22 + $0xed8] sm:$0xff] }
 0xa7d   : > { %3687 = vmatpush.msra.mxu0 %v3543_v42  ;;  %3710 = vmatpush.msra.mxu1 %v3575_v17  ;;  %v3592_v42 = vld [vmem:[#allocation22 + $0xda8] sm:$0xff]  ;;  %v3590_v10 = vld [vmem:[#allocation22 + $0xd98] sm:$0xff] }
 0xa7e   : > { %3730 = vmatpush.msra.mxu2 %v3613_v63  ;;  %3753 = vmatpush.msra.mxu3 %v3645_v12  ;;  %2885 = vst [vmem:[%s5887_s27 + $0x8] sm:$0xff] %v2879_v33  ;;  %v3662_v63 = vld [vmem:[#allocation22 + $0xfd8] sm:$0xff]  ;;  %v3628_v33 = vld [vmem:[#allocation22 + $0xec8] sm:$0xff] }
 0xa7f   : > { %3688 = vmatpush.msra.mxu0 %v3541_v51  ;;  %3711 = vmatpush.msra.mxu1 %v3573_v23  ;;  %v3554_v40 = vld [vmem:[#allocation22 + $0xc78] sm:$0xff] }
 0xa80   : > { %3731 = vmatpush.msra.mxu2 %v3611_v48  ;;  %3754 = vmatpush.msra.mxu3 %v3643_v29  ;;  %v3041_v46 = vpop.f32.mrf.mxu0  ;;  %v3064_v34 = vpop.f32.mrf.mxu1  ;;  %v3660_v48 = vld [vmem:[#allocation22 + $0xfc8] sm:$0xff] }
 0xa81   : > { %3689 = vmatpush.msra.mxu0 %v3539_v25  ;;  %3712 = vmatpush.msra.mxu1 %v3571_v59  ;;  %v3042_v2 = vadd.f32 %v3041_v46, %v3020_v6  ;;  %v2564_v25 = vmax.f32 %v5795_v57, 0.0  ;;  %v2565_v59 = vmax.f32 %v5797_v32, 0.0 }
 0xa82   : > { %3732 = vmatpush.msra.mxu2 %v3609_v39  ;;  %3755 = vmatpush.msra.mxu3 %v3641_v31  ;;  %v3588_v39 = vld [vmem:[#allocation22 + $0xd88] sm:$0xff] }
 0xa83   : > { %3690 = vmatmul.f32.vlgmr.msra.gmra.mxu0 %v2546_v41  ;;  %3713 = vmatmul.f32.vlgmr.msra.gmra.mxu1 %v2547_v28  ;;  %v2858_v13 = vpop.f32.mrf.mxu2  ;;  %v2881_v0 = vpop.f32.mrf.mxu3  ;;  %v3065_v45 = vadd.f32 %v3064_v34, %v3042_v2  ;;  %v3578_v34 = vld [vmem:[#allocation22 + $0xd38] sm:$0xff] }
 0xa84   : > { %3766 = vmatpush.msrb.mxu0 %v3570_v35  ;;  %3789 = vmatpush.msrb.mxu1 %v3602_v58  ;;  %v2859_v9 = vadd.f32 %v2858_v13, %v2836_v61  ;;  %v3626_v35 = vld [vmem:[#allocation22 + $0xeb8] sm:$0xff]  ;;  %v3656_v61 = vld [vmem:[#allocation22 + $0xfa8] sm:$0xff] }
 0xa85   : > { %3733 = vmatpush.msra.mxu2 %v3607_v21  ;;  %3756 = vmatpush.msra.mxu3 %v3639_v16  ;;  %v3658_v58 = vld [vmem:[#allocation22 + $0xfb8] sm:$0xff]  ;;  %v3624_v16 = vld [vmem:[#allocation22 + $0xea8] sm:$0xff] }
 0xa86   : > { %3767 = vmatpush.msrb.mxu0 %v3568_v27  ;;  %3790 = vmatpush.msrb.mxu1 %v3600_v52  ;;  %v2882_v56 = vadd.f32 %v2881_v0, %v2859_v9  ;;  %v3586_v21 = vld [vmem:[#allocation22 + $0xd78] sm:$0xff]  ;;  %v3552_v52 = vld [vmem:[#allocation22 + $0xc68] sm:$0xff] }
 0xa87   : > { %3734 = vmatpush.msra.mxu2 %v3605_v47  ;;  %3757 = vmatpush.msra.mxu3 %v3637_v49  ;;  %v3584_v13 = vld [vmem:[#allocation22 + $0xd68] sm:$0xff]  ;;  %v3622_v49 = vld [vmem:[#allocation22 + $0xe98] sm:$0xff] }
 0xa88   : > { %3768 = vmatpush.msrb.mxu0 %v3566_v53  ;;  %3791 = vmatpush.msrb.mxu1 %v3598_v50  ;;  %2887 = vst [vmem:[%s5887_s27 + $0x18] sm:$0xff] %v2882_v56  ;;  %v3550_v53 = vld [vmem:[#allocation22 + $0xc58] sm:$0xff]  ;;  %v3620_v0 = vld [vmem:[#allocation22 + $0xe88] sm:$0xff] }
 0xa89   : > { %3735 = vmatpush.msra.mxu2 %v3603_v19  ;;  %3758 = vmatpush.msra.mxu3 %v3635_v5  ;;  %v3582_v50 = vld [vmem:[#allocation22 + $0xd58] sm:$0xff]  ;;  %v3652_v19 = vld [vmem:[#allocation22 + $0xf88] sm:$0xff] }
 0xa8a   : > { %3736 = vmatmul.f32.vlgmr.msra.gmra.mxu2 %v2548_v7  ;;  %3759 = vmatmul.f32.vlgmr.msra.gmra.mxu3 %v2549_v8  ;;  %v3044_v51 = vpop.f32.mrf.mxu0  ;;  %v3067_v27 = vpop.f32.mrf.mxu1  ;;  %v3548_v56 = vld [vmem:[#allocation22 + $0xc48] sm:$0xff] }
 0xa8b   : > { %3769 = vmatpush.msrb.mxu0 %v3564_v20  ;;  %3792 = vmatpush.msrb.mxu1 %v3596_v1  ;;  %v3045_v31 = vadd.f32 %v3044_v51, %v3020_v6  ;;  %v3654_v6 = vld [vmem:[#allocation22 + $0xf98] sm:$0xff]  ;;  %v3580_v20 = vld [vmem:[#allocation22 + $0xd48] sm:$0xff]  ;;  %v3021_v1 = vperm.slane %v5917_v60, 1 }
 0xa8c   : > { %3812 = vmatpush.msrb.mxu2 %v3634_v3  ;;  %3835 = vmatpush.msrb.mxu3 %v3666_v4  ;;  %v3618_v3 = vld [vmem:[#allocation22 + $0xe78] sm:$0xff]  ;;  %v3540_v51 = vld [vmem:[#allocation22 + $0xc08] sm:$0xff] }
 0xa8d   : > { %3693 = vmatmul.f32.gmra.mxu0 %v2562_v62  ;;  %3716 = vmatmul.f32.gmra.mxu1 %v2563_v11  ;;  %v3087_v17 = vpop.f32.mrf.mxu2  ;;  %v3110_v23 = vpop.f32.mrf.mxu3  ;;  %v3068_v47 = vadd.f32 %v3067_v27, %v3045_v31  ;;  %v3650_v4 = vld [vmem:[#allocation22 + $0xf78] sm:$0xff]  ;;  %v3608_v31 = vld [vmem:[#allocation22 + $0xe28] sm:$0xff] }
 0xa8e   : > { %3770 = vmatpush.msrb.mxu0 %v3562_v18  ;;  %3793 = vmatpush.msrb.mxu1 %v3594_v15  ;;  %v3088_v12 = vadd.f32 %v3087_v17, %v3065_v45  ;;  %v3546_v15 = vld [vmem:[#allocation22 + $0xc38] sm:$0xff]  ;;  %v3544_v45 = vld [vmem:[#allocation22 + $0xc28] sm:$0xff] }
 0xa8f   : > { %3813 = vmatpush.msrb.mxu2 %v3632_v36  ;;  %3836 = vmatpush.msrb.mxu3 %v3664_v44  ;;  %v3616_v36 = vld [vmem:[#allocation22 + $0xe68] sm:$0xff]  ;;  %v3646_v17 = vld [vmem:[#allocation22 + $0xf58] sm:$0xff] }
 0xa90   : > { %3771 = vmatpush.msrb.mxu0 %v3560_v22  ;;  %3794 = vmatpush.msrb.mxu1 %v3592_v42  ;;  %v3111_v29 = vadd.f32 %v3110_v23, %v3088_v12  ;;  %v3648_v44 = vld [vmem:[#allocation22 + $0xf68] sm:$0xff]  ;;  %v3614_v42 = vld [vmem:[#allocation22 + $0xe58] sm:$0xff] }
 0xa91   : > { %3814 = vmatpush.msrb.mxu2 %v3630_v26  ;;  %3837 = vmatpush.msrb.mxu3 %v3662_v63  ;;  %v3576_v22 = vld [vmem:[#allocation22 + $0xd28] sm:$0xff]  ;;  %v3542_v26 = vld [vmem:[#allocation22 + $0xc18] sm:$0xff] }
 0xa92   : > { %3772 = vmatpush.msrb.mxu0 %v3558_v43  ;;  %3795 = vmatpush.msrb.mxu1 %v3590_v10  ;;  %4243 = vst [vmem:[%s5887_s27 + $0x20] sm:$0xff] %v3111_v29  ;;  %v3574_v63 = vld [vmem:[#allocation22 + $0xd18] sm:$0xff]  ;;  %v3612_v12 = vld [vmem:[#allocation22 + $0xe48] sm:$0xff] }
 0xa93   : > { %3815 = vmatpush.msrb.mxu2 %v3628_v33  ;;  %3838 = vmatpush.msrb.mxu3 %v3660_v48  ;;  %v3644_v43 = vld [vmem:[#allocation22 + $0xf48] sm:$0xff]  ;;  %v3610_v48 = vld [vmem:[#allocation22 + $0xe38] sm:$0xff] }
 0xa94   : > { %3739 = vmatmul.f32.gmra.mxu2 %v2564_v25  ;;  %3762 = vmatmul.f32.gmra.mxu3 %v2565_v59  ;;  %v3572_v23 = vld [vmem:[#allocation22 + $0xd08] sm:$0xff]  ;;  %v3642_v29 = vld [vmem:[#allocation22 + $0xf38] sm:$0xff] }
 0xa95   : > { %3773 = vmatpush.msrb.mxu0 %v3556_v37  ;;  %3796 = vmatpush.msrb.mxu1 %v3588_v39  ;;  %v3133_v18 = vpop.f32.mrf.mxu0  ;;  %v3156_v10 = vpop.f32.mrf.mxu1 }
 0xa96   : > { %3816 = vmatpush.msrb.mxu2 %v3626_v35  ;;  %3839 = vmatpush.msrb.mxu3 %v3658_v58  ;;  %v3134_v60 = vadd.f32 %v3133_v18, %v3021_v1  ;;  %v3640_v35 = vld [vmem:[#allocation22 + $0xf28] sm:$0xff] }
 0xa97   : > { %3774 = vmatpush.msrb.mxu0 %v3554_v40  ;;  %3797 = vmatpush.msrb.mxu1 %v3586_v21  ;;  %v3090_v9 = vpop.f32.mrf.mxu2  ;;  %v3113_v5 = vpop.f32.mrf.mxu3 }
 0xa98   : > { %3817 = vmatpush.msrb.mxu2 %v3624_v16  ;;  %3840 = vmatpush.msrb.mxu3 %v3656_v61  ;;  %v3091_v46 = vadd.f32 %v3090_v9, %v3068_v47  ;;  %v3157_v33 = vadd.f32 %v3156_v10, %v3134_v60  ;;  %v3606_v16 = vld [vmem:[#allocation22 + $0xe18] sm:$0xff] }
 0xa99   : > { %3775 = vmatpush.msrb.mxu0 %v3552_v52  ;;  %3798 = vmatpush.msrb.mxu1 %v3584_v13  ;;  %v3638_v61 = vld [vmem:[#allocation22 + $0xf18] sm:$0xff]  ;;  %v3604_v52 = vld [vmem:[#allocation22 + $0xe08] sm:$0xff] }
 0xa9a   : > { %3818 = vmatpush.msrb.mxu2 %v3622_v49  ;;  %3841 = vmatpush.msrb.mxu3 %v3654_v6  ;;  %v3114_v2 = vadd.f32 %v3113_v5, %v3091_v46  ;;  %v3636_v13 = vld [vmem:[#allocation22 + $0xf08] sm:$0xff] }
 0xa9b   : > { %3776 = vmatpush.msrb.mxu0 %v3550_v53  ;;  %3799 = vmatpush.msrb.mxu1 %v3582_v50 }
 0xa9c   : > { %3819 = vmatpush.msrb.mxu2 %v3620_v0  ;;  %3842 = vmatpush.msrb.mxu3 %v3652_v19  ;;  %4245 = vst [vmem:[%s5887_s27 + $0x30] sm:$0xff] %v3114_v2  ;;  %v3346_v19 = vperm.slane %v3343_v24, 1 }
 0xa9d   : > { %3777 = vmatpush.msrb.mxu0 %v3548_v56  ;;  %3800 = vmatpush.msrb.mxu1 %v3580_v20 }
 0xa9e   : > { %3820 = vmatpush.msrb.mxu2 %v3618_v3  ;;  %3843 = vmatpush.msrb.mxu3 %v3650_v4 }
 0xa9f   : > { %3778 = vmatpush.msrb.mxu0 %v3546_v15  ;;  %3801 = vmatpush.msrb.mxu1 %v3578_v34 }
 0xaa0   : > { %3821 = vmatpush.msrb.mxu2 %v3616_v36  ;;  %3844 = vmatpush.msrb.mxu3 %v3648_v44  ;;  %v3136_v58 = vpop.f32.mrf.mxu0  ;;  %v3159_v47 = vpop.f32.mrf.mxu1 }
 0xaa1   : > { %3779 = vmatpush.msrb.mxu0 %v3544_v45  ;;  %3802 = vmatpush.msrb.mxu1 %v3576_v22  ;;  %v3137_v27 = vadd.f32 %v3136_v58, %v3021_v1 }
 0xaa2   : > { %3822 = vmatpush.msrb.mxu2 %v3614_v42  ;;  %3845 = vmatpush.msrb.mxu3 %v3646_v17  ;;  %v3668_v17 = vld [vmem:[#allocation24 + $0x6] sm:$0x3] }
 0xaa3   : > { %3780 = vmatpush.msrb.mxu0 %v3542_v26  ;;  %3803 = vmatpush.msrb.mxu1 %v3574_v63  ;;  %v3179_v37 = vpop.f32.mrf.mxu2  ;;  %v3202_v40 = vpop.f32.mrf.mxu3  ;;  %v3160_v49 = vadd.f32 %v3159_v47, %v3137_v27  ;;  %v3670_v26 = vperm.slane %v3668_v17, 0 }
 0xaa4   : > { %3823 = vmatpush.msrb.mxu2 %v3612_v12  ;;  %3846 = vmatpush.msrb.mxu3 %v3644_v43  ;;  %v3180_v39 = vadd.f32 %v3179_v37, %v3157_v33 }
 0xaa5   : > { %3781 = vmatpush.msrb.mxu0 %v3540_v51  ;;  %3804 = vmatpush.msrb.mxu1 %v3572_v23 }
 0xaa6   : > { %3824 = vmatpush.msrb.mxu2 %v3610_v48  ;;  %3847 = vmatpush.msrb.mxu3 %v3642_v29  ;;  %v3203_v21 = vadd.f32 %v3202_v40, %v3180_v39 }
 0xaa7   : > { %3782 = vmatmul.f32.vlgmr.msrb.gmra.mxu0 %v2546_v41  ;;  %3805 = vmatmul.f32.vlgmr.msrb.gmra.mxu1 %v2547_v28 }
 0xaa8   : > { %3825 = vmatpush.msrb.mxu2 %v3608_v31  ;;  %3848 = vmatpush.msrb.mxu3 %v3640_v35  ;;  %4244 = vst [vmem:[%s5887_s27 + $0x28] sm:$0xff] %v3203_v21 }
 0xaaa   : > { %3826 = vmatpush.msrb.mxu2 %v3606_v16  ;;  %3849 = vmatpush.msrb.mxu3 %v3638_v61  ;;  %v3671_v61 = vperm.slane %v3668_v17, 1 }
 0xaac   : > { %3827 = vmatpush.msrb.mxu2 %v3604_v52  ;;  %3850 = vmatpush.msrb.mxu3 %v3636_v13 }
 0xaad   : > { %3828 = vmatmul.f32.vlgmr.msrb.gmra.mxu2 %v2548_v7  ;;  %3851 = vmatmul.f32.vlgmr.msrb.gmra.mxu3 %v2549_v8  ;;  %v3182_v54 = vpop.f32.mrf.mxu2  ;;  %v3205_v41 = vpop.f32.mrf.mxu3 }
 0xaae   : > { %v3183_v55 = vadd.f32 %v3182_v54, %v3160_v49 }
 0xaaf   : > { %3785 = vmatmul.f32.gmra.mxu0 %v2562_v62  ;;  %3808 = vmatmul.f32.gmra.mxu1 %v2563_v11 }
 0xab0   : > { %v3206_v28 = vadd.f32 %v3205_v41, %v3183_v55 }
 0xab2   : > { %4246 = vst [vmem:[%s5887_s27 + $0x38] sm:$0xff] %v3206_v28 }
 0xab5   : > { %3831 = vmatmul.f32.gmra.mxu2 %v2564_v25  ;;  %3854 = vmatmul.f32.gmra.mxu3 %v2565_v59 }
 0xab8   : > { %v3366_v7 = vpop.f32.mrf.mxu0  ;;  %v3389_v38 = vpop.f32.mrf.mxu1 }
 0xab9   : > { %v3367_v8 = vadd.f32 %v3366_v7, %v3345_v30 }
 0xabb   : > { %v3390_v62 = vadd.f32 %v3389_v38, %v3367_v8 }
 0xac2   : > { %v3369_v11 = vpop.f32.mrf.mxu0  ;;  %v3392_v46 = vpop.f32.mrf.mxu1 }
 0xac3   : > { %v3370_v50 = vadd.f32 %v3369_v11, %v3345_v30 }
 0xac5   : > { %v3412_v6 = vpop.f32.mrf.mxu2  ;;  %v3435_v9 = vpop.f32.mrf.mxu3  ;;  %v3393_v57 = vadd.f32 %v3392_v46, %v3370_v50 }
 0xac6   : > { %v3413_v14 = vadd.f32 %v3412_v6, %v3390_v62 }
 0xac8   : > { %v3436_v53 = vadd.f32 %v3435_v9, %v3413_v14 }
 0xaca   : > { %4247 = vst [vmem:[%s5887_s27 + $0x40] sm:$0xff] %v3436_v53 }
 0xacf   : > { %v3415_v25 = vpop.f32.mrf.mxu2  ;;  %v3438_v59 = vpop.f32.mrf.mxu3 }
 0xad0   : > { %v3416_v32 = vadd.f32 %v3415_v25, %v3393_v57 }
 0xad2   : > { %v3439_v0 = vadd.f32 %v3438_v59, %v3416_v32 }
 0xad4   : > { %4249 = vst [vmem:[%s5887_s27 + $0x50] sm:$0xff] %v3439_v0 }
 0xadc   : > { %v3458_v5 = vpop.f32.mrf.mxu0  ;;  %v3481_v20 = vpop.f32.mrf.mxu1 }
 0xadd   : > { %v3459_v56 = vadd.f32 %v3458_v5, %v3346_v19 }
 0xadf   : > { %v3482_v1 = vadd.f32 %v3481_v20, %v3459_v56 }
 0xae6   : > { %v3461_v4 = vpop.f32.mrf.mxu0  ;;  %v3484_v36 = vpop.f32.mrf.mxu1 }
 0xae7   : > { %v3462_v34 = vadd.f32 %v3461_v4, %v3346_v19 }
 0xae9   : > { %v3504_v2 = vpop.f32.mrf.mxu2  ;;  %v3527_v18 = vpop.f32.mrf.mxu3  ;;  %v3485_v44 = vadd.f32 %v3484_v36, %v3462_v34 }
 0xaea   : > { %v3505_v3 = vadd.f32 %v3504_v2, %v3482_v1 }
 0xaec   : > { %v3528_v15 = vadd.f32 %v3527_v18, %v3505_v3 }
 0xaee   : > { %4248 = vst [vmem:[%s5887_s27 + $0x48] sm:$0xff] %v3528_v15 }
 0xaf3   : > { %v3507_v45 = vpop.f32.mrf.mxu2  ;;  %v3530_v60 = vpop.f32.mrf.mxu3 }
 0xaf4   : > { %v3508_v22 = vadd.f32 %v3507_v45, %v3485_v44 }
 0xaf6   : > { %v3531_v42 = vadd.f32 %v3530_v60, %v3508_v22 }
 0xaf8   : > { %4250 = vst [vmem:[%s5887_s27 + $0x58] sm:$0xff] %v3531_v42 }
 0xb00   : > { %v3691_v63 = vpop.f32.mrf.mxu0  ;;  %v3714_v43 = vpop.f32.mrf.mxu1 }
 0xb01   : > { %v3692_v12 = vadd.f32 %v3691_v63, %v3670_v26 }
 0xb03   : > { %v3715_v10 = vadd.f32 %v3714_v43, %v3692_v12 }
 0xb0a   : > { %v3694_v33 = vpop.f32.mrf.mxu0  ;;  %v3717_v39 = vpop.f32.mrf.mxu1 }
 0xb0b   : > { %v3695_v37 = vadd.f32 %v3694_v33, %v3670_v26 }
 0xb0d   : > { %v3737_v51 = vpop.f32.mrf.mxu2  ;;  %v3760_v48 = vpop.f32.mrf.mxu3  ;;  %v3718_v31 = vadd.f32 %v3717_v39, %v3695_v37 }
 0xb0e   : > { %v3738_v23 = vadd.f32 %v3737_v51, %v3715_v10 }
 0xb10   : > { %v3761_v29 = vadd.f32 %v3760_v48, %v3738_v23 }
 0xb12   : > { %4251 = vst [vmem:[%s5887_s27 + $0x60] sm:$0xff] %v3761_v29 }
 0xb17   : > { %v3740_v35 = vpop.f32.mrf.mxu2  ;;  %v3763_v40 = vpop.f32.mrf.mxu3 }
 0xb18   : > { %v3741_v58 = vadd.f32 %v3740_v35, %v3718_v31 }
 0xb1a   : > { %v3764_v21 = vadd.f32 %v3763_v40, %v3741_v58 }
 0xb1c   : > { %4253 = vst [vmem:[%s5887_s27 + $0x70] sm:$0xff] %v3764_v21 }
 0xb24   : > { %v3783_v16 = vpop.f32.mrf.mxu0  ;;  %v3806_v52 = vpop.f32.mrf.mxu1 }
 0xb25   : > { %v3784_v27 = vadd.f32 %v3783_v16, %v3671_v61 }
 0xb27   : > { %v3807_v13 = vadd.f32 %v3806_v52, %v3784_v27 }
 0xb2c   : > { %v3786_v47 = vpop.f32.mrf.mxu0  ;;  %v3809_v24 = vpop.f32.mrf.mxu1 }
 0xb2d   : > { %v3787_v41 = vadd.f32 %v3786_v47, %v3671_v61 }
 0xb2f   : > { %v3810_v30 = vadd.f32 %v3809_v24, %v3787_v41 }
 0xb30   : > { %v3829_v49 = vpop.f32.mrf.mxu2  ;;  %v3852_v54 = vpop.f32.mrf.mxu3 }
 0xb31   : > { %v3830_v55 = vadd.f32 %v3829_v49, %v3807_v13 }
 0xb33   : > { %v3853_v28 = vadd.f32 %v3852_v54, %v3830_v55 }
 0xb35   : > { %4252 = vst [vmem:[%s5887_s27 + $0x68] sm:$0xff] %v3853_v28 }
 0xb38   : > { %v3832_v7 = vpop.f32.mrf.mxu2  ;;  %v3855_v38 = vpop.f32.mrf.mxu3 }
 0xb39   : > { %v3833_v8 = vadd.f32 %v3832_v7, %v3810_v30 }
 0xb3b   : > { %v3856_v62 = vadd.f32 %v3855_v38, %v3833_v8 }
 0xb3d   : > { %4254 = vst [vmem:[%s5887_s27 + $0x78] sm:$0xff] %v3856_v62 }
 0xb3e   : > { %4934 = shalt.err (!%p4931_p8)
}
 0xb3f   : > { %s5023_s28 = smov 256   ;;  %s5024_s27 = smov 16  }
 0xb40   : > { %4323 = dma.vmem_to_hbm [thread:$0]  (%p5148_p5), %s3877_s16, 2048, %s3879_s29, %s3864_s25, %s5023_s28, %s5023_s28, %s5024_s27  }
 0xb41 PF: > { %s6064_s17 = sld [smem:[#allocation36_spill]] }
 0xb42   : > { %s6065_s0 = sld [smem:[#allocation34_spill]] }
 0xb47   : > { %p4395_p9 = scmp.ge.s32.totalorder %s6064_s17, 2 }
 0xb48   : > { %s3893_s21 = sand.u32 1, %s6065_s0  }
 0xb49   : > { %p4366_p10 = pnand %p4395_p9, %p5152_p6  ;;  %s3894_s23 = scalar_lea.sflag [#allocation6], %s3893_s21 }
 0xb4b   : > { %p4367_p11 = pneg %p4366_p10 }
 0xb4d   : > { %4980 = dma.done.wait (%p4367_p11), %s3894_s23, 2048  }
 0xb4e   : > { %4982 = vsyncadd (%p4367_p11), %s3894_s23, 4294965248  ;;  %s6067_s24 = sld [smem:[#allocation37_spill]]  ;;  %s6070_s21 = smov %s4989_s22 }
 0xb4f   : > { %s6068_s19 = sld [smem:[#allocation35_spill]] }
 0xb50   : > { %s6069_s23 = sld [smem:[#allocation38_spill]] }
 0xb54   : > { %p33_p12 = scmp.ge.s32.totalorder %s6067_s24, 4  }
 0xb55   : > { %s6071_s22 = smov %s6068_s19 }
 0xb56   :  { %35 = sbr.rel (!%p33_p12) target bundleno = 17 (0x11), region = 208 }
 0xb5b   :  { %3900 = vsyncpa [#allocation5], 1 }
 0xb5c   :  { %3902 = vsyncpa [#allocation5 + $0x1], 1 }
 0xb5d   :  { %3903 = vsyncpa [#allocation8], 1 }
 0xb5e   :  { %3904 = vsyncpa [#allocation11], 1 }
 0xb5f   :  { %3905 = vsyncpa [#allocation14], 1 }
 0xb60   :  { %3906 = vsyncpa [#allocation17], 1 }
 0xb61   :  { %3907 = vsyncpa [#allocation20], 1 }
 0xb62   :  { %3908 = vsyncpa [#allocation23], 1 }
 0xb63   :  { %3909 = vsyncpa [#allocation6], 1 }
 0xb64   :  { %3911 = vsyncpa [#allocation6 + $0x1], 1 }

</bundles_post_ra>
